<compile_context>
chip_gen: v6e
topology: v6e:2x2x1
jax: 0.10.0
libtpu: 0.0.40
codegen_flags: <defaults>
</compile_context>

<pallas_src>
import jax
import jax.numpy as jnp
import numpy as np
from jax import lax
from jax.experimental import pallas as pl
from jax.experimental.pallas import tpu as pltpu


def _flat_dilations(d_r):
    return [d for grp in d_r for d in grp]


# ----------------------------------------------------------------------------
# Fused ResBlock kernel (all 6 leaky_relu->dilated-conv layers + 3 residual adds)
# ----------------------------------------------------------------------------
def make_fused_resblock_kernel(d_r, k_r, t_tile, halo_left, t_real, w0, channels):
    d_flat = _flat_dilations(d_r)
    n_layers = len(d_flat)

    def kernel(x_ref, w_ref, b_ref, o_ref):
        C = channels
        # Start of this tile's input window in padded coordinates (128-aligned).
        t0 = pl.multiple_of(pl.program_id(1) * t_tile, 128)

        # (C, w0) input window = output tile + cumulative dilation halo.
        cur = x_ref[0, :, pl.ds(t0, w0)].astype(jnp.float32)

        # Hoisted validity row: global column of window col j is (t0 - hl) + j.
        # Built ONCE per tile on a single sublane; each layer only applies a
        # broadcast select with a static slice of it.
        gcol = (t0 - halo_left) + lax.broadcasted_iota(jnp.int32, (1, w0), 1)
        valid = (gcol >= 0) & (gcol < t_real)            # (1, w0) bool

        li = 0          # flat layer index
        off = 0         # left halo columns consumed so far (window coords)
        for dils in d_r:
            res = cur                 # residual = pre-activation group input
            res_off = off
            for d in dils:
                left = d * (k_r - 1) // 2
                w_out = cur.shape[1] - d * (k_r - 1)

                # leaky_relu(0.1) on the VPU, in f32 (zeros in the halo stay 0).
                a = jnp.where(cur >= 0, cur, jnp.float32(0.1) * cur)
                a = a.astype(jnp.bfloat16)

                # K accumulating per-tap MXU dots, no staging concat:
                #   y = b + sum_k W_k @ a[:, k*d : k*d + w_out]
                acc = jnp.dot(w_ref[li, 0], a[:, 0:w_out],
                              preferred_element_type=jnp.float32)
                for k in range(1, k_r):
                    acc = acc + jnp.dot(w_ref[li, k],
                                        a[:, k * d:k * d + w_out],
                                        preferred_element_type=jnp.float32)
                y = acc + b_ref[li]                      # (C, 1) bias broadcast

                off += left

                # Reproduce per-layer 'same' ZERO padding exactly: columns whose
                # global index lies outside [0, T) must be zero before they feed
                # the next conv.  Skipped on the very last layer: its halo /
                # round-up columns never feed another conv and are discarded by
                # the wrapper slice to T (residual operand is already zero there).
                if li < n_layers - 1:
                    y = jnp.where(valid[:, off:off + w_out], y, 0.0)

                cur = y
                li += 1

            # Residual add at the end of each dilation group (module: x += res).
            delta = off - res_off
            cur = cur + res[:, delta:delta + cur.shape[1]]

        o_ref[0] = cur.astype(o_ref.dtype)

    return kernel


def resblock_forward(x, w_stack, b_stack, d_r, k_r, *, t_tile=512,
                     out_dtype=jnp.float32):
    """x: (B, C, T) float32.  w_stack: (L, K, C, C) bf16 per-tap weights.
    b_stack: (L, C, 1) f32.  Returns (B, C, T) in out_dtype."""
    B, C, T = x.shape
    d_flat = _flat_dilations(d_r)
    L = len(d_flat)
    lefts = [d * (k_r - 1) // 2 for d in d_flat]
    rights = [d * (k_r - 1) - l for d, l in zip(d_flat, lefts)]
    hl, hr = sum(lefts), sum(rights)

    # Large tiles (512) amortize the ~0.35us/step overhead and widen the matmul
    # N dim; clamp to the rounded-up T, keep a multiple of 128.  For very short
    # T on v7x, prefer a smaller t_tile so B*nt still gives each TC >= ~8 steps.
    t_tile = max(128, min(t_tile, -(-T // 128) * 128))
    nt = -(-T // t_tile)                  # ceil(T / t_tile)
    t_round = nt * t_tile
    w0 = t_tile + hl + hr                 # per-tile input window width

    # ONE pad for the whole fused block (halo + tile round-up), in bf16.
    # allow_input_fusion below lets XLA fuse this pad/cast into the kernel call
    # instead of materializing an extra HBM pass.
    x_pad = jnp.pad(x.astype(jnp.bfloat16),
                    ((0, 0), (0, 0), (hl, hr + t_round - T)))
    t_padded = t_round + hl + hr

    kernel = make_fused_resblock_kernel(d_r, k_r, t_tile, hl, T, w0, C)

    flops = 2 * B * L * C * C * k_r * t_round
    bytes_accessed = int(x_pad.size * 2 + w_stack.size * 2 + b_stack.size * 4
                         + B * C * t_round * jnp.dtype(out_dtype).itemsize)

    out = pl.pallas_call(
        kernel,
        out_shape=jax.ShapeDtypeStruct((B, C, t_round), out_dtype),
        grid=(B, nt),
        in_specs=[
            # Padded input: block index independent of the time-tile index ->
            # DMA'd once per batch item, reused across all its time tiles.
            # (Demo-sized; see TODO(synk) for production C/T.)
            pl.BlockSpec((1, C, t_padded), lambda b, t: (b, 0, 0)),
            pl.BlockSpec((L, k_r, C, C), lambda b, t: (0, 0, 0, 0)),
            pl.BlockSpec((L, C, 1), lambda b, t: (0, 0, 0)),
        ],
        out_specs=pl.BlockSpec((1, C, t_tile), lambda b, t: (b, 0, t)),
        compiler_params=pltpu.CompilerParams(
            dimension_semantics=("parallel", "parallel"),
            vmem_limit_bytes=32 * 1024 * 1024,
            allow_input_fusion=[True, False, False],
        ),
        cost_estimate=pl.CostEstimate(flops=flops, transcendentals=0,
                                      bytes_accessed=bytes_accessed),
    )(x_pad, w_stack, b_stack)

    return out[:, :, :T] if t_round != T else out


# ----------------------------------------------------------------------------
# Parameters: weight_norm (w = g * v / ||v||) folded into effective weights,
# then one-time prep: per-tap (L, K, C_out, C_in) layout, bf16 cast.
# ----------------------------------------------------------------------------
def init_resblock_params(key, channels, d_r, k_r):
    params = []
    for dils in d_r:
        for _ in dils:
            key, kv, kg, kb = jax.random.split(key, 4)
            v = jax.random.normal(kv, (channels, channels, k_r), jnp.float32) * 0.1
            g = jax.random.uniform(kg, (channels, 1, 1), jnp.float32,
                                   minval=0.5, maxval=1.5)
            norm = jnp.sqrt(jnp.sum(v * v, axis=(1, 2), keepdims=True))
            w = g * v / norm                      # effective weight_norm weight
            b = jax.random.normal(kb, (channels,), jnp.float32) * 0.01
            params.append((w, b))
    return params


def prepare_resblock_params(params, channels, k_r):
    ws, bs = [], []
    for w, b in params:
        # (C_out, C_in, K) -> (K, C_out, C_in): each tap is a lane-aligned
        # (C, C) tile the kernel can feed straight to the MXU.
        ws.append(jnp.transpose(w, (2, 0, 1)).astype(jnp.bfloat16))
        bs.append(b.reshape(channels, 1).astype(jnp.float32))
    return jnp.stack(ws), jnp.stack(bs)


# ----------------------------------------------------------------------------
# Pure-JAX reference (optionally emulating the kernel's bf16 rounding)
# ----------------------------------------------------------------------------
def resblock_reference(x, params, d_r, k_r, *, bf16_activations=False):
    i = 0
    for dils in d_r:
        res = x
        for d in dils:
            w, b = params[i]
            a = jnp.where(x >= 0, x, 0.1 * x)
            if bf16_activations:
                a = a.astype(jnp.bfloat16).astype(jnp.float32)
            total = d * (k_r - 1)
            left = total // 2
            y = lax.conv_general_dilated(
                a, w, window_strides=(1,), padding=[(left, total - left)],
                rhs_dilation=(d,), dimension_numbers=("NCH", "OIH", "NCH"))
            x = y + b.reshape(1, -1, 1)
            i += 1
        x = x + res
    return x


if __name__ == "__main__":
    # Small but representative HiFi-GAN ResBlock config.  T is deliberately not
    # a multiple of 128 to exercise the round-up / boundary-mask path.
    channels = 32
    k_r = 3
    d_r = [[1, 1], [3, 1], [5, 1]]
    B, T = 2, 1000

    key = jax.random.PRNGKey(0)
    key, kx = jax.random.split(key)
    x = jax.random.normal(kx, (B, channels, T), jnp.float32)
    params = init_resblock_params(key, channels, d_r, k_r)

    w_stack, b_stack = prepare_resblock_params(params, channels, k_r)
    out = resblock_forward(x, w_stack, b_stack, d_r, k_r, t_tile=512)
    out = np.asarray(jax.block_until_ready(out), np.float32)
    assert out.shape == (B, channels, T)

    # Strict structural check: reference with the same bf16 rounding of the
    # input, weights and per-layer activations (fp32 accumulation everywhere).
    params_b = [(w.astype(jnp.bfloat16).astype(jnp.float32), b) for w, b in params]
    x_b = x.astype(jnp.bfloat16).astype(jnp.float32)
    ref_strict = np.asarray(resblock_reference(x_b, params_b, d_r, k_r,
                                               bf16_activations=True))
    np.testing.assert_allclose(out, ref_strict, rtol=2e-3, atol=2e-3)

    # Loose sanity check against the pure fp32 reference (bf16 compute path).
    ref_f32 = np.asarray(resblock_reference(x, params, d_r, k_r))
    np.testing.assert_allclose(out, ref_f32, rtol=5e-2, atol=1e-1)

    print("KERNEL_OK")
</pallas_src>

<mosaic_0001>
module attributes {stable_mosaic.version = 11 : i64} {
  func.func @kernel(%arg0: i32, %arg1: i32, %arg2: memref<1x32x1048xbf16, #tpu.memory_space<vmem>>, %arg3: memref<6x3x32x32xbf16, #tpu.memory_space<vmem>>, %arg4: memref<6x32x1xf32, #tpu.memory_space<vmem>>, %arg5: memref<1x32x512xf32, #tpu.memory_space<vmem>>) attributes {dimension_semantics = [#tpu.dimension_semantics<parallel>, #tpu.dimension_semantics<parallel>], iteration_bounds = array<i64: 2, 2>, scalar_prefetch = 0 : i64, scratch_operands = 0 : i64, tpu.core_type = #tpu.core_type<tc>, window_params = [{transform_indices = @transform_0, window_bounds = array<i64: 1, 32, 1048>}, {pipeline_mode = #tpu.pipeline_mode<synchronous>, transform_indices = @transform_1, window_bounds = array<i64: 6, 3, 32, 32>}, {pipeline_mode = #tpu.pipeline_mode<synchronous>, transform_indices = @transform_2, window_bounds = array<i64: 6, 32, 1>}, {transform_indices = @transform_3, window_bounds = array<i64: 1, 32, 512>}]} {
    %c512_i32 = arith.constant 512 : i32
    %0 = arith.muli %arg1, %c512_i32 : i32
    %1 = tpu.assume_multiple %0, 128 : i32
    %c0 = arith.constant 0 : index
    %c0_0 = arith.constant 0 : index
    %2 = arith.index_cast %1 : i32 to index
    %3 = vector.load %arg2[%c0, %c0_0, %2] : memref<1x32x1048xbf16, #tpu.memory_space<vmem>>, vector<1x32x536xbf16>
    %4 = vector.shape_cast %3 : vector<1x32x536xbf16> to vector<32x536xbf16>
    %5 = arith.extf %4 : vector<32x536xbf16> to vector<32x536xf32>
    %c12_i32 = arith.constant 12 : i32
    %6 = arith.subi %1, %c12_i32 : i32
    %7 = tpu.iota {dimensions = array<i32: 1>} : vector<1x536xi32>
    %8 = vector.broadcast %6 : i32 to vector<1x536xi32>
    %9 = arith.addi %8, %7 : vector<1x536xi32>
    %c0_i32 = arith.constant 0 : i32
    %10 = vector.broadcast %c0_i32 : i32 to vector<1x536xi32>
    %11 = arith.cmpi sge, %9, %10 : vector<1x536xi32>
    %c1000_i32 = arith.constant 1000 : i32
    %12 = vector.broadcast %c1000_i32 : i32 to vector<1x536xi32>
    %13 = arith.cmpi slt, %9, %12 : vector<1x536xi32>
    %14 = arith.andi %11, %13 : vector<1x536xi1>
    %cst = arith.constant 0.000000e+00 : f32
    %15 = vector.broadcast %cst : f32 to vector<32x536xf32>
    %16 = arith.cmpf oge, %5, %15 : vector<32x536xf32>
    %cst_1 = arith.constant 1.000000e-01 : f32
    %17 = vector.broadcast %cst_1 : f32 to vector<32x536xf32>
    %18 = arith.mulf %17, %5 : vector<32x536xf32>
    %19 = arith.select %16, %5, %18 : vector<32x536xi1>, vector<32x536xf32>
    %20 = arith.truncf %19 : vector<32x536xf32> to vector<32x536xbf16>
    %c0_2 = arith.constant 0 : index
    %c0_3 = arith.constant 0 : index
    %c0_4 = arith.constant 0 : index
    %c0_5 = arith.constant 0 : index
    %21 = vector.load %arg3[%c0_2, %c0_3, %c0_4, %c0_5] : memref<6x3x32x32xbf16, #tpu.memory_space<vmem>>, vector<1x1x32x32xbf16>
    %22 = vector.shape_cast %21 : vector<1x1x32x32xbf16> to vector<32x32xbf16>
    %23 = vector.extract_strided_slice %20 {offsets = [0, 0], sizes = [32, 534], strides = [1, 1]} : vector<32x536xbf16> to vector<32x534xbf16>
    %cst_6 = arith.constant dense<0.000000e+00> : vector<32x534xf32>
    %24 = tpu.matmul %22, %23, %cst_6 {dimension_numbers = #tpu.dot_dimension_numbers<[1], [0], [0], [1], [0, 0, 1, 1], [], []>} : vector<32x32xbf16>, vector<32x534xbf16>, vector<32x534xf32> -> vector<32x534xf32>
    %c0_7 = arith.constant 0 : index
    %c1 = arith.constant 1 : index
    %c0_8 = arith.constant 0 : index
    %c0_9 = arith.constant 0 : index
    %25 = vector.load %arg3[%c0_7, %c1, %c0_8, %c0_9] : memref<6x3x32x32xbf16, #tpu.memory_space<vmem>>, vector<1x1x32x32xbf16>
    %26 = vector.shape_cast %25 : vector<1x1x32x32xbf16> to vector<32x32xbf16>
    %27 = vector.extract_strided_slice %20 {offsets = [0, 1], sizes = [32, 534], strides = [1, 1]} : vector<32x536xbf16> to vector<32x534xbf16>
    %cst_10 = arith.constant dense<0.000000e+00> : vector<32x534xf32>
    %28 = tpu.matmul %26, %27, %cst_10 {dimension_numbers = #tpu.dot_dimension_numbers<[1], [0], [0], [1], [0, 0, 1, 1], [], []>} : vector<32x32xbf16>, vector<32x534xbf16>, vector<32x534xf32> -> vector<32x534xf32>
    %29 = arith.addf %24, %28 : vector<32x534xf32>
    %c0_11 = arith.constant 0 : index
    %c2 = arith.constant 2 : index
    %c0_12 = arith.constant 0 : index
    %c0_13 = arith.constant 0 : index
    %30 = vector.load %arg3[%c0_11, %c2, %c0_12, %c0_13] : memref<6x3x32x32xbf16, #tpu.memory_space<vmem>>, vector<1x1x32x32xbf16>
    %31 = vector.shape_cast %30 : vector<1x1x32x32xbf16> to vector<32x32xbf16>
    %32 = vector.extract_strided_slice %20 {offsets = [0, 2], sizes = [32, 534], strides = [1, 1]} : vector<32x536xbf16> to vector<32x534xbf16>
    %cst_14 = arith.constant dense<0.000000e+00> : vector<32x534xf32>
    %33 = tpu.matmul %31, %32, %cst_14 {dimension_numbers = #tpu.dot_dimension_numbers<[1], [0], [0], [1], [0, 0, 1, 1], [], []>} : vector<32x32xbf16>, vector<32x534xbf16>, vector<32x534xf32> -> vector<32x534xf32>
    %34 = arith.addf %29, %33 : vector<32x534xf32>
    %c0_15 = arith.constant 0 : index
    %c0_16 = arith.constant 0 : index
    %c0_17 = arith.constant 0 : index
    %35 = vector.load %arg4[%c0_15, %c0_16, %c0_17] : memref<6x32x1xf32, #tpu.memory_space<vmem>>, vector<1x32x1xf32>
    %36 = vector.shape_cast %35 : vector<1x32x1xf32> to vector<32x1xf32>
    %37 = vector.broadcast %36 : vector<32x1xf32> to vector<32x534xf32>
    %38 = arith.addf %34, %37 : vector<32x534xf32>
    %39 = vector.extract_strided_slice %14 {offsets = [0, 1], sizes = [1, 534], strides = [1, 1]} : vector<1x536xi1> to vector<1x534xi1>
    %cst_18 = arith.constant 0.000000e+00 : f32
    %40 = vector.shape_cast %39 : vector<1x534xi1> to vector<1x534xi1>
    %41 = vector.broadcast %40 : vector<1x534xi1> to vector<32x534xi1>
    %42 = vector.broadcast %cst_18 : f32 to vector<32x534xf32>
    %43 = arith.select %41, %38, %42 : vector<32x534xi1>, vector<32x534xf32>
    %cst_19 = arith.constant 0.000000e+00 : f32
    %44 = vector.broadcast %cst_19 : f32 to vector<32x534xf32>
    %45 = arith.cmpf oge, %43, %44 : vector<32x534xf32>
    %cst_20 = arith.constant 1.000000e-01 : f32
    %46 = vector.broadcast %cst_20 : f32 to vector<32x534xf32>
    %47 = arith.mulf %46, %43 : vector<32x534xf32>
    %48 = arith.select %45, %43, %47 : vector<32x534xi1>, vector<32x534xf32>
    %49 = arith.truncf %48 : vector<32x534xf32> to vector<32x534xbf16>
    %c1_21 = arith.constant 1 : index
    %c0_22 = arith.constant 0 : index
    %c0_23 = arith.constant 0 : index
    %c0_24 = arith.constant 0 : index
    %50 = vector.load %arg3[%c1_21, %c0_22, %c0_23, %c0_24] : memref<6x3x32x32xbf16, #tpu.memory_space<vmem>>, vector<1x1x32x32xbf16>
    %51 = vector.shape_cast %50 : vector<1x1x32x32xbf16> to vector<32x32xbf16>
    %52 = vector.extract_strided_slice %49 {offsets = [0, 0], sizes = [32, 532], strides = [1, 1]} : vector<32x534xbf16> to vector<32x532xbf16>
    %cst_25 = arith.constant dense<0.000000e+00> : vector<32x532xf32>
    %53 = tpu.matmul %51, %52, %cst_25 {dimension_numbers = #tpu.dot_dimension_numbers<[1], [0], [0], [1], [0, 0, 1, 1], [], []>} : vector<32x32xbf16>, vector<32x532xbf16>, vector<32x532xf32> -> vector<32x532xf32>
    %c1_26 = arith.constant 1 : index
    %c1_27 = arith.constant 1 : index
    %c0_28 = arith.constant 0 : index
    %c0_29 = arith.constant 0 : index
    %54 = vector.load %arg3[%c1_26, %c1_27, %c0_28, %c0_29] : memref<6x3x32x32xbf16, #tpu.memory_space<vmem>>, vector<1x1x32x32xbf16>
    %55 = vector.shape_cast %54 : vector<1x1x32x32xbf16> to vector<32x32xbf16>
    %56 = vector.extract_strided_slice %49 {offsets = [0, 1], sizes = [32, 532], strides = [1, 1]} : vector<32x534xbf16> to vector<32x532xbf16>
    %cst_30 = arith.constant dense<0.000000e+00> : vector<32x532xf32>
    %57 = tpu.matmul %55, %56, %cst_30 {dimension_numbers = #tpu.dot_dimension_numbers<[1], [0], [0], [1], [0, 0, 1, 1], [], []>} : vector<32x32xbf16>, vector<32x532xbf16>, vector<32x532xf32> -> vector<32x532xf32>
    %58 = arith.addf %53, %57 : vector<32x532xf32>
    %c1_31 = arith.constant 1 : index
    %c2_32 = arith.constant 2 : index
    %c0_33 = arith.constant 0 : index
    %c0_34 = arith.constant 0 : index
    %59 = vector.load %arg3[%c1_31, %c2_32, %c0_33, %c0_34] : memref<6x3x32x32xbf16, #tpu.memory_space<vmem>>, vector<1x1x32x32xbf16>
    %60 = vector.shape_cast %59 : vector<1x1x32x32xbf16> to vector<32x32xbf16>
    %61 = vector.extract_strided_slice %49 {offsets = [0, 2], sizes = [32, 532], strides = [1, 1]} : vector<32x534xbf16> to vector<32x532xbf16>
    %cst_35 = arith.constant dense<0.000000e+00> : vector<32x532xf32>
    %62 = tpu.matmul %60, %61, %cst_35 {dimension_numbers = #tpu.dot_dimension_numbers<[1], [0], [0], [1], [0, 0, 1, 1], [], []>} : vector<32x32xbf16>, vector<32x532xbf16>, vector<32x532xf32> -> vector<32x532xf32>
    %63 = arith.addf %58, %62 : vector<32x532xf32>
    %c1_36 = arith.constant 1 : index
    %c0_37 = arith.constant 0 : index
    %c0_38 = arith.constant 0 : index
    %64 = vector.load %arg4[%c1_36, %c0_37, %c0_38] : memref<6x32x1xf32, #tpu.memory_space<vmem>>, vector<1x32x1xf32>
    %65 = vector.shape_cast %64 : vector<1x32x1xf32> to vector<32x1xf32>
    %66 = vector.broadcast %65 : vector<32x1xf32> to vector<32x532xf32>
    %67 = arith.addf %63, %66 : vector<32x532xf32>
    %68 = vector.extract_strided_slice %14 {offsets = [0, 2], sizes = [1, 532], strides = [1, 1]} : vector<1x536xi1> to vector<1x532xi1>
    %cst_39 = arith.constant 0.000000e+00 : f32
    %69 = vector.shape_cast %68 : vector<1x532xi1> to vector<1x532xi1>
    %70 = vector.broadcast %69 : vector<1x532xi1> to vector<32x532xi1>
    %71 = vector.broadcast %cst_39 : f32 to vector<32x532xf32>
    %72 = arith.select %70, %67, %71 : vector<32x532xi1>, vector<32x532xf32>
    %73 = vector.extract_strided_slice %5 {offsets = [0, 2], sizes = [32, 532], strides = [1, 1]} : vector<32x536xf32> to vector<32x532xf32>
    %74 = arith.addf %72, %73 : vector<32x532xf32>
    %cst_40 = arith.constant 0.000000e+00 : f32
    %75 = vector.broadcast %cst_40 : f32 to vector<32x532xf32>
    %76 = arith.cmpf oge, %74, %75 : vector<32x532xf32>
    %cst_41 = arith.constant 1.000000e-01 : f32
    %77 = vector.broadcast %cst_41 : f32 to vector<32x532xf32>
    %78 = arith.mulf %77, %74 : vector<32x532xf32>
    %79 = arith.select %76, %74, %78 : vector<32x532xi1>, vector<32x532xf32>
    %80 = arith.truncf %79 : vector<32x532xf32> to vector<32x532xbf16>
    %c2_42 = arith.constant 2 : index
    %c0_43 = arith.constant 0 : index
    %c0_44 = arith.constant 0 : index
    %c0_45 = arith.constant 0 : index
    %81 = vector.load %arg3[%c2_42, %c0_43, %c0_44, %c0_45] : memref<6x3x32x32xbf16, #tpu.memory_space<vmem>>, vector<1x1x32x32xbf16>
    %82 = vector.shape_cast %81 : vector<1x1x32x32xbf16> to vector<32x32xbf16>
    %83 = vector.extract_strided_slice %80 {offsets = [0, 0], sizes = [32, 526], strides = [1, 1]} : vector<32x532xbf16> to vector<32x526xbf16>
    %cst_46 = arith.constant dense<0.000000e+00> : vector<32x526xf32>
    %84 = tpu.matmul %82, %83, %cst_46 {dimension_numbers = #tpu.dot_dimension_numbers<[1], [0], [0], [1], [0, 0, 1, 1], [], []>} : vector<32x32xbf16>, vector<32x526xbf16>, vector<32x526xf32> -> vector<32x526xf32>
    %c2_47 = arith.constant 2 : index
    %c1_48 = arith.constant 1 : index
    %c0_49 = arith.constant 0 : index
    %c0_50 = arith.constant 0 : index
    %85 = vector.load %arg3[%c2_47, %c1_48, %c0_49, %c0_50] : memref<6x3x32x32xbf16, #tpu.memory_space<vmem>>, vector<1x1x32x32xbf16>
    %86 = vector.shape_cast %85 : vector<1x1x32x32xbf16> to vector<32x32xbf16>
    %87 = vector.extract_strided_slice %80 {offsets = [0, 3], sizes = [32, 526], strides = [1, 1]} : vector<32x532xbf16> to vector<32x526xbf16>
    %cst_51 = arith.constant dense<0.000000e+00> : vector<32x526xf32>
    %88 = tpu.matmul %86, %87, %cst_51 {dimension_numbers = #tpu.dot_dimension_numbers<[1], [0], [0], [1], [0, 0, 1, 1], [], []>} : vector<32x32xbf16>, vector<32x526xbf16>, vector<32x526xf32> -> vector<32x526xf32>
    %89 = arith.addf %84, %88 : vector<32x526xf32>
    %c2_52 = arith.constant 2 : index
    %c2_53 = arith.constant 2 : index
    %c0_54 = arith.constant 0 : index
    %c0_55 = arith.constant 0 : index
    %90 = vector.load %arg3[%c2_52, %c2_53, %c0_54, %c0_55] : memref<6x3x32x32xbf16, #tpu.memory_space<vmem>>, vector<1x1x32x32xbf16>
    %91 = vector.shape_cast %90 : vector<1x1x32x32xbf16> to vector<32x32xbf16>
    %92 = vector.extract_strided_slice %80 {offsets = [0, 6], sizes = [32, 526], strides = [1, 1]} : vector<32x532xbf16> to vector<32x526xbf16>
    %cst_56 = arith.constant dense<0.000000e+00> : vector<32x526xf32>
    %93 = tpu.matmul %91, %92, %cst_56 {dimension_numbers = #tpu.dot_dimension_numbers<[1], [0], [0], [1], [0, 0, 1, 1], [], []>} : vector<32x32xbf16>, vector<32x526xbf16>, vector<32x526xf32> -> vector<32x526xf32>
    %94 = arith.addf %89, %93 : vector<32x526xf32>
    %c2_57 = arith.constant 2 : index
    %c0_58 = arith.constant 0 : index
    %c0_59 = arith.constant 0 : index
    %95 = vector.load %arg4[%c2_57, %c0_58, %c0_59] : memref<6x32x1xf32, #tpu.memory_space<vmem>>, vector<1x32x1xf32>
    %96 = vector.shape_cast %95 : vector<1x32x1xf32> to vector<32x1xf32>
    %97 = vector.broadcast %96 : vector<32x1xf32> to vector<32x526xf32>
    %98 = arith.addf %94, %97 : vector<32x526xf32>
    %99 = vector.extract_strided_slice %14 {offsets = [0, 5], sizes = [1, 526], strides = [1, 1]} : vector<1x536xi1> to vector<1x526xi1>
    %cst_60 = arith.constant 0.000000e+00 : f32
    %100 = vector.shape_cast %99 : vector<1x526xi1> to vector<1x526xi1>
    %101 = vector.broadcast %100 : vector<1x526xi1> to vector<32x526xi1>
    %102 = vector.broadcast %cst_60 : f32 to vector<32x526xf32>
    %103 = arith.select %101, %98, %102 : vector<32x526xi1>, vector<32x526xf32>
    %cst_61 = arith.constant 0.000000e+00 : f32
    %104 = vector.broadcast %cst_61 : f32 to vector<32x526xf32>
    %105 = arith.cmpf oge, %103, %104 : vector<32x526xf32>
    %cst_62 = arith.constant 1.000000e-01 : f32
    %106 = vector.broadcast %cst_62 : f32 to vector<32x526xf32>
    %107 = arith.mulf %106, %103 : vector<32x526xf32>
    %108 = arith.select %105, %103, %107 : vector<32x526xi1>, vector<32x526xf32>
    %109 = arith.truncf %108 : vector<32x526xf32> to vector<32x526xbf16>
    %c3 = arith.constant 3 : index
    %c0_63 = arith.constant 0 : index
    %c0_64 = arith.constant 0 : index
    %c0_65 = arith.constant 0 : index
    %110 = vector.load %arg3[%c3, %c0_63, %c0_64, %c0_65] : memref<6x3x32x32xbf16, #tpu.memory_space<vmem>>, vector<1x1x32x32xbf16>
    %111 = vector.shape_cast %110 : vector<1x1x32x32xbf16> to vector<32x32xbf16>
    %112 = vector.extract_strided_slice %109 {offsets = [0, 0], sizes = [32, 524], strides = [1, 1]} : vector<32x526xbf16> to vector<32x524xbf16>
    %cst_66 = arith.constant dense<0.000000e+00> : vector<32x524xf32>
    %113 = tpu.matmul %111, %112, %cst_66 {dimension_numbers = #tpu.dot_dimension_numbers<[1], [0], [0], [1], [0, 0, 1, 1], [], []>} : vector<32x32xbf16>, vector<32x524xbf16>, vector<32x524xf32> -> vector<32x524xf32>
    %c3_67 = arith.constant 3 : index
    %c1_68 = arith.constant 1 : index
    %c0_69 = arith.constant 0 : index
    %c0_70 = arith.constant 0 : index
    %114 = vector.load %arg3[%c3_67, %c1_68, %c0_69, %c0_70] : memref<6x3x32x32xbf16, #tpu.memory_space<vmem>>, vector<1x1x32x32xbf16>
    %115 = vector.shape_cast %114 : vector<1x1x32x32xbf16> to vector<32x32xbf16>
    %116 = vector.extract_strided_slice %109 {offsets = [0, 1], sizes = [32, 524], strides = [1, 1]} : vector<32x526xbf16> to vector<32x524xbf16>
    %cst_71 = arith.constant dense<0.000000e+00> : vector<32x524xf32>
    %117 = tpu.matmul %115, %116, %cst_71 {dimension_numbers = #tpu.dot_dimension_numbers<[1], [0], [0], [1], [0, 0, 1, 1], [], []>} : vector<32x32xbf16>, vector<32x524xbf16>, vector<32x524xf32> -> vector<32x524xf32>
    %118 = arith.addf %113, %117 : vector<32x524xf32>
    %c3_72 = arith.constant 3 : index
    %c2_73 = arith.constant 2 : index
    %c0_74 = arith.constant 0 : index
    %c0_75 = arith.constant 0 : index
    %119 = vector.load %arg3[%c3_72, %c2_73, %c0_74, %c0_75] : memref<6x3x32x32xbf16, #tpu.memory_space<vmem>>, vector<1x1x32x32xbf16>
    %120 = vector.shape_cast %119 : vector<1x1x32x32xbf16> to vector<32x32xbf16>
    %121 = vector.extract_strided_slice %109 {offsets = [0, 2], sizes = [32, 524], strides = [1, 1]} : vector<32x526xbf16> to vector<32x524xbf16>
    %cst_76 = arith.constant dense<0.000000e+00> : vector<32x524xf32>
    %122 = tpu.matmul %120, %121, %cst_76 {dimension_numbers = #tpu.dot_dimension_numbers<[1], [0], [0], [1], [0, 0, 1, 1], [], []>} : vector<32x32xbf16>, vector<32x524xbf16>, vector<32x524xf32> -> vector<32x524xf32>
    %123 = arith.addf %118, %122 : vector<32x524xf32>
    %c3_77 = arith.constant 3 : index
    %c0_78 = arith.constant 0 : index
    %c0_79 = arith.constant 0 : index
    %124 = vector.load %arg4[%c3_77, %c0_78, %c0_79] : memref<6x32x1xf32, #tpu.memory_space<vmem>>, vector<1x32x1xf32>
    %125 = vector.shape_cast %124 : vector<1x32x1xf32> to vector<32x1xf32>
    %126 = vector.broadcast %125 : vector<32x1xf32> to vector<32x524xf32>
    %127 = arith.addf %123, %126 : vector<32x524xf32>
    %128 = vector.extract_strided_slice %14 {offsets = [0, 6], sizes = [1, 524], strides = [1, 1]} : vector<1x536xi1> to vector<1x524xi1>
    %cst_80 = arith.constant 0.000000e+00 : f32
    %129 = vector.shape_cast %128 : vector<1x524xi1> to vector<1x524xi1>
    %130 = vector.broadcast %129 : vector<1x524xi1> to vector<32x524xi1>
    %131 = vector.broadcast %cst_80 : f32 to vector<32x524xf32>
    %132 = arith.select %130, %127, %131 : vector<32x524xi1>, vector<32x524xf32>
    %133 = vector.extract_strided_slice %74 {offsets = [0, 4], sizes = [32, 524], strides = [1, 1]} : vector<32x532xf32> to vector<32x524xf32>
    %134 = arith.addf %132, %133 : vector<32x524xf32>
    %cst_81 = arith.constant 0.000000e+00 : f32
    %135 = vector.broadcast %cst_81 : f32 to vector<32x524xf32>
    %136 = arith.cmpf oge, %134, %135 : vector<32x524xf32>
    %cst_82 = arith.constant 1.000000e-01 : f32
    %137 = vector.broadcast %cst_82 : f32 to vector<32x524xf32>
    %138 = arith.mulf %137, %134 : vector<32x524xf32>
    %139 = arith.select %136, %134, %138 : vector<32x524xi1>, vector<32x524xf32>
    %140 = arith.truncf %139 : vector<32x524xf32> to vector<32x524xbf16>
    %c4 = arith.constant 4 : index
    %c0_83 = arith.constant 0 : index
    %c0_84 = arith.constant 0 : index
    %c0_85 = arith.constant 0 : index
    %141 = vector.load %arg3[%c4, %c0_83, %c0_84, %c0_85] : memref<6x3x32x32xbf16, #tpu.memory_space<vmem>>, vector<1x1x32x32xbf16>
    %142 = vector.shape_cast %141 : vector<1x1x32x32xbf16> to vector<32x32xbf16>
    %143 = vector.extract_strided_slice %140 {offsets = [0, 0], sizes = [32, 514], strides = [1, 1]} : vector<32x524xbf16> to vector<32x514xbf16>
    %cst_86 = arith.constant dense<0.000000e+00> : vector<32x514xf32>
    %144 = tpu.matmul %142, %143, %cst_86 {dimension_numbers = #tpu.dot_dimension_numbers<[1], [0], [0], [1], [0, 0, 1, 1], [], []>} : vector<32x32xbf16>, vector<32x514xbf16>, vector<32x514xf32> -> vector<32x514xf32>
    %c4_87 = arith.constant 4 : index
    %c1_88 = arith.constant 1 : index
    %c0_89 = arith.constant 0 : index
    %c0_90 = arith.constant 0 : index
    %145 = vector.load %arg3[%c4_87, %c1_88, %c0_89, %c0_90] : memref<6x3x32x32xbf16, #tpu.memory_space<vmem>>, vector<1x1x32x32xbf16>
    %146 = vector.shape_cast %145 : vector<1x1x32x32xbf16> to vector<32x32xbf16>
    %147 = vector.extract_strided_slice %140 {offsets = [0, 5], sizes = [32, 514], strides = [1, 1]} : vector<32x524xbf16> to vector<32x514xbf16>
    %cst_91 = arith.constant dense<0.000000e+00> : vector<32x514xf32>
    %148 = tpu.matmul %146, %147, %cst_91 {dimension_numbers = #tpu.dot_dimension_numbers<[1], [0], [0], [1], [0, 0, 1, 1], [], []>} : vector<32x32xbf16>, vector<32x514xbf16>, vector<32x514xf32> -> vector<32x514xf32>
    %149 = arith.addf %144, %148 : vector<32x514xf32>
    %c4_92 = arith.constant 4 : index
    %c2_93 = arith.constant 2 : index
    %c0_94 = arith.constant 0 : index
    %c0_95 = arith.constant 0 : index
    %150 = vector.load %arg3[%c4_92, %c2_93, %c0_94, %c0_95] : memref<6x3x32x32xbf16, #tpu.memory_space<vmem>>, vector<1x1x32x32xbf16>
    %151 = vector.shape_cast %150 : vector<1x1x32x32xbf16> to vector<32x32xbf16>
    %152 = vector.extract_strided_slice %140 {offsets = [0, 10], sizes = [32, 514], strides = [1, 1]} : vector<32x524xbf16> to vector<32x514xbf16>
    %cst_96 = arith.constant dense<0.000000e+00> : vector<32x514xf32>
    %153 = tpu.matmul %151, %152, %cst_96 {dimension_numbers = #tpu.dot_dimension_numbers<[1], [0], [0], [1], [0, 0, 1, 1], [], []>} : vector<32x32xbf16>, vector<32x514xbf16>, vector<32x514xf32> -> vector<32x514xf32>
    %154 = arith.addf %149, %153 : vector<32x514xf32>
    %c4_97 = arith.constant 4 : index
    %c0_98 = arith.constant 0 : index
    %c0_99 = arith.constant 0 : index
    %155 = vector.load %arg4[%c4_97, %c0_98, %c0_99] : memref<6x32x1xf32, #tpu.memory_space<vmem>>, vector<1x32x1xf32>
    %156 = vector.shape_cast %155 : vector<1x32x1xf32> to vector<32x1xf32>
    %157 = vector.broadcast %156 : vector<32x1xf32> to vector<32x514xf32>
    %158 = arith.addf %154, %157 : vector<32x514xf32>
    %159 = vector.extract_strided_slice %14 {offsets = [0, 11], sizes = [1, 514], strides = [1, 1]} : vector<1x536xi1> to vector<1x514xi1>
    %cst_100 = arith.constant 0.000000e+00 : f32
    %160 = vector.shape_cast %159 : vector<1x514xi1> to vector<1x514xi1>
    %161 = vector.broadcast %160 : vector<1x514xi1> to vector<32x514xi1>
    %162 = vector.broadcast %cst_100 : f32 to vector<32x514xf32>
    %163 = arith.select %161, %158, %162 : vector<32x514xi1>, vector<32x514xf32>
    %cst_101 = arith.constant 0.000000e+00 : f32
    %164 = vector.broadcast %cst_101 : f32 to vector<32x514xf32>
    %165 = arith.cmpf oge, %163, %164 : vector<32x514xf32>
    %cst_102 = arith.constant 1.000000e-01 : f32
    %166 = vector.broadcast %cst_102 : f32 to vector<32x514xf32>
    %167 = arith.mulf %166, %163 : vector<32x514xf32>
    %168 = arith.select %165, %163, %167 : vector<32x514xi1>, vector<32x514xf32>
    %169 = arith.truncf %168 : vector<32x514xf32> to vector<32x514xbf16>
    %c5 = arith.constant 5 : index
    %c0_103 = arith.constant 0 : index
    %c0_104 = arith.constant 0 : index
    %c0_105 = arith.constant 0 : index
    %170 = vector.load %arg3[%c5, %c0_103, %c0_104, %c0_105] : memref<6x3x32x32xbf16, #tpu.memory_space<vmem>>, vector<1x1x32x32xbf16>
    %171 = vector.shape_cast %170 : vector<1x1x32x32xbf16> to vector<32x32xbf16>
    %172 = vector.extract_strided_slice %169 {offsets = [0, 0], sizes = [32, 512], strides = [1, 1]} : vector<32x514xbf16> to vector<32x512xbf16>
    %cst_106 = arith.constant dense<0.000000e+00> : vector<32x512xf32>
    %173 = tpu.matmul %171, %172, %cst_106 {dimension_numbers = #tpu.dot_dimension_numbers<[1], [0], [0], [1], [0, 0, 1, 1], [], []>} : vector<32x32xbf16>, vector<32x512xbf16>, vector<32x512xf32> -> vector<32x512xf32>
    %c5_107 = arith.constant 5 : index
    %c1_108 = arith.constant 1 : index
    %c0_109 = arith.constant 0 : index
    %c0_110 = arith.constant 0 : index
    %174 = vector.load %arg3[%c5_107, %c1_108, %c0_109, %c0_110] : memref<6x3x32x32xbf16, #tpu.memory_space<vmem>>, vector<1x1x32x32xbf16>
    %175 = vector.shape_cast %174 : vector<1x1x32x32xbf16> to vector<32x32xbf16>
    %176 = vector.extract_strided_slice %169 {offsets = [0, 1], sizes = [32, 512], strides = [1, 1]} : vector<32x514xbf16> to vector<32x512xbf16>
    %cst_111 = arith.constant dense<0.000000e+00> : vector<32x512xf32>
    %177 = tpu.matmul %175, %176, %cst_111 {dimension_numbers = #tpu.dot_dimension_numbers<[1], [0], [0], [1], [0, 0, 1, 1], [], []>} : vector<32x32xbf16>, vector<32x512xbf16>, vector<32x512xf32> -> vector<32x512xf32>
    %178 = arith.addf %173, %177 : vector<32x512xf32>
    %c5_112 = arith.constant 5 : index
    %c2_113 = arith.constant 2 : index
    %c0_114 = arith.constant 0 : index
    %c0_115 = arith.constant 0 : index
    %179 = vector.load %arg3[%c5_112, %c2_113, %c0_114, %c0_115] : memref<6x3x32x32xbf16, #tpu.memory_space<vmem>>, vector<1x1x32x32xbf16>
    %180 = vector.shape_cast %179 : vector<1x1x32x32xbf16> to vector<32x32xbf16>
    %181 = vector.extract_strided_slice %169 {offsets = [0, 2], sizes = [32, 512], strides = [1, 1]} : vector<32x514xbf16> to vector<32x512xbf16>
    %cst_116 = arith.constant dense<0.000000e+00> : vector<32x512xf32>
    %182 = tpu.matmul %180, %181, %cst_116 {dimension_numbers = #tpu.dot_dimension_numbers<[1], [0], [0], [1], [0, 0, 1, 1], [], []>} : vector<32x32xbf16>, vector<32x512xbf16>, vector<32x512xf32> -> vector<32x512xf32>
    %183 = arith.addf %178, %182 : vector<32x512xf32>
    %c5_117 = arith.constant 5 : index
    %c0_118 = arith.constant 0 : index
    %c0_119 = arith.constant 0 : index
    %184 = vector.load %arg4[%c5_117, %c0_118, %c0_119] : memref<6x32x1xf32, #tpu.memory_space<vmem>>, vector<1x32x1xf32>
    %185 = vector.shape_cast %184 : vector<1x32x1xf32> to vector<32x1xf32>
    %186 = vector.broadcast %185 : vector<32x1xf32> to vector<32x512xf32>
    %187 = arith.addf %183, %186 : vector<32x512xf32>
    %188 = vector.extract_strided_slice %134 {offsets = [0, 6], sizes = [32, 512], strides = [1, 1]} : vector<32x524xf32> to vector<32x512xf32>
    %189 = arith.addf %187, %188 : vector<32x512xf32>
    %c0_120 = arith.constant 0 : index
    %c0_121 = arith.constant 0 : index
    %c0_122 = arith.constant 0 : index
    %190 = vector.load %arg5[%c0_120, %c0_121, %c0_122] : memref<1x32x512xf32, #tpu.memory_space<vmem>>, vector<1x32x512xf32>
    %191 = vector.shape_cast %190 : vector<1x32x512xf32> to vector<32x512xf32>
    %192 = vector.shape_cast %189 : vector<32x512xf32> to vector<1x32x512xf32>
    tpu.vector_store %arg5[%c0_120, %c0_121, %c0_122], %192 {strides = array<i32>} : memref<1x32x512xf32, #tpu.memory_space<vmem>>, vector<1x32x512xf32>,
    return
  }
  func.func @transform_0(%arg0: i32, %arg1: i32) -> (i32, i32, i32) {
    %c0_i32 = arith.constant 0 : i32
    %c0_i32_0 = arith.constant 0 : i32
    %c0_i32_1 = arith.constant 0 : i32
    return %arg0, %c0_i32, %c0_i32_0 : i32, i32, i32
  }
  func.func @transform_1(%arg0: i32, %arg1: i32) -> (i32, i32, i32, i32) {
    %c0_i32 = arith.constant 0 : i32
    %c0_i32_0 = arith.constant 0 : i32
    %c0_i32_1 = arith.constant 0 : i32
    %c0_i32_2 = arith.constant 0 : i32
    %c0_i32_3 = arith.constant 0 : i32
    return %c0_i32, %c0_i32_0, %c0_i32_1, %c0_i32_2 : i32, i32, i32, i32
  }
  func.func @transform_2(%arg0: i32, %arg1: i32) -> (i32, i32, i32) {
    %c0_i32 = arith.constant 0 : i32
    %c0_i32_0 = arith.constant 0 : i32
    %c0_i32_1 = arith.constant 0 : i32
    %c0_i32_2 = arith.constant 0 : i32
    return %c0_i32, %c0_i32_0, %c0_i32_1 : i32, i32, i32
  }
  func.func @transform_3(%arg0: i32, %arg1: i32) -> (i32, i32, i32) {
    %c0_i32 = arith.constant 0 : i32
    %c0_i32_0 = arith.constant 0 : i32
    return %arg0, %c0_i32, %arg1 : i32, i32, i32
  }
}

</mosaic_0001>

<bundles_post_ra>
// kernel: tpu_custom_call.1
= control target key start
LH: loop header
LB: loop body
LE: loop exit
PB: predicated region body
PF: predicated region fallthrough
CT: control target
= control target key end

     0   :  { %s8796_s0 = inlined_call_operand.hbm [shape: bf16[2,32,1048], index: 0, kind: input, shape index: {}]   ;;  %s8797_s1 = inlined_call_operand.hbm [shape: bf16[6,3,32,32], index: 1, kind: input, shape index: {}]   ;;  %s8798_s2 = inlined_call_operand.vmem [shape: f32[6,32,1], index: 2, kind: input, shape index: {}]   ;;  %s8799_s3 = inlined_call_operand.hbm [shape: f32[2,32,1024], index: 3, kind: output, shape index: {}]  }
   0x1   :  { %8866 = sst [smem:[#allocation36_spill]] %s8797_s1 }
   0x2   :  { %8867 = sst [smem:[#allocation37_spill]] %s8799_s3 }
   0x3   :  { %8 = vsyncpa [#allocation3], 0 }
   0x4   :  { %10 = vsyncpa [#allocation3 + $0x1], 0 }
   0x5   :  { %11 = vsyncpa [#allocation6], 0 }
   0x6   :  { %12 = vsyncpa [#allocation4], 0 }
   0x7   :  { %14 = vsyncpa [#allocation4 + $0x1], 0  ;;  %s6454_s12 = smov 0   ;;  %s6456_s13 = smov 0  }
   0x8   :  { %s6458_s14 = smov 0   ;;  %s6460_s15 = smov 0  }
   0x9   :  { %s6462_s16 = smov 0   ;;  %s6464_s17 = smov 0  }
   0xa   :  { %s6466_s18 = smov 0   ;;  %s6468_s19 = smov 0  }
   0xb   :  { %s6470_s20 = smov 0   ;;  %s6472_s21 = smov 0  }
   0xc   :  { %s6474_s22 = smov 0  }
   0xd LB: > { %8868 = sst [smem:[#allocation11_spill]] %s6365_s12  ;;  %s5693_s23 = sadd.s32 4294967295, %s6405_s22   ;;  %s6405_s22 = sphi %s6474_s22, %s20_s22   ;;  %s6401_s21 = sphi %s6472_s21, %s9021_s21   ;;  %s6397_s20 = sphi %s6470_s20, %s9012_s20   ;;  %s6393_s19 = sphi %s6468_s19, %s9020_s19   ;;  %s6389_s18 = sphi %s6466_s18, %s9011_s18   ;;  %s6385_s17 = sphi %s6464_s17, %s9019_s17   ;;  %s6381_s16 = sphi %s6462_s16, %s9018_s16   ;;  %s6377_s15 = sphi %s6460_s15, %s9017_s15   ;;  %s6373_s14 = sphi %s6458_s14, %s9016_s14   ;;  %s6369_s13 = sphi %s6456_s13, %s9015_s13   ;;  %s6365_s12 = sphi %s6454_s12, %s9014_s12  }
   0xe   : > { %8869 = sst [smem:[#allocation12_spill]] %s6397_s20  ;;  %s5694_s24 = sadd.s32 4294967294, %s6405_s22  }
   0xf   : > { %p52_p0 = scmp.ne.s32.totalorder %s6381_s16, %s6377_s15  ;;  %p6510_p1 = scmp.eq.s32.totalorder %s5693_s23, 0 }
  0x10   : > { %s109_s26 = sadd.s32 1, %s6373_s14  ;;  %p119_p2 = scmp.ne.s32.totalorder %s6373_s14, %s6369_s13 }
  0x11   : > { %p6519_p3 = por %p6510_p1, %p52_p0  ;;  %p120_p4 = scmp.eq.s32.totalorder %s5693_s23, 3 }
  0x12   : > { %p125_p5 = scmp.ne.s32.totalorder %s6369_s13, %s6365_s12  ;;  %p126_p6 = scmp.eq.s32.totalorder %s5694_s24, 3 }
  0x13   : > { %p6525_p7 = por %p120_p4, %p119_p2  ;;  %p5695_p8 = scmp.ge.s32.totalorder %s6405_s22, 1 }
  0x14   : > { %p6530_p9 = por %p126_p6, %p125_p5  ;;  %p133_p10 = scmp.lt.s32.totalorder %s6405_s22, 5 }
  0x15   : > { %s8872_s28 = scalar_select %p6525_p7, 1, 0 }
  0x16   : > { %s8873_s29 = scalar_select %p6530_p9, 1, 0 }
  0x17   : > { %p6535_p11 = pnand %p5695_p8, %p133_p10  ;;  %s6407_s4 = smov [#allocation5]  }
  0x18   : > { %8874 = sst [smem:[#allocation13_spill]] %s8873_s29  ;;  %s145_s5 = sshll.u32 %s6407_s4, 4  ;;  %s146_s5 = int_to_ptr.vmem [resolvable:$true] %s145_s5 }
  0x19   : > { %p6060_p12 = pneg %p6535_p11  ;;  %s6238_s6 = scalar_lea.vmem %s146_s5, 4608 }
  0x1a   : > { %p6239_p2 = scmp.ne.s32.totalorder %s146_s5, %s6238_s6  ;;  %p6246_p6 = scmp.lt.s32.totalorder %s146_s5, %s146_s5 }
  0x1b   : > { %p6061_p13 = pnand %p6060_p12, %p6510_p1  ;;  %p6247_p9 = scmp.lt.s32.totalorder %s6238_s6, %s6238_s6 }
  0x1d   : > { %p6229_p0 = pneg %p6061_p13  ;;  %p6248_p7 = por %p6247_p9, %p6246_p6 }
  0x1f   : > { %p6241_p4 = pnand %p6239_p2, %p6229_p0 }
  0x21   : > { %p6242_p5 = pneg %p6241_p4 }
  0x23   : > { %p6249_p8 = pnand %p6248_p7, %p6242_p5 }
  0x25   : > { %6252 = shalt.err (!%p6249_p8)
}
  0x26   : > { %s6408_s7 = smov 64   ;;  %s6409_s8 = smov 4  }
  0x27   : > { %s8876_s1 = sld [smem:[#allocation36_spill]]  ;;  %s29_s11 = sadd.s32 1, %s6397_s20 }
  0x28   : > { %p30_p7 = scmp.ge.s32.totalorder %s29_s11, 2  ;;  %s32_s15 = sadd.s32 1, %s6401_s21 }
  0x29   : > { %s39_s23 = sadd.s32 1, %s6385_s17  ;;  %p46_p9 = scmp.ne.s32.totalorder %s6385_s17, %s6381_s16 }
  0x2a   : > { %s9023_s11 = smov (%p30_p7, %s29_s11), 0  ;;  %s9025_s15 = smov (!%p30_p7, %s32_s15), %s6401_s21 }
  0x2b   : > { %8877 = sst [smem:[#allocation14_spill]] %s9023_s11  ;;  %p47_p10 = scmp.eq.s32.totalorder %s6405_s22, 0 }
  0x2c   : > { %s105_s24 = ssub.s32 %s6397_s20, %s9023_s11  ;;  %p34_p12 = scmp.ge.s32.totalorder %s9025_s15, 2 }
  0x2d   : > { %6063 = dma.hbm_to_vmem [thread:$0]  (!%p6061_p13), %s8876_s1, 4608, %s146_s5, [#allocation6], %s6408_s7, %s6408_s7, %s6409_s8  }
  0x2e   : > { %p6073_p0 = scmp.lt.s32.totalorder %s6405_s22, 4  ;;  %p6558_p13 = por %p47_p10, %p46_p9 }
  0x2f   : > { %s162_s5 = sand.u32 1, %s6385_s17   ;;  %s9027_s15 = smov (%p34_p12, %s9025_s15), 0 }
  0x30   : > { %8879 = sst [smem:[#allocation15_spill]] %s9027_s15  ;;  %s6049_s6 = smul.u32 144, %s162_s5 }
  0x31   : > { %s36_s7 = ssub.s32 %s6401_s21, %s9027_s15  ;;  %s6050_s8 = smul.u32 2304, %s6401_s21 }
  0x32   : > { %p37_p2 = scmp.eq.s32.totalorder %s36_s7, 0  ;;  %s106_s9 = sor.u32 %s105_s24, %s36_s7 }
  0x33   : > { %p107_p4 = scmp.eq.s32.totalorder %s106_s9, 0  ;;  %s172_s29 = scalar_lea.hbm %s8796_s0, %s6050_s8 }
  0x34   : > { %s6569_s10 = scalar_select %p37_p2, %s6385_s17, %s39_s23  }
  0x35   : > { %s6574_s1 = scalar_select %p107_p4, %s6373_s14, %s109_s26  }
  0x36   : > { %s166_s12 = scalar_lea.vmem [#allocation2], %s6049_s6  ;;  %p6583_p5 = pnand %p6073_p0, %p6558_p13 }
  0x37   : > { %s173_s3 = sshll.u32 %s166_s12, 4  ;;  %s163_s24 = scalar_lea.sflag [#allocation3], %s162_s5  ;;  %s174_s3 = int_to_ptr.vmem [resolvable:$true] %s173_s3 }
  0x38   : > { %p6255_p6 = pneg %p6583_p5  ;;  %s6266_s23 = scalar_lea.vmem %s174_s3, 2304 }
  0x39   : > { %p6267_p8 = scmp.ne.s32.totalorder %s174_s3, %s6266_s23  ;;  %s6410_s26 = smov [#allocation2]  }
  0x3a   : > { %s6271_s20 = sshll.u32 %s6410_s26, 4  ;;  %s6272_s20 = int_to_ptr.vmem [resolvable:$false] %s6271_s20 }
  0x3b   : > { %p6269_p7 = pnand %p6267_p8, %p6255_p6  ;;  %s6273_s11 = scalar_lea.vmem %s6272_s20, 4608 }
  0x3c   : > { %p6274_p10 = scmp.lt.s32.totalorder %s174_s3, %s6272_s20  ;;  %p6275_p12 = scmp.lt.s32.totalorder %s6273_s11, %s6266_s23 }
  0x3d   : > { %p6270_p9 = pneg %p6269_p7 }
  0x3e   : > { %p6276_p2 = por %p6275_p12, %p6274_p10 }
  0x40   : > { %p6277_p4 = pnand %p6276_p2, %p6270_p9 }
  0x42   : > { %6280 = shalt.err (!%p6277_p4)
}
  0x43   : > { %s6411_s12 = smov 576   ;;  %s6412_s4 = smov 36  }
  0x44   : > { %6067 = dma.hbm_to_vmem [thread:$0]  (!%p6583_p5), %s172_s29, 2304, %s174_s3, %s163_s24, %s6411_s12, %s6411_s12, %s6412_s4  }
  0x45   : > { %185 = sbr.rel (%p6535_p11) target bundleno = 3073 (0xc01), region = 32 }
  0x4a   : > { %s187_s5 = sand.u32 1, %s6381_s16  }
  0x4b   : > { %s6051_s6 = smul.u32 144, %s187_s5  ;;  %s188_s7 = scalar_lea.sflag [#allocation3], %s187_s5 }
  0x4d   : > { %s191_s8 = scalar_lea.vmem [#allocation2], %s6051_s6 }
  0x4e   : > { %6352 = dma.done.wait (%p6519_p3), %s188_s7, 2304  }
  0x4f   : > { %6354 = vsyncadd (%p6519_p3), %s188_s7, 4294964992 }
  0x50   : > { %6356 = dma.done.wait (%p6510_p1), [#allocation6], 4608  }
  0x51   : > { %6358 = vsyncadd (%p6510_p1), [#allocation6], 4294962688  ;;  %s5702_s3 = sshll.u32 %s6389_s18, 9  ;;  %s6413_s25 = smov 127  }
  0x52   : > { %s221_s29 = sshra.s32 %s5702_s3, 7  ;;  %s6415_s27 = smov 126  }
  0x53   : > { %s5703_s30 = sshll.u32 %s221_s29, 2  ;;  %s6416_s5 = smov 1  }
  0x54   : > { %s6605_s15 = scalar_lea.vmem %s191_s8, %s5703_s30 [#allocation2]  ;;  %s5704_s6 = sadd.s32 4294967284, %s5702_s3 }
  0x55   : > { %v231_v0 = vld [vmem:[%s6605_s15 + $0x48] sm:$0xff]  ;;  %v232_v4 = vld [vmem:[%s6605_s15 + $0x50] sm:$0xff]  ;;  %v225_v6 = vld [vmem:[%s6605_s15] sm:$0xff]  ;;  %s6417_s7 = smov 125   ;;  %s6418_s23 = smov 2  }
  0x56   : > { %v234_v1 = vld [vmem:[%s6605_s15 + $0x6c] sm:$0xff]  ;;  %v6609_v2 = vunpack.c.h.bf16 %v231_v0  ;;  %v235_v5 = vld [vmem:[%s6605_s15 + $0x74] sm:$0xff]  ;;  %v228_v7 = vld [vmem:[%s6605_s15 + $0x24] sm:$0xff]  ;;  %v6621_v10 = vunpack.c.l.bf16 %v231_v0  ;;  %v6625_v12 = vunpack.c.l.bf16 %v232_v4  ;;  %v6629_v14 = vunpack.c.h.bf16 %v225_v6  ;;  %s6419_s26 = smov 123   ;;  %s6420_s20 = smov 120  }
  0x57   : > { %v6611_v3 = vunpack.c.h.bf16 %v234_v1  ;;  %v6623_v11 = vunpack.c.l.bf16 %v234_v1  ;;  %v6627_v13 = vunpack.c.l.bf16 %v235_v5  ;;  %v6631_v15 = vunpack.c.h.bf16 %v228_v7  ;;  %v226_v18 = vld [vmem:[%s6605_s15 + $0x8] sm:$0xff]  ;;  %v233_v36 = vld [vmem:[%s6605_s15 + $0x58] ss:$36 sps:$4 sm:$0xff]   ;;  %v227_v48 = vld [vmem:[%s6605_s15 + $0x10] ss:$36 sps:$4 sm:$0xff]   ;;  %s6421_s3 = smov 5  }
  0x58   : > { %8881 = vst [vmem:[#allocation16_spill] sm:$0xff] %v6609_v2  ;;  %vm296_vm0 = vcmp.ge.f32.partialorder %v6609_v2, 0.0  ;;  %v316_v8 = vmul.f32 0.1, %v6609_v2  ;;  %8883 = vst [vmem:[#allocation18_spill] sm:$0xff] %v6621_v10  ;;  %vm295_vm2 = vcmp.ge.f32.partialorder %v6621_v10, 0.0  ;;  %v6662_v34 = vunpack.c.l.bf16 %v226_v18 }
  0x59   : > { %8882 = vst [vmem:[#allocation17_spill] sm:$0xff] %v6611_v3  ;;  %vm301_vm1 = vcmp.ge.f32.partialorder %v6611_v3, 0.0  ;;  %v321_v9 = vmul.f32 0.1, %v6611_v3  ;;  %8884 = vst [vmem:[#allocation19_spill] sm:$0xff] %v6623_v11  ;;  %vm300_vm3 = vcmp.ge.f32.partialorder %v6623_v11, 0.0  ;;  %v6670_v38 = vunpack.c.l.bf16 %v225_v6 }
  0x5a   : > { %8885 = vst [vmem:[#allocation20_spill] sm:$0xff] %v6625_v12  ;;  %8886 = vst [vmem:[#allocation21_spill] sm:$0xff] %v6627_v13  ;;  %v336_v16 = vsel %vm296_vm0, %v6609_v2, %v316_v8  ;;  %v315_v20 = vmul.f32 0.1, %v6621_v10  ;;  %v320_v21 = vmul.f32 0.1, %v6623_v11  ;;  %v6672_v39 = vunpack.c.l.bf16 %v228_v7 }
  0x5b   : > { %v341_v17 = vsel %vm301_vm1, %v6611_v3, %v321_v9  ;;  %vm297_vm4 = vcmp.ge.f32.partialorder %v6625_v12, 0.0  ;;  %v229_v22 = vld [vmem:[%s6605_s15 + $0x2c] sm:$0xff]  ;;  %vm302_vm5 = vcmp.ge.f32.partialorder %v6627_v13, 0.0  ;;  %v317_v23 = vmul.f32 0.1, %v6625_v12  ;;  %s6422_s29 = smov 122  }
  0x5c   : > { %v6638_v19 = vpack.c.bf16 %v341_v17, %v336_v16  ;;  %v322_v24 = vmul.f32 0.1, %v6627_v13  ;;  %vm286_vm6 = vcmp.ge.f32.partialorder %v6629_v14, 0.0  ;;  %v335_v25 = vsel %vm295_vm2, %v6621_v10, %v315_v20  ;;  %s6423_s30 = smov 121   ;;  %s6424_s12 = smov 6  }
  0x5d   : > { %v340_v26 = vsel %vm300_vm3, %v6623_v11, %v320_v21  ;;  %vm291_vm7 = vcmp.ge.f32.partialorder %v6631_v15, 0.0  ;;  %v306_v27 = vmul.f32 0.1, %v6629_v14  ;;  %v337_v29 = vsel %vm297_vm4, %v6625_v12, %v317_v23  ;;  %s6426_s4 = smov 112   ;;  %s6428_s9 = smov 116  }
  0x5e   : > { %396 = vrot.lane.b32.xlu0 %v6638_v19, %s6413_s25  ;;  %v6654_v28 = vpack.c.bf16 %v340_v26, %v335_v25  ;;  %v342_v30 = vsel %vm302_vm5, %v6627_v13, %v322_v24  ;;  %v311_v31 = vmul.f32 0.1, %v6631_v15  ;;  %v6664_v35 = vunpack.c.l.bf16 %v229_v22  ;;  %v994_v26 = vld [vmem:[%s8798_s2 + $0x18] sm:$0xff]  ;;  %s6429_s24 = smov 115   ;;  %p9007_p3 = scmp.ne.s32.totalorder %s8872_s28, 0 }
  0x5f   : > { %v6659_v32 = vpack.c.bf16 %v342_v30, %v337_v29  ;;  %v326_v33 = vsel %vm286_vm6, %v6629_v14, %v306_v27  ;;  %v6674_v40 = vunpack.c.h.bf16 %v232_v4  ;;  %vm287_vm8 = vcmp.ge.f32.partialorder %v6662_v34, 0.0  ;;  %v993_v27 = vld [vmem:[%s8798_s2 + $0x10] sm:$0xff]  ;;  %v991_v29 = vld [vmem:[%s8798_s2] sm:$0xff]  ;;  %v992_v30 = vld [vmem:[%s8798_s2 + $0x8] sm:$0xff] }
  0x60   : > { %8887 = vst [vmem:[#allocation22_spill] sm:$0xff] %v6664_v35  ;;  %394 = vrot.lane.b32.xlu1 %v6654_v28, %s6413_s25  ;;  %v331_v37 = vsel %vm291_vm7, %v6631_v15, %v311_v31  ;;  %vm292_vm9 = vcmp.ge.f32.partialorder %v6664_v35, 0.0  ;;  %v307_v42 = vmul.f32 0.1, %v6662_v34  ;;  %v312_v43 = vmul.f32 0.1, %v6664_v35 }
  0x61   : > { %8888 = vst [vmem:[#allocation23_spill] sm:$0xff] %v6674_v40  ;;  %v6678_v41 = vpack.c.bf16 %v331_v37, %v326_v33  ;;  %vm285_vm10 = vcmp.ge.f32.partialorder %v6670_v38, 0.0  ;;  %vm290_vm11 = vcmp.ge.f32.partialorder %v6672_v39, 0.0  ;;  %v305_v44 = vmul.f32 0.1, %v6670_v38 }
  0x62   : > { %398 = vrot.lane.b32.xlu0 %v6659_v32, %s6413_s25  ;;  %v327_v45 = vsel %vm287_vm8, %v6662_v34, %v307_v42  ;;  %v310_v46 = vmul.f32 0.1, %v6672_v39  ;;  %v6689_v47 = vunpack.c.h.bf16 %v235_v5  ;;  %vm298_vm12 = vcmp.ge.f32.partialorder %v6674_v40, 0.0 }
  0x63   : > { %v332_v49 = vsel %vm292_vm9, %v6664_v35, %v312_v43  ;;  %v325_v50 = vsel %vm285_vm10, %v6670_v38, %v305_v44  ;;  %v318_v51 = vmul.f32 0.1, %v6674_v40  ;;  %v6698_v52 = vunpack.c.l.bf16 %v233_v36 }
  0x64   : > { %8889 = vst [vmem:[#allocation24_spill] sm:$0xff] %v6689_v47  ;;  %386 = vrot.lane.b32.xlu1 %v6678_v41, %s6413_s25  ;;  %v6700_v53 = vpack.c.bf16 %v332_v49, %v327_v45  ;;  %v330_v54 = vsel %vm290_vm11, %v6672_v39, %v310_v46  ;;  %vm303_vm13 = vcmp.ge.f32.partialorder %v6689_v47, 0.0  ;;  %v323_v55 = vmul.f32 0.1, %v6689_v47  ;;  %v6191_v49 = vld [vmem:[#allocation5 + $0x10] sm:$0xff]  }
  0x65   : > { %8890 = vst [vmem:[#allocation25_spill] sm:$0xff] %v6698_v52  ;;  %v6705_v56 = vpack.c.bf16 %v330_v54, %v325_v50  ;;  %v338_v57 = vsel %vm298_vm12, %v6674_v40, %v318_v51  ;;  %v6708_v58 = vunpack.c.h.bf16 %v233_v36  ;;  %vm299_vm14 = vcmp.ge.f32.partialorder %v6698_v52, 0.0 }
  0x66   : > { %388 = vrot.lane.b32.xlu0 %v6700_v53, %s6413_s25  ;;  %v343_v59 = vsel %vm303_vm13, %v6689_v47, %v323_v55  ;;  %v319_v60 = vmul.f32 0.1, %v6698_v52  ;;  %v6715_v61 = vunpack.c.h.bf16 %v226_v18  ;;  %v6717_v62 = vunpack.c.h.bf16 %v229_v22 }
  0x67   : > { %8891 = vst [vmem:[#allocation26_spill] sm:$0xff] %v6708_v58  ;;  %v6721_v63 = vpack.c.bf16 %v343_v59, %v338_v57  ;;  %vm304_vm15 = vcmp.ge.f32.partialorder %v6708_v58, 0.0  ;;  %v324_v0 = vmul.f32 0.1, %v6708_v58  ;;  %v6725_v1 = vunpack.c.l.bf16 %v227_v48 }
  0x68   : > { %8892 = vst [vmem:[#allocation27_spill] sm:$0xff] %v6715_v61  ;;  %8893 = vst [vmem:[#allocation28_spill] sm:$0xff] %v6717_v62  ;;  %384 = vrot.lane.b32.xlu1 %v6705_v56, %s6413_s25  ;;  %v339_v4 = vsel %vm299_vm14, %v6698_v52, %v319_v60  ;;  %vm288_vm0 = vcmp.ge.f32.partialorder %v6715_v61, 0.0  ;;  %vm293_vm1 = vcmp.ge.f32.partialorder %v6717_v62, 0.0  ;;  %v308_v5 = vmul.f32 0.1, %v6715_v61 }
  0x69   : > { %8894 = vst [vmem:[#allocation29_spill] sm:$0xff] %v6725_v1  ;;  %v344_v6 = vsel %vm304_vm15, %v6708_v58, %v324_v0  ;;  %v313_v7 = vmul.f32 0.1, %v6717_v62  ;;  %v6733_v8 = vunpack.c.h.bf16 %v227_v48  ;;  %vm289_vm2 = vcmp.ge.f32.partialorder %v6725_v1, 0.0  ;;  %v6192_v0 = vld [vmem:[#allocation5 + $0x18] sm:$0xff]  }
  0x6a   : > { %400 = vrot.lane.b32.xlu0 %v6721_v63, %s6413_s25  ;;  %v6738_v9 = vpack.c.bf16 %v344_v6, %v339_v4  ;;  %v328_v16 = vsel %vm288_vm0, %v6715_v61, %v308_v5  ;;  %v309_v17 = vmul.f32 0.1, %v6725_v1  ;;  %v8807_v21 = vmov 0  }
  0x6b   : > { %8895 = vst [vmem:[#allocation30_spill] sm:$0xff] %v6733_v8  ;;  %v333_v18 = vsel %vm293_vm1, %v6717_v62, %v313_v7  ;;  %vm294_vm3 = vcmp.ge.f32.partialorder %v6733_v8, 0.0  ;;  %v314_v20 = vmul.f32 0.1, %v6733_v8  ;;  %462 = vmatprep.mubr.bf16.mxu0 %v8807_v21  ;;  %515 = vmatprep.mubr.bf16.mxu1 %v8807_v21  ;;  %vm8819_vm4 = vcmask 1039360  }
  0x6c   : > { %402 = vrot.lane.b32.xlu1 %v6738_v9, %s6413_s25  ;;  %v6749_v22 = vpack.c.bf16 %v333_v18, %v328_v16  ;;  %v329_v23 = vsel %vm289_vm2, %v6725_v1, %v309_v17  ;;  %6189 = vset.pattern.permute.xlu0 %v8807_v21  ;;  %vm423_vm5 = vcmask 261120   ;;  %vm791_vm6 = vcmask 1031168  }
  0x6d   : > { %v334_v24 = vsel %vm294_vm3, %v6733_v8, %v314_v20  ;;  %6190 = vset.pattern.permute.xlu1 %v8807_v21  ;;  %v6194_v20 = vld [vmem:[#allocation5 + $0x8] sm:$0xff]   ;;  %vm1105_vm0 = vcmask 7168  }
  0x6e   : > { %390 = vrot.lane.b32.xlu0 %v6749_v22, %s6413_s25  ;;  %v6757_v25 = vpack.c.bf16 %v334_v24, %v329_v23 }
  0x70   : > { %392 = vrot.lane.b32.xlu1 %v6757_v25, %s6413_s25 }
  0x72   : > { %783 = vrot.lane.b32.xlu0 %v6638_v19, %s6415_s27 }
  0x74   : > { %785 = vrot.lane.b32.xlu1 %v6659_v32, %s6415_s27 }
  0x76   : > { %781 = vrot.lane.b32.xlu0 %v6654_v28, %s6415_s27 }
  0x78   : > { %773 = vrot.lane.b32.xlu1 %v6678_v41, %s6415_s27 }
  0x7a   : > { %775 = vrot.lane.b32.xlu0 %v6700_v53, %s6415_s27 }
  0x7c   : > { %771 = vrot.lane.b32.xlu1 %v6705_v56, %s6415_s27 }
  0x7e   : > { %787 = vrot.lane.b32.xlu0 %v6721_v63, %s6415_s27 }
  0x80   : > { %789 = vrot.lane.b32.xlu1 %v6738_v9, %s6415_s27 }
  0x82   : > { %777 = vrot.lane.b32.xlu0 %v6749_v22, %s6415_s27 }
  0x84   : > { %779 = vrot.lane.b32.xlu1 %v6757_v25, %s6415_s27 }
  0x86   : > { %1007 = vperm.xlu0 %6189, %v993_v27   ;;  %v6196_v27 = vld [vmem:[#allocation5 + $0x28] sm:$0xff]  }
  0x88   : > { %1012 = vperm.xlu1 %6190, %v994_v26  }
  0x8a   : > { %1002 = vperm.xlu0 %6189, %v992_v30  }
  0x8c   : > { %997 = vperm.xlu1 %6190, %v991_v29  }
  0xd0   : > { %v397_v31 = vpop.permute.xlu0 %396 }
  0xd2   : > { %v395_v33 = vpop.permute.xlu1 %394 }
  0xd3   : > { %v409_v42 = vsel %vm8819_vm4, %v395_v33, %v397_v31 }
  0xd4   : > { %v399_v36 = vpop.permute.xlu0 %398 }
  0xd5   : > { %v410_v37 = vsel %vm8819_vm4, %v397_v31, %v399_v36 }
  0xd6   : > { %442 = vmatprep.subr.bf16.mxu0 %v410_v37  ;;  %v387_v43 = vpop.permute.xlu1 %386 }
  0xd7   : > { %443 = vmatpush1.bf16.msra.mxu0 %v409_v42 }
  0xd8   : > { %v389_v44 = vpop.permute.xlu0 %388 }
  0xd9   : > { %v406_v46 = vsel %vm8819_vm4, %v387_v43, %v389_v44 }
  0xda   : > { %v385_v45 = vpop.permute.xlu1 %384  ;;  %444 = vmatprep.subr.bf16.mxu0 %v406_v46 }
  0xdb   : > { %v405_v48 = vsel %vm8819_vm4, %v385_v45, %v387_v43 }
  0xdc   : > { %445 = vmatpush1.bf16.msra.mxu0 %v405_v48  ;;  %v401_v50 = vpop.permute.xlu0 %400 }
  0xdd   : > { %v411_v54 = vsel %vm8819_vm4, %v399_v36, %v401_v50 }
  0xde   : > { %v403_v51 = vpop.permute.xlu1 %402 }
  0xdf   : > { %5707 = vmatmul.mubr.msk.bf16.vlgmr.msra.gmra.mxu0 %vm423_vm5, %v6191_v49  ;;  %5929 = vmatprep.subr.bf16.mxu0 %v403_v51  ;;  %v412_v55 = vsel %vm8819_vm4, %v401_v50, %v403_v51 }
  0xe0   : > { %472 = vmatprep.mubr.bf16.mxu0 %v8807_v21  ;;  %495 = vmatprep.subr.bf16.mxu1 %v412_v55  ;;  %v391_v57 = vpop.permute.xlu0 %390 }
  0xe1   : > { %5930 = vmatpush3.bf16.msra.mxu0 %v403_v51  ;;  %496 = vmatpush1.bf16.msra.mxu1 %v411_v54  ;;  %v407_v60 = vsel %vm8819_vm4, %v389_v44, %v391_v57 }
  0xe2   : > { %v393_v59 = vpop.permute.xlu1 %392 }
  0xe3   : > { %5931 = vmatprep.subr.bf16.mxu0 %v393_v59  ;;  %v408_v4 = vsel %vm8819_vm4, %v391_v57, %v393_v59 }
  0xe4   : > { %497 = vmatprep.subr.bf16.mxu1 %v408_v4  ;;  %v784_v5 = vpop.permute.xlu0 %783 }
  0xe5   : > { %5932 = vmatpush3.bf16.msra.mxu0 %v393_v59  ;;  %498 = vmatpush1.bf16.msra.mxu1 %v407_v60 }
  0xe6   : > { %666 = vmatprep.subr.bf16.mxu0 %v6721_v63  ;;  %613 = vmatprep.subr.bf16.mxu1 %v6638_v19  ;;  %v786_v6 = vpop.permute.xlu1 %785 }
  0xe7   : > { %5708 = vmatmul.mubr.msk.bf16.gmra.mxu0 %vm423_vm5, %v6192_v0  ;;  %v797_v19 = vsel %vm791_vm6, %v784_v5, %v786_v6 }
  0xe8   : > { %5933 = vmatprep.mubr.msk.bf16.mxu0 %vm423_vm5, %v6191_v49  ;;  %5709 = vmatmul.mubr.msk.bf16.vlgmr.msra.gmra.mxu1 %vm423_vm5, %v6191_v49  ;;  %v782_v63 = vpop.permute.xlu0 %781 }
  0xe9   : > { %525 = vmatprep.mubr.bf16.mxu1 %v8807_v21  ;;  %614 = vmatpush1.bf16.msra.mxu1 %v6654_v28  ;;  %v6193_v28 = vld [vmem:[#allocation5] sm:$0xff]  }
  0xea   : > { %615 = vmatprep.subr.bf16.mxu1 %v6678_v41  ;;  %v774_v7 = vpop.permute.xlu1 %773  ;;  %v796_v41 = vsel %vm791_vm6, %v782_v63, %v784_v5 }
  0xed   : > { %616 = vmatpush1.bf16.msra.mxu1 %v6705_v56  ;;  %v776_v56 = vpop.permute.xlu0 %775 }
  0xee   : > { %5937 = vmatprep.subr.bf16.mxu1 %v6738_v9  ;;  %v772_v16 = vpop.permute.xlu1 %771 }
  0xef   : > { %5934 = vmatmul.mubr.msk.bf16.vlgmr.msra.gmra.mxu0 %vm423_vm5, %v6192_v0  ;;  %v792_v17 = vsel %vm791_vm6, %v772_v16, %v774_v7 }
  0xf0   : > { %667 = vmatpush1.bf16.msra.mxu0 %v6659_v32  ;;  %686 = vmatprep.mubr.bf16.mxu0 %v8807_v21  ;;  %v793_v32 = vsel %vm791_vm6, %v774_v7, %v776_v56 }
  0xf1   : > { %5710 = vmatmul.mubr.msk.bf16.gmra.mxu1 %vm423_vm5, %v6192_v0  ;;  %668 = vmatprep.subr.bf16.mxu0 %v6749_v22 }
  0xf2   : > { %633 = vmatprep.mubr.bf16.mxu1 %v8807_v21  ;;  %v790_v18 = vpop.permute.xlu1 %789 }
  0xf4   : > { %669 = vmatpush1.bf16.msra.mxu0 %v6700_v53  ;;  %v788_v53 = vpop.permute.xlu0 %787 }
  0xf5   : > { %828 = vmatprep.subr.bf16.mxu0 %v797_v19  ;;  %v799_v22 = vsel %vm791_vm6, %v788_v53, %v790_v18 }
  0xf6   : > { %v780_v23 = vpop.permute.xlu1 %779 }
  0xf7   : > { %5717 = vmatmul.mubr.msk.bf16.vlgmr.msra.gmra.mxu0 %vm423_vm5, %v6193_v28 }
  0xf8   : > { %829 = vmatpush1.bf16.msra.mxu0 %v796_v41  ;;  %696 = vmatprep.mubr.bf16.mxu0 %v8807_v21  ;;  %v778_v24 = vpop.permute.xlu0 %777 }
  0xf9   : > { %5715 = vmatmul.mubr.msk.bf16.vlgmr.msra.gmra.mxu1 %vm423_vm5, %v6193_v28  ;;  %830 = vmatprep.subr.bf16.mxu0 %v793_v32  ;;  %v795_v26 = vsel %vm791_vm6, %v778_v24, %v780_v23  ;;  %v794_v29 = vsel %vm791_vm6, %v776_v56, %v778_v24 }
  0xfa   : > { %643 = vmatprep.mubr.bf16.mxu1 %v8807_v21  ;;  %5938 = vmatpush3.bf16.msra.mxu1 %v6738_v9  ;;  %v6195_v9 = vld [vmem:[#allocation5 + $0x20] sm:$0xff]  }
  0xfb   : > { %5939 = vmatprep.subr.bf16.mxu1 %v6757_v25 }
  0xfc   : > { %831 = vmatpush1.bf16.msra.mxu0 %v792_v17 }
  0xfd   : > { %5945 = vmatprep.subr.bf16.mxu0 %v790_v18 }
  0xfe   : > { %5940 = vmatpush3.bf16.msra.mxu1 %v6757_v25  ;;  %v798_v25 = vsel %vm791_vm6, %v786_v6, %v788_v53 }
  0xff   : > { %5718 = vmatmul.mubr.msk.bf16.gmra.mxu0 %vm423_vm5, %v6194_v20  ;;  %881 = vmatprep.subr.bf16.mxu1 %v799_v22 }
 0x100   : > { %848 = vmatprep.mubr.bf16.mxu0 %v8807_v21 }
 0x101   : > { %5716 = vmatmul.mubr.msk.bf16.gmra.mxu1 %vm423_vm5, %v6194_v20 }
 0x102   : > { %5941 = vmatprep.mubr.msk.bf16.mxu1 %vm423_vm5, %v6193_v28 }
 0x103   : > { %v6883_v16 = vpop.permute.xlu1 %1012 }
 0x107   : > { %5723 = vmatmul.mubr.msk.bf16.vlgmr.msra.gmra.mxu0 %vm423_vm5, %v6195_v9  ;;  %v6891_v24 = vpop.permute.xlu1 %997 }
 0x108   : > { %5946 = vmatpush3.bf16.msra.mxu0 %v790_v18  ;;  %858 = vmatprep.mubr.bf16.mxu0 %v8807_v21 }
 0x109   : > { %5942 = vmatmul.mubr.msk.bf16.vlgmr.msra.gmra.mxu1 %vm423_vm5, %v6194_v20  ;;  %5947 = vmatprep.subr.bf16.mxu0 %v780_v23 }
 0x10a   : > { %882 = vmatpush1.bf16.msra.mxu1 %v798_v25  ;;  %901 = vmatprep.mubr.bf16.mxu1 %v8807_v21 }
 0x10b   : > { %883 = vmatprep.subr.bf16.mxu1 %v795_v26 }
 0x10c   : > { %5948 = vmatpush3.bf16.msra.mxu0 %v780_v23  ;;  %v6889_v23 = vpop.permute.xlu0 %1007 }
 0x10e   : > { %884 = vmatpush1.bf16.msra.mxu1 %v794_v29 }
 0x10f   : > { %5724 = vmatmul.mubr.msk.bf16.gmra.mxu0 %vm423_vm5, %v6196_v27 }
 0x110   : > { %5949 = vmatprep.mubr.msk.bf16.mxu0 %vm423_vm5, %v6195_v9 }
 0x111   : > { %5725 = vmatmul.mubr.msk.bf16.vlgmr.msra.gmra.mxu1 %vm423_vm5, %v6195_v9 }
 0x112   : > { %911 = vmatprep.mubr.bf16.mxu1 %v8807_v21 }
 0x117   : > { %5950 = vmatmul.mubr.msk.bf16.vlgmr.msra.gmra.mxu0 %vm423_vm5, %v6196_v27 }
 0x118   : > { %1391 = vmatprep.mubr.bf16.mxu0 %v8807_v21 }
 0x119   : > { %5726 = vmatmul.mubr.msk.bf16.gmra.mxu1 %vm423_vm5, %v6196_v27 }
 0x11a   : > { %1338 = vmatprep.mubr.bf16.mxu1 %v8807_v21 }
 0x19f   : > { %v464_v30 = vpop.f32.mrf.mxu0 }
 0x1a1   : > { %v466_v31 = vpop.f32.mrf.mxu0 }
 0x1a3   : > { %v468_v33 = vpop.f32.mrf.mxu0 }
 0x1a5   : > { %v6851_v36 = vpop.f32.mrf.mxu0 }
 0x1a7   : > { %v6853_v37 = vpop.f32.mrf.mxu0 }
 0x1a8   : > { %v517_v42 = vpop.f32.mrf.mxu1 }
 0x1a9   : > { %v6855_v43 = vpop.f32.mrf.mxu0 }
 0x1aa   : > { %v519_v44 = vpop.f32.mrf.mxu1 }
 0x1ab   : > { %v6857_v45 = vpop.f32.mrf.mxu0 }
 0x1ac   : > { %v521_v46 = vpop.f32.mrf.mxu1 }
 0x1ad   : > { %v6859_v48 = vpop.f32.mrf.mxu0 }
 0x1ae   : > { %v6861_v49 = vpop.f32.mrf.mxu1 }
 0x1af   : > { %v6863_v50 = vpop.f32.mrf.mxu0 }
 0x1b1   : > { %v6865_v51 = vpop.f32.mrf.mxu1  ;;  %v6867_v54 = vpop.f32.mrf.mxu0 }
 0x1b3   : > { %v6869_v55 = vpop.f32.mrf.mxu1  ;;  %v6871_v57 = vpop.f32.mrf.mxu0 }
 0x1b5   : > { %v6873_v59 = vpop.f32.mrf.mxu1  ;;  %v6875_v60 = vpop.f32.mrf.mxu0 }
 0x1b7   : > { %v6877_v0 = vpop.f32.mrf.mxu1  ;;  %v688_v4 = vpop.f32.mrf.mxu0 }
 0x1b9   : > { %v635_v5 = vpop.f32.mrf.mxu1  ;;  %v690_v6 = vpop.f32.mrf.mxu0 }
 0x1ba   : > { %v636_v9 = vadd.f32 %v635_v5, %v464_v30  ;;  %v6899_v30 = vpop.permute.xlu0 %1002 }
 0x1bb   : > { %v637_v63 = vpop.f32.mrf.mxu1  ;;  %v692_v7 = vpop.f32.mrf.mxu0 }
 0x1bc   : > { %v638_v27 = vadd.f32 %v637_v63, %v466_v31 }
 0x1bd   : > { %v639_v19 = vpop.f32.mrf.mxu1  ;;  %v6879_v28 = vpop.f32.mrf.mxu0 }
 0x1be   : > { %v640_v62 = vadd.f32 %v639_v19, %v468_v33 }
 0x1bf   : > { %v641_v41 = vpop.f32.mrf.mxu1  ;;  %v6881_v56 = vpop.f32.mrf.mxu0 }
 0x1c1   : > { %v645_v32 = vpop.f32.mrf.mxu1  ;;  %v6885_v17 = vpop.f32.mrf.mxu0 }
 0x1c3   : > { %v647_v18 = vpop.f32.mrf.mxu1  ;;  %v702_v53 = vpop.f32.mrf.mxu0 }
 0x1c4   : > { %v648_v3 = vadd.f32 %v647_v18, %v6855_v43 }
 0x1c5   : > { %v649_v20 = vpop.f32.mrf.mxu1  ;;  %v6887_v22 = vpop.f32.mrf.mxu0 }
 0x1c7   : > { %v6893_v26 = vpop.f32.mrf.mxu1  ;;  %v850_v25 = vpop.f32.mrf.mxu0 }
 0x1c8   : > { %v971_v29 = vadd.f32 %v850_v25, %v636_v9  ;;  %v693_v25 = vadd.f32 %v692_v7, %v521_v46 }
 0x1c9   : > { %v5943_v21 = vpop.f32.mrf.mxu1  ;;  %v852_v8 = vpop.f32.mrf.mxu0 }
 0x1ca   : > { %v972_v58 = vadd.f32 %v852_v8, %v638_v27  ;;  %v1015_v47 = vadd.f32 %v6891_v24, %v971_v29  ;;  %v689_v8 = vadd.f32 %v688_v4, %v517_v42 }
 0x1cb   : > { %v6896_v1 = vpop.f32.mrf.mxu1  ;;  %v854_v52 = vpop.f32.mrf.mxu0 }
 0x1cc   : > { %v976_v40 = vadd.f32 %v854_v52, %v640_v62  ;;  %1065 = vrot.lane.b32.xlu1 %v1015_v47, %s6416_s5  ;;  %v1016_v5 = vadd.f32 %v6891_v24, %v972_v58  ;;  %v691_v52 = vadd.f32 %v690_v6, %v519_v44 }
 0x1cd   : > { %v6902_v13 = vpop.f32.mrf.mxu1  ;;  %v856_v31 = vpop.f32.mrf.mxu0 }
 0x1ce   : > { %1067 = vrot.lane.b32.xlu0 %v1016_v5, %s6416_s5  ;;  %v1020_v63 = vadd.f32 %v6899_v30, %v976_v40  ;;  %v642_v5 = vadd.f32 %v641_v41, %v6851_v36 }
 0x1cf   : > { %v6905_v33 = vpop.f32.mrf.mxu1  ;;  %v860_v19 = vpop.f32.mrf.mxu0 }
 0x1d0   : > { %v977_v4 = vadd.f32 %v856_v31, %v642_v5 }
 0x1d1   : > { %v903_v9 = vpop.f32.mrf.mxu1  ;;  %v862_v29 = vpop.f32.mrf.mxu0 }
 0x1d2   : > { %v973_v62 = vadd.f32 %v903_v9, %v689_v8  ;;  %1075 = vrot.lane.b32.xlu0 %v1020_v63, %s6416_s5  ;;  %v982_v44 = vadd.f32 %v862_v29, %v648_v3  ;;  %v646_v63 = vadd.f32 %v645_v32, %v6853_v37  ;;  %v650_v9 = vadd.f32 %v649_v20, %v6857_v45 }
 0x1d3   : > { %v905_v47 = vpop.f32.mrf.mxu1  ;;  %v864_v46 = vpop.f32.mrf.mxu0  ;;  %v1021_v36 = vadd.f32 %v6899_v30, %v977_v4  ;;  %v703_v37 = vadd.f32 %v702_v53, %v6873_v59  ;;  %v742_v29 = vadd.f32 %v6896_v1, %v6867_v54  ;;  %v705_v4 = vadd.f32 %v6887_v22, %v6877_v0 }
 0x1d4   : > { %v1017_v58 = vadd.f32 %v6891_v24, %v973_v62  ;;  %v974_v27 = vadd.f32 %v905_v47, %v691_v52  ;;  %v981_v43 = vadd.f32 %v860_v19, %v646_v63  ;;  %v1026_v3 = vadd.f32 %v6889_v23, %v982_v44 }
 0x1d5   : > { %v907_v61 = vpop.f32.mrf.mxu1  ;;  %v986_v41 = vadd.f32 %v864_v46, %v650_v9  ;;  %v866_v18 = vpop.f32.mrf.mxu0  ;;  %v699_v52 = vadd.f32 %v6881_v56, %v6865_v51  ;;  %v701_v47 = vadd.f32 %v6885_v17, %v6869_v55  ;;  %v745_v0 = vadd.f32 %v6905_v33, %v6875_v60 }
 0x1d6   : > { %v978_v42 = vadd.f32 %v907_v61, %v693_v25  ;;  %1069 = vrot.lane.b32.xlu1 %v1017_v58, %s6416_s5  ;;  %v1018_v6 = vadd.f32 %v6891_v24, %v974_v27  ;;  %v1025_v45 = vadd.f32 %v6889_v23, %v981_v43  ;;  %v750_v25 = vadd.f32 %v5943_v21, %v6863_v50 }
 0x1d7   : > { %v909_v40 = vpop.f32.mrf.mxu1  ;;  %v1030_v32 = vadd.f32 %v6883_v16, %v986_v41  ;;  %v5951_v62 = vpop.f32.mrf.mxu0  ;;  %v652_v27 = vadd.f32 %v6893_v26, %v6859_v48  ;;  %v753_v48 = vadd.f32 %v6902_v13, %v6871_v57  ;;  %v258_v60 = vlaneseq }
 0x1d8   : > { %v1022_v8 = vadd.f32 %v6899_v30, %v978_v42  ;;  %v985_v59 = vadd.f32 %v5951_v62, %v750_v25  ;;  %v264_v33 = vstv %s5704_s6  ;;  %s215_s6 = sand.u32 1, %s6369_s13  }
 0x1d9   : > { %v913_v7 = vpop.f32.mrf.mxu1  ;;  %v956_v58 = vpop.f32.mrf.mxu0  ;;  %v987_v21 = vadd.f32 %v866_v18, %v652_v27 }
 0x1da   : > { %1079 = vrot.lane.b32.xlu0 %v1022_v8, %s6416_s5  ;;  %1071 = vrot.lane.b32.xlu1 %v1018_v6, %s6416_s5  ;;  %v983_v20 = vadd.f32 %v913_v7, %v699_v52  ;;  %v1029_v50 = vadd.f32 %v6889_v23, %v985_v59  ;;  %v975_v17 = vadd.f32 %v956_v58, %v742_v29 }
 0x1db   : > { %v915_v61 = vpop.f32.mrf.mxu1  ;;  %v5952_v5 = vpop.f32.mrf.mxu0  ;;  %v1031_v1 = vadd.f32 %v6883_v16, %v987_v21  ;;  %v695_v6 = vadd.f32 %v6879_v28, %v6861_v49  ;;  %v259_v28 = vand.u32 127, %v258_v60 }
 0x1dc   : > { %v1027_v51 = vadd.f32 %v6889_v23, %v983_v20  ;;  %v984_v56 = vadd.f32 %v915_v61, %v701_v47  ;;  %v1019_v54 = vadd.f32 %v6891_v24, %v975_v17  ;;  %v990_v26 = vadd.f32 %v5952_v5, %v753_v48 }
 0x1dd   : > { %v917_v31 = vpop.f32.mrf.mxu1  ;;  %v979_v13 = vadd.f32 %v909_v40, %v695_v6  ;;  %v265_v40 = vadd.s32 %v264_v33, %v259_v28  ;;  %v261_v63 = vadd.s32 256, %v259_v28  ;;  %v260_v9 = vadd.s32 128, %v259_v28 }
 0x1de   : > { %1087 = vrot.lane.b32.xlu0 %v1026_v3, %s6416_s5  ;;  %1077 = vrot.lane.b32.xlu1 %v1021_v36, %s6416_s5  ;;  %v988_v19 = vadd.f32 %v917_v31, %v703_v37  ;;  %v1028_v55 = vadd.f32 %v6889_v23, %v984_v56  ;;  %v959_v23 = vpop.f32.mrf.mxu0  ;;  %v1034_v57 = vadd.f32 %v6883_v16, %v990_v26  ;;  %v262_v47 = vadd.s32 384, %v259_v28 }
 0x1df   : > { %v919_v42 = vpop.f32.mrf.mxu1  ;;  %v980_v24 = vadd.f32 %v959_v23, %v745_v0  ;;  %v1023_v8 = vadd.f32 %v6899_v30, %v979_v13  ;;  %vm270_vm7 = vcmp.ge.s32.totalorder %v265_v40, 0  ;;  %vm275_vm8 = vcmp.lt.s32.totalorder %v265_v40, 1000 }
 0x1e0   : > { %v1032_v53 = vadd.f32 %v6883_v16, %v988_v19  ;;  %v989_v44 = vadd.f32 %v919_v42, %v705_v4  ;;  %vm6967_vm9 = vmand %vm270_vm7, %vm275_vm8  ;;  %v267_v43 = vadd.s32 %v264_v33, %v261_v63  ;;  %v266_v18 = vadd.s32 %v264_v33, %v260_v9 }
 0x1e1   : > { %v1024_v49 = vadd.f32 %v6899_v30, %v980_v24  ;;  %v263_v59 = vadd.s32 512, %v259_v28  ;;  %v8905_v9 = vmov 0 }
 0x1e2   : > { %1095 = vrot.lane.b32.xlu0 %v1030_v32, %s6416_s5  ;;  %1085 = vrot.lane.b32.xlu1 %v1025_v45, %s6416_s5  ;;  %v1033_v22 = vadd.f32 %v6883_v16, %v989_v44  ;;  %vm272_vm12 = vcmp.ge.s32.totalorder %v267_v43, 0  ;;  %vm277_vm13 = vcmp.lt.s32.totalorder %v267_v43, 1000  ;;  %vm271_vm14 = vcmp.ge.s32.totalorder %v266_v18, 0 }
 0x1e3   : > { %vm276_vm15 = vcmp.lt.s32.totalorder %v266_v18, 1000  ;;  %vm6981_vm1 = vmand %vm272_vm12, %vm277_vm13  ;;  %v269_v42 = vadd.s32 %v264_v33, %v263_v59 }
 0x1e4   : > { %vm6991_vm2 = vmand %vm271_vm14, %vm276_vm15 }
 0x1e5   : > { %vm274_vm14 = vcmp.ge.s32.totalorder %v269_v42, 0  ;;  %vm279_vm15 = vcmp.lt.s32.totalorder %v269_v42, 1000 }
 0x1e6   : > { %1099 = vrot.lane.b32.xlu0 %v1032_v53, %s6416_s5  ;;  %1089 = vrot.lane.b32.xlu1 %v1027_v51, %s6416_s5 }
 0x1ea   : > { %1093 = vrot.lane.b32.xlu0 %v1029_v50, %s6416_s5  ;;  %1091 = vrot.lane.b32.xlu1 %v1028_v55, %s6416_s5  ;;  %v268_v50 = vadd.s32 %v264_v33, %v262_v47 }
 0x1ec   : > { %vm273_vm13 = vcmp.ge.s32.totalorder %v268_v50, 0  ;;  %vm278_vm4 = vcmp.lt.s32.totalorder %v268_v50, 1000 }
 0x1ee   : > { %1073 = vrot.lane.b32.xlu0 %v1019_v54, %s6416_s5  ;;  %1097 = vrot.lane.b32.xlu1 %v1031_v1, %s6416_s5 }
 0x1f2   : > { %1103 = vrot.lane.b32.xlu0 %v1034_v57, %s6416_s5  ;;  %1101 = vrot.lane.b32.xlu1 %v1033_v22, %s6416_s5 }
 0x1f6   : > { %1083 = vrot.lane.b32.xlu0 %v1024_v49, %s6416_s5  ;;  %1081 = vrot.lane.b32.xlu1 %v1023_v8, %s6416_s5 }
 0x23e   : > { %v1066_v46 = vpop.permute.xlu1 %1065 }
 0x23f   : > { %v1142_v30 = vsel %vm6967_vm9, %v1066_v46, 0.0 }
 0x240   : > { %v1068_v7 = vpop.permute.xlu0 %1067  ;;  %v1182_v61 = vmul.f32 0.1, %v1142_v30  ;;  %vm1162_vm10 = vcmp.ge.f32.partialorder %v1142_v30, 0.0 }
 0x241   : > { %v1106_v51 = vsel %vm1105_vm0, %v1066_v46, %v1068_v7 }
 0x242   : > { %v1202_v52 = vsel %vm1162_vm10, %v1142_v30, %v1182_v61  ;;  %v1143_v27 = vsel %vm6991_vm2, %v1106_v51, 0.0  ;;  %v8902_v30 = vmov 0 }
 0x243   : > { %vm1163_vm8 = vcmp.ge.f32.partialorder %v1143_v27, 0.0  ;;  %v1183_v48 = vmul.f32 0.1, %v1143_v27 }
 0x244   : > { %v1076_v36 = vpop.permute.xlu0 %1075 }
 0x245   : > { %v1147_v3 = vsel %vm6967_vm9, %v1076_v36, 0.0  ;;  %v1203_v8 = vsel %vm1163_vm8, %v1143_v27, %v1183_v48 }
 0x246   : > { %vm1167_vm11 = vcmp.ge.f32.partialorder %v1147_v3, 0.0  ;;  %v1187_v41 = vmul.f32 0.1, %v1147_v3 }
 0x248   : > { %v6975_v31 = vpop.permute.xlu1 %1069  ;;  %v1207_v37 = vsel %vm1167_vm11, %v1147_v3, %v1187_v41 }
 0x249   : > { %v6977_v45 = vpack.c.bf16 %v1207_v37, %v1202_v52  ;;  %v1107_v20 = vsel %vm1105_vm0, %v1068_v7, %v6975_v31 }
 0x24a   : > { %v1144_v56 = vsel %vm6981_vm1, %v1107_v20, 0.0 }
 0x24b   : > { %1262 = vrot.lane.b32.xlu0 %v6977_v45, %s6415_s27  ;;  %v1184_v55 = vmul.f32 0.1, %v1144_v56  ;;  %vm1164_vm3 = vcmp.ge.f32.partialorder %v1144_v56, 0.0 }
 0x24c   : > { %v6987_v19 = vpop.permute.xlu0 %1079  ;;  %v6989_v62 = vpop.permute.xlu1 %1071 }
 0x24d   : > { %v1204_v13 = vsel %vm1164_vm3, %v1144_v56, %v1184_v55  ;;  %vm7024_vm3 = vmand %vm274_vm14, %vm279_vm15  ;;  %v1108_v61 = vsel %vm1105_vm0, %v6975_v31, %v6989_v62 }
 0x24e   : > { %v8903_v30 = vsel %vm7024_vm3, 4294967295, %v8902_v30 }
 0x24f   : > { %8904 = vst [vmem:[#allocation31_spill] sm:$0xff] %v8903_v30 }
 0x250   : > { %v1088_v53 = vpop.permute.xlu0 %1087  ;;  %v1078_v58 = vpop.permute.xlu1 %1077 }
 0x251   : > { %v1110_v29 = vsel %vm1105_vm0, %v1076_v36, %v1078_v58  ;;  %v1111_v21 = vsel %vm1105_vm0, %v1078_v58, %v6987_v19 }
 0x252   : > { %v1148_v17 = vsel %vm6991_vm2, %v1110_v29, 0.0  ;;  %v1149_v5 = vsel %vm6981_vm1, %v1111_v21, 0.0 }
 0x253   : > { %vm1169_vm7 = vcmp.ge.f32.partialorder %v1149_v5, 0.0  ;;  %v1189_v4 = vmul.f32 0.1, %v1149_v5  ;;  %v1188_v1 = vmul.f32 0.1, %v1148_v17  ;;  %vm1168_vm10 = vcmp.ge.f32.partialorder %v1148_v17, 0.0 }
 0x254   : > { %v1096_v54 = vpop.permute.xlu0 %1095  ;;  %v1086_v26 = vpop.permute.xlu1 %1085 }
 0x255   : > { %v1157_v44 = vsel %vm6967_vm9, %v1096_v54, 0.0  ;;  %v1152_v23 = vsel %vm6967_vm9, %v1086_v26, 0.0  ;;  %v1209_v6 = vsel %vm1169_vm7, %v1149_v5, %v1189_v4  ;;  %v1208_v49 = vsel %vm1168_vm10, %v1148_v17, %v1188_v1  ;;  %vm7031_vm7 = vmand %vm273_vm13, %vm278_vm4 }
 0x256   : > { %vm1177_vm11 = vcmp.ge.f32.partialorder %v1157_v44, 0.0  ;;  %v1197_v0 = vmul.f32 0.1, %v1157_v44  ;;  %vm1172_vm12 = vcmp.ge.f32.partialorder %v1152_v23, 0.0  ;;  %v1192_v57 = vmul.f32 0.1, %v1152_v23 }
 0x257   : > { %v7011_v22 = vpack.c.bf16 %v1209_v6, %v1204_v13  ;;  %v1114_v33 = vsel %vm1105_vm0, %v1086_v26, %v1088_v53  ;;  %v7017_v40 = vpack.c.bf16 %v1208_v49, %v1203_v8  ;;  %v8906_v9 = vsel %vm7031_vm7, 4294967295, %v8905_v9 }
 0x258   : > { %v1100_v24 = vpop.permute.xlu0 %1099  ;;  %v1090_v60 = vpop.permute.xlu1 %1089  ;;  %v1217_v28 = vsel %vm1177_vm11, %v1157_v44, %v1197_v0  ;;  %v1212_v46 = vsel %vm1172_vm12, %v1152_v23, %v1192_v57  ;;  %8907 = vst [vmem:[#allocation32_spill] sm:$0xff] %v8906_v9  ;;  %v1153_v36 = vsel %vm6991_vm2, %v1114_v33, 0.0  ;;  %v1145_v20 = vsel %vm7031_vm7, %v1108_v61, 0.0 }
 0x259   : > { %1266 = vrot.lane.b32.xlu1 %v7011_v22, %s6415_s27  ;;  %v1115_v7 = vsel %vm1105_vm0, %v1088_v53, %v1090_v60  ;;  %v7021_v63 = vpack.c.bf16 %v1217_v28, %v1212_v46  ;;  %1264 = vrot.lane.b32.xlu0 %v7017_v40, %s6415_s27  ;;  %v1193_v47 = vmul.f32 0.1, %v1153_v36  ;;  %vm1173_vm4 = vcmp.ge.f32.partialorder %v1153_v36, 0.0 }
 0x25a   : > { %v1154_v41 = vsel %vm6981_vm1, %v1115_v7, 0.0  ;;  %vm1165_vm11 = vcmp.ge.f32.partialorder %v1145_v20, 0.0  ;;  %v1185_v17 = vmul.f32 0.1, %v1145_v20 }
 0x25b   : > { %vm1174_vm8 = vcmp.ge.f32.partialorder %v1154_v41, 0.0  ;;  %v1194_v51 = vmul.f32 0.1, %v1154_v41  ;;  %v1213_v5 = vsel %vm1173_vm4, %v1153_v36, %v1193_v47 }
 0x25c   : > { %v1094_v43 = vpop.permute.xlu0 %1093  ;;  %v1092_v3 = vpop.permute.xlu1 %1091 }
 0x25d   : > { %1272 = vrot.lane.b32.xlu1 %v7021_v63, %s6415_s27  ;;  %v1116_v18 = vsel %vm1105_vm0, %v1090_v60, %v1092_v3  ;;  %v1117_v52 = vsel %vm1105_vm0, %v1092_v3, %v1094_v43 }
 0x25e   : > { %v1155_v37 = vsel %vm7031_vm7, %v1116_v18, 0.0  ;;  %v1156_v31 = vsel %vm7024_vm3, %v1117_v52, 0.0 }
 0x25f   : > { %v1196_v59 = vmul.f32 0.1, %v1156_v31  ;;  %vm1176_vm10 = vcmp.ge.f32.partialorder %v1156_v31, 0.0  ;;  %v1195_v58 = vmul.f32 0.1, %v1155_v37  ;;  %vm1175_vm12 = vcmp.ge.f32.partialorder %v1155_v37, 0.0 }
 0x260   : > { %v1074_v56 = vpop.permute.xlu0 %1073  ;;  %v1098_v53 = vpop.permute.xlu1 %1097 }
 0x261   : > { %v1118_v27 = vsel %vm1105_vm0, %v1096_v54, %v1098_v53  ;;  %v1119_v29 = vsel %vm1105_vm0, %v1098_v53, %v1100_v24  ;;  %v1109_v21 = vsel %vm1105_vm0, %v6989_v62, %v1074_v56  ;;  %v1214_v54 = vsel %vm1174_vm8, %v1154_v41, %v1194_v51 }
 0x262   : > { %v1158_v50 = vsel %vm6991_vm2, %v1118_v27, 0.0  ;;  %v1159_v55 = vsel %vm6981_vm1, %v1119_v29, 0.0  ;;  %v1216_v26 = vsel %vm1176_vm10, %v1156_v31, %v1196_v59  ;;  %v1146_v62 = vsel %vm7024_vm3, %v1109_v21, 0.0  ;;  %v5755_v27 = vld [vmem:[%s8798_s2 + $0x30] sm:$0xff] }
 0x263   : > { %vm1178_vm13 = vcmp.ge.f32.partialorder %v1158_v50, 0.0  ;;  %vm1179_vm14 = vcmp.ge.f32.partialorder %v1159_v55, 0.0  ;;  %v1198_v42 = vmul.f32 0.1, %v1158_v50  ;;  %v1199_v4 = vmul.f32 0.1, %v1159_v55 }
 0x264   : > { %v1104_v48 = vpop.permute.xlu0 %1103  ;;  %v1102_v1 = vpop.permute.xlu1 %1101  ;;  %v1215_v6 = vsel %vm1175_vm12, %v1155_v37, %v1195_v58  ;;  %vm1166_vm8 = vcmp.ge.f32.partialorder %v1146_v62, 0.0  ;;  %v1186_v28 = vmul.f32 0.1, %v1146_v62  ;;  %v1205_v59 = vsel %vm1165_vm11, %v1145_v20, %v1185_v17  ;;  %v5756_v20 = vld [vmem:[%s8798_s2 + $0x38] sm:$0xff] }
 0x265   : > { %v1120_v44 = vsel %vm1105_vm0, %v1100_v24, %v1102_v1  ;;  %v1121_v23 = vsel %vm1105_vm0, %v1102_v1, %v1104_v48  ;;  %v1219_v57 = vsel %vm1179_vm14, %v1159_v55, %v1199_v4  ;;  %v1218_v8 = vsel %vm1178_vm13, %v1158_v50, %v1198_v42 }
 0x266   : > { %v1160_v0 = vsel %vm7031_vm7, %v1120_v44, 0.0  ;;  %v1161_v13 = vsel %vm7024_vm3, %v1121_v23, 0.0  ;;  %v1229_v33 = vpack.c.bf16 %v1219_v57, %v1214_v54  ;;  %v1228_v46 = vpack.c.bf16 %v1218_v8, %v1213_v5 }
 0x267   : > { %vm1180_vm15 = vcmp.ge.f32.partialorder %v1160_v0, 0.0  ;;  %vm1181_vm4 = vcmp.ge.f32.partialorder %v1161_v13, 0.0  ;;  %v1200_v49 = vmul.f32 0.1, %v1160_v0  ;;  %v1201_v60 = vmul.f32 0.1, %v1161_v13 }
 0x268   : > { %v1084_v24 = vpop.permute.xlu0 %1083  ;;  %v1082_v7 = vpop.permute.xlu1 %1081  ;;  %1276 = vrot.lane.b32.xlu0 %v1229_v33, %s6415_s27  ;;  %1274 = vrot.lane.b32.xlu1 %v1228_v46, %s6415_s27  ;;  %v1206_v47 = vsel %vm1166_vm8, %v1146_v62, %v1186_v28  ;;  %v6197_v62 = vld [vmem:[#allocation5 + $0x40] sm:$0xff]   ;;  %v8908_v8 = vmov 0  }
 0x269   : > { %v1112_v61 = vsel %vm1105_vm0, %v6987_v19, %v1082_v7  ;;  %v1113_v36 = vsel %vm1105_vm0, %v1082_v7, %v1084_v24  ;;  %v1221_v43 = vsel %vm1181_vm4, %v1161_v13, %v1201_v60  ;;  %v1220_v3 = vsel %vm1180_vm15, %v1160_v0, %v1200_v49  ;;  %v6198_v60 = vld [vmem:[#allocation5 + $0x48] sm:$0xff]  }
 0x26a   : > { %v1150_v41 = vsel %vm7031_vm7, %v1112_v61, 0.0  ;;  %v1151_v18 = vsel %vm7024_vm3, %v1113_v36, 0.0  ;;  %v1231_v52 = vpack.c.bf16 %v1221_v43, %v1216_v26  ;;  %v1230_v37 = vpack.c.bf16 %v1220_v3, %v1215_v6 }
 0x26b   : > { %vm1170_vm10 = vcmp.ge.f32.partialorder %v1150_v41, 0.0  ;;  %vm1171_vm12 = vcmp.ge.f32.partialorder %v1151_v18, 0.0  ;;  %v1190_v31 = vmul.f32 0.1, %v1150_v41  ;;  %v1191_v19 = vmul.f32 0.1, %v1151_v18 }
 0x26c   : > { %1280 = vrot.lane.b32.xlu1 %v1231_v52, %s6415_s27  ;;  %1278 = vrot.lane.b32.xlu0 %v1230_v37, %s6415_s27  ;;  %vm8909_vm0 = vcmask 1039360  }
 0x26d   : > { %v1211_v51 = vsel %vm1171_vm12, %v1151_v18, %v1191_v19  ;;  %v1210_v56 = vsel %vm1170_vm10, %v1150_v41, %v1190_v31  ;;  %vm8910_vm11 = vmmov %vm8909_vm0  ;;  %vm1705_vm12 = vcmask 1022976  }
 0x26e   : > { %v1226_v53 = vpack.c.bf16 %v1211_v51, %v1206_v47  ;;  %v1225_v58 = vpack.c.bf16 %v1210_v56, %v1205_v59  ;;  %vm8911_vm13 = vmmov %vm8909_vm0 }
 0x26f   : > { %vm8912_vm14 = vmmov %vm8909_vm0 }
 0x270   : > { %1270 = vrot.lane.b32.xlu0 %v1226_v53, %s6415_s27  ;;  %1268 = vrot.lane.b32.xlu1 %v1225_v58, %s6415_s27  ;;  %vm8913_vm15 = vmmov %vm8909_vm0 }
 0x271   : > { %vm8914_vm4 = vmmov %vm8909_vm0 }
 0x272   : > { %vm8915_vm8 = vmmov %vm8909_vm0 }
 0x273   : > { %vm8916_vm10 = vmmov %vm8909_vm0 }
 0x274   : > { %1485 = vrot.lane.b32.xlu0 %v1229_v33, %s6413_s25  ;;  %1483 = vrot.lane.b32.xlu1 %v1228_v46, %s6413_s25 }
 0x278   : > { %1473 = vrot.lane.b32.xlu0 %v7017_v40, %s6413_s25  ;;  %1481 = vrot.lane.b32.xlu1 %v7021_v63, %s6413_s25 }
 0x27c   : > { %1471 = vrot.lane.b32.xlu0 %v6977_v45, %s6413_s25  ;;  %1475 = vrot.lane.b32.xlu1 %v7011_v22, %s6413_s25 }
 0x280   : > { %1489 = vrot.lane.b32.xlu0 %v1231_v52, %s6413_s25  ;;  %1487 = vrot.lane.b32.xlu1 %v1230_v37, %s6413_s25 }
 0x284   : > { %1479 = vrot.lane.b32.xlu0 %v1226_v53, %s6413_s25  ;;  %1477 = vrot.lane.b32.xlu1 %v1225_v58, %s6413_s25  ;;  %s6427_s25 = smov 11  }
 0x288   : > { %1699 = vrot.lane.b32.xlu0 %v1229_v33, %s6417_s7  ;;  %1697 = vrot.lane.b32.xlu1 %v1228_v46, %s6417_s7 }
 0x28c   : > { %1701 = vrot.lane.b32.xlu0 %v1230_v37, %s6417_s7  ;;  %1695 = vrot.lane.b32.xlu1 %v7021_v63, %s6417_s7 }
 0x290   : > { %1687 = vrot.lane.b32.xlu0 %v7017_v40, %s6417_s7  ;;  %1703 = vrot.lane.b32.xlu1 %v1231_v52, %s6417_s7  ;;  %v5754_v40 = vld [vmem:[%s8798_s2 + $0x28] sm:$0xff]  ;;  %v6199_v52 = vld [vmem:[#allocation5 + $0x30] sm:$0xff]  }
 0x294   : > { %1685 = vrot.lane.b32.xlu0 %v6977_v45, %s6417_s7  ;;  %1689 = vrot.lane.b32.xlu1 %v7011_v22, %s6417_s7  ;;  %v5753_v45 = vld [vmem:[%s8798_s2 + $0x20] sm:$0xff] }
 0x298   : > { %1693 = vrot.lane.b32.xlu0 %v1226_v53, %s6417_s7  ;;  %1691 = vrot.lane.b32.xlu1 %v1225_v58, %s6417_s7  ;;  %v6200_v53 = vld [vmem:[#allocation5 + $0x38] sm:$0xff]   ;;  %s5701_s7 = sshll.u32 %s215_s6, 7 }
 0x299   : > { %s8661_s8 = scalar_lea.vmem [#allocation7], %s5701_s7 }
 0x29c   : > { %1927 = vperm.xlu0 %6189, %v5756_v20   ;;  %1922 = vperm.xlu1 %6190, %v5755_v27  }
 0x2a0   : > { %1917 = vperm.xlu0 %6189, %v5754_v40   ;;  %1912 = vperm.xlu1 %6190, %v5753_v45  }
 0x2bd   : > { %v1263_v63 = vpop.permute.xlu0 %1262 }
 0x2cb   : > { %v1267_v22 = vpop.permute.xlu1 %1266  ;;  %v1265_v29 = vpop.permute.xlu0 %1264 }
 0x2cc   : > { %v1283_v42 = vsel %vm791_vm6, %v1265_v29, %v1267_v22  ;;  %v1282_v26 = vsel %vm791_vm6, %v1263_v63, %v1265_v29 }
 0x2cf   : > { %v1273_v21 = vpop.permute.xlu1 %1272 }
 0x2da   : > { %v1277_v50 = vpop.permute.xlu0 %1276  ;;  %v1275_v55 = vpop.permute.xlu1 %1274 }
 0x2db   : > { %v1287_v17 = vsel %vm791_vm6, %v1275_v55, %v1277_v50  ;;  %v1286_v5 = vsel %vm791_vm6, %v1273_v21, %v1275_v55 }
 0x2dc   : > { %1318 = vmatprep.subr.bf16.mxu1 %v1287_v17  ;;  %v6201_v17 = vld [vmem:[#allocation5 + $0x50] sm:$0xff]  }
 0x2dd   : > { %1319 = vmatpush1.bf16.msra.mxu1 %v1286_v5 }
 0x2de   : > { %v1279_v4 = vpop.permute.xlu0 %1278  ;;  %1320 = vmatprep.subr.bf16.mxu1 %v1283_v42  ;;  %v1281_v48 = vpop.permute.xlu1 %1280 }
 0x2df   : > { %v1289_v1 = vsel %vm791_vm6, %v1279_v4, %v1281_v48  ;;  %v1288_v54 = vsel %vm791_vm6, %v1277_v50, %v1279_v4 }
 0x2e0   : > { %1371 = vmatprep.subr.bf16.mxu0 %v1289_v1  ;;  %v6202_v1 = vld [vmem:[#allocation5 + $0x58] sm:$0xff]  }
 0x2e1   : > { %1321 = vmatpush1.bf16.msra.mxu1 %v1282_v26  ;;  %1372 = vmatpush1.bf16.msra.mxu0 %v1288_v54 }
 0x2e2   : > { %v1271_v44 = vpop.permute.xlu0 %1270  ;;  %5953 = vmatprep.subr.bf16.mxu1 %v1281_v48  ;;  %v1269_v23 = vpop.permute.xlu1 %1268 }
 0x2e3   : > { %v1285_v6 = vsel %vm791_vm6, %v1269_v23, %v1271_v44  ;;  %v1284_v0 = vsel %vm791_vm6, %v1267_v22, %v1269_v23 }
 0x2e4   : > { %5731 = vmatmul.mubr.msk.bf16.vlgmr.msra.gmra.mxu1 %vm423_vm5, %v6197_v62  ;;  %1373 = vmatprep.subr.bf16.mxu0 %v1285_v6 }
 0x2e5   : > { %1374 = vmatpush1.bf16.msra.mxu0 %v1284_v0  ;;  %5954 = vmatpush3.bf16.msra.mxu1 %v1281_v48 }
 0x2e6   : > { %v1486_v13 = vpop.permute.xlu0 %1485  ;;  %5955 = vmatprep.subr.bf16.mxu1 %v1271_v44  ;;  %v1484_v57 = vpop.permute.xlu1 %1483  ;;  %1348 = vmatprep.mubr.bf16.mxu1 %v8908_v8 }
 0x2e7   : > { %v1496_v49 = vsel %vm8909_vm0, %v1484_v57, %v1486_v13  ;;  %vm2010_vm0 = vcmask 15360  }
 0x2e8   : > { %5733 = vmatmul.mubr.msk.bf16.vlgmr.msra.gmra.mxu0 %vm423_vm5, %v6197_v62  ;;  %1527 = vmatprep.subr.bf16.mxu0 %v1496_v49 }
 0x2e9   : > { %5956 = vmatpush3.bf16.msra.mxu1 %v1271_v44  ;;  %1401 = vmatprep.mubr.bf16.mxu0 %v8908_v8 }
 0x2ea   : > { %v1474_v28 = vpop.permute.xlu0 %1473  ;;  %v1482_v24 = vpop.permute.xlu1 %1481 }
 0x2eb   : > { %v1495_v33 = vsel %vm8910_vm11, %v1482_v24, %v1484_v57 }
 0x2ec   : > { %5732 = vmatmul.mubr.msk.bf16.gmra.mxu1 %vm423_vm5, %v6198_v60  ;;  %1528 = vmatpush1.bf16.msra.mxu0 %v1495_v33 }
 0x2ed   : > { %5957 = vmatprep.mubr.msk.bf16.mxu1 %vm423_vm5, %v6197_v62 }
 0x2ee   : > { %v1472_v46 = vpop.permute.xlu0 %1471  ;;  %v1476_v7 = vpop.permute.xlu1 %1475 }
 0x2ef   : > { %v1491_v61 = vsel %vm8911_vm13, %v1472_v46, %v1474_v28  ;;  %v1492_v36 = vsel %vm8912_vm14, %v1474_v28, %v1476_v7 }
 0x2f0   : > { %5734 = vmatmul.mubr.msk.bf16.gmra.mxu0 %vm423_vm5, %v6198_v60  ;;  %1529 = vmatprep.subr.bf16.mxu0 %v1492_v36 }
 0x2f1   : > { %1530 = vmatpush1.bf16.msra.mxu0 %v1491_v61  ;;  %1547 = vmatprep.mubr.bf16.mxu0 %v8908_v8 }
 0x2f2   : > { %v1490_v43 = vpop.permute.xlu0 %1489  ;;  %v1488_v3 = vpop.permute.xlu1 %1487 }
 0x2f3   : > { %5961 = vmatprep.subr.bf16.mxu0 %v1490_v43  ;;  %v1498_v41 = vsel %vm8913_vm15, %v1488_v3, %v1490_v43  ;;  %v1497_v18 = vsel %vm8914_vm4, %v1486_v13, %v1488_v3 }
 0x2f4   : > { %5958 = vmatmul.mubr.msk.bf16.vlgmr.msra.gmra.mxu1 %vm423_vm5, %v6198_v60  ;;  %1580 = vmatprep.subr.bf16.mxu1 %v1498_v41 }
 0x2f5   : > { %1581 = vmatpush1.bf16.msra.mxu1 %v1497_v18  ;;  %1600 = vmatprep.mubr.bf16.mxu1 %v8908_v8 }
 0x2f6   : > { %v1480_v37 = vpop.permute.xlu0 %1479  ;;  %v1478_v31 = vpop.permute.xlu1 %1477 }
 0x2f7   : > { %v1494_v19 = vsel %vm8915_vm8, %v1478_v31, %v1480_v37  ;;  %v1493_v47 = vsel %vm8916_vm10, %v1476_v7, %v1478_v31 }
 0x2f8   : > { %5739 = vmatmul.mubr.msk.bf16.vlgmr.msra.gmra.mxu0 %vm423_vm5, %v6199_v52  ;;  %1582 = vmatprep.subr.bf16.mxu1 %v1494_v19 }
 0x2f9   : > { %5962 = vmatpush3.bf16.msra.mxu0 %v1490_v43  ;;  %1583 = vmatpush1.bf16.msra.mxu1 %v1493_v47 }
 0x2fa   : > { %5963 = vmatprep.subr.bf16.mxu0 %v1480_v37  ;;  %v1700_v51 = vpop.permute.xlu0 %1699  ;;  %v1698_v59 = vpop.permute.xlu1 %1697  ;;  %1557 = vmatprep.mubr.bf16.mxu0 %v8908_v8 }
 0x2fb   : > { %v1711_v56 = vsel %vm1705_vm12, %v1698_v59, %v1700_v51 }
 0x2fc   : > { %5741 = vmatmul.mubr.msk.bf16.vlgmr.msra.gmra.mxu1 %vm423_vm5, %v6199_v52  ;;  %1742 = vmatprep.subr.bf16.mxu1 %v1711_v56 }
 0x2fd   : > { %5964 = vmatpush3.bf16.msra.mxu0 %v1480_v37  ;;  %1610 = vmatprep.mubr.bf16.mxu1 %v8908_v8 }
 0x2fe   : > { %v1702_v58 = vpop.permute.xlu0 %1701  ;;  %v1696_v20 = vpop.permute.xlu1 %1695 }
 0x2ff   : > { %v1710_v27 = vsel %vm1705_vm12, %v1696_v20, %v1698_v59  ;;  %v1712_v55 = vsel %vm1705_vm12, %v1700_v51, %v1702_v58 }
 0x300   : > { %5740 = vmatmul.mubr.msk.bf16.gmra.mxu0 %vm423_vm5, %v6200_v53  ;;  %1743 = vmatpush1.bf16.msra.mxu1 %v1710_v27 }
 0x301   : > { %5965 = vmatprep.mubr.msk.bf16.mxu0 %vm423_vm5, %v6199_v52 }
 0x302   : > { %v1688_v40 = vpop.permute.xlu0 %1687  ;;  %v1704_v45 = vpop.permute.xlu1 %1703 }
 0x303   : > { %v1713_v22 = vsel %vm1705_vm12, %v1702_v58, %v1704_v45 }
 0x304   : > { %5742 = vmatmul.mubr.msk.bf16.gmra.mxu1 %vm423_vm5, %v6200_v53  ;;  %1795 = vmatprep.subr.bf16.mxu0 %v1713_v22 }
 0x305   : > { %1762 = vmatprep.mubr.bf16.mxu1 %v8908_v8 }
 0x306   : > { %v1686_v63 = vpop.permute.xlu0 %1685  ;;  %v1690_v29 = vpop.permute.xlu1 %1689 }
 0x307   : > { %v1706_v21 = vsel %vm1705_vm12, %v1686_v63, %v1688_v40  ;;  %v1707_v50 = vsel %vm1705_vm12, %v1688_v40, %v1690_v29 }
 0x308   : > { %5966 = vmatmul.mubr.msk.bf16.vlgmr.msra.gmra.mxu0 %vm423_vm5, %v6200_v53  ;;  %1744 = vmatprep.subr.bf16.mxu1 %v1707_v50 }
 0x309   : > { %1796 = vmatpush1.bf16.msra.mxu0 %v1712_v55  ;;  %1745 = vmatpush1.bf16.msra.mxu1 %v1706_v21 }
 0x30a   : > { %v1694_v5 = vpop.permute.xlu0 %1693  ;;  %5969 = vmatprep.subr.bf16.mxu1 %v1704_v45  ;;  %v1692_v42 = vpop.permute.xlu1 %1691  ;;  %1815 = vmatprep.mubr.bf16.mxu0 %v8908_v8 }
 0x30b   : > { %v1709_v4 = vsel %vm1705_vm12, %v1692_v42, %v1694_v5  ;;  %v1708_v48 = vsel %vm1705_vm12, %v1690_v29, %v1692_v42 }
 0x30c   : > { %5747 = vmatmul.mubr.msk.bf16.vlgmr.msra.gmra.mxu1 %vm423_vm5, %v6201_v17  ;;  %1797 = vmatprep.subr.bf16.mxu0 %v1709_v4 }
 0x30d   : > { %1798 = vmatpush1.bf16.msra.mxu0 %v1708_v48  ;;  %5970 = vmatpush3.bf16.msra.mxu1 %v1704_v45 }
 0x30e   : > { %5971 = vmatprep.subr.bf16.mxu1 %v1694_v5  ;;  %1772 = vmatprep.mubr.bf16.mxu1 %v8908_v8 }
 0x310   : > { %5749 = vmatmul.mubr.msk.bf16.vlgmr.msra.gmra.mxu0 %vm423_vm5, %v6201_v17 }
 0x311   : > { %5972 = vmatpush3.bf16.msra.mxu1 %v1694_v5  ;;  %1825 = vmatprep.mubr.bf16.mxu0 %v8908_v8 }
 0x314   : > { %5748 = vmatmul.mubr.msk.bf16.gmra.mxu1 %vm423_vm5, %v6202_v1 }
 0x315   : > { %5973 = vmatprep.mubr.msk.bf16.mxu1 %vm423_vm5, %v6201_v17 }
 0x317   : > { %v7204_v40 = vpop.permute.xlu1 %1922  ;;  %v7214_v17 = vpop.permute.xlu0 %1927 }
 0x318   : > { %5750 = vmatmul.mubr.msk.bf16.gmra.mxu0 %vm423_vm5, %v6202_v1 }
 0x319   : > { %2264 = vmatprep.mubr.bf16.mxu0 %v8908_v8 }
 0x31b   : > { %v7216_v5 = vpop.permute.xlu1 %1912 }
 0x31c   : > { %5974 = vmatmul.mubr.msk.bf16.vlgmr.msra.gmra.mxu1 %vm423_vm5, %v6202_v1 }
 0x31d   : > { %2317 = vmatprep.mubr.bf16.mxu1 %v8908_v8 }
 0x3a4   : > { %v1340_v54 = vpop.f32.mrf.mxu1 }
 0x3a6   : > { %v1342_v26 = vpop.f32.mrf.mxu1 }
 0x3a8   : > { %v1344_v62 = vpop.f32.mrf.mxu1  ;;  %v1393_v44 = vpop.f32.mrf.mxu0 }
 0x3aa   : > { %v1346_v23 = vpop.f32.mrf.mxu1  ;;  %v7172_v6 = vpop.f32.mrf.mxu0 }
 0x3ac   : > { %v1350_v0 = vpop.f32.mrf.mxu1  ;;  %v7174_v13 = vpop.f32.mrf.mxu0 }
 0x3ae   : > { %v1352_v57 = vpop.f32.mrf.mxu1  ;;  %v7176_v49 = vpop.f32.mrf.mxu0 }
 0x3b0   : > { %v7178_v60 = vpop.f32.mrf.mxu1  ;;  %v7180_v28 = vpop.f32.mrf.mxu0 }
 0x3b2   : > { %v7182_v24 = vpop.f32.mrf.mxu1  ;;  %v7184_v33 = vpop.f32.mrf.mxu0 }
 0x3b4   : > { %v7186_v46 = vpop.f32.mrf.mxu0  ;;  %v7188_v7 = vpop.f32.mrf.mxu1 }
 0x3b6   : > { %v7190_v61 = vpop.f32.mrf.mxu0  ;;  %v7192_v36 = vpop.f32.mrf.mxu1 }
 0x3b8   : > { %v7194_v43 = vpop.f32.mrf.mxu1  ;;  %v1549_v3 = vpop.f32.mrf.mxu0 }
 0x3b9   : > { %v1550_v21 = vadd.f32 %v1549_v3, %v1340_v54 }
 0x3ba   : > { %v7196_v41 = vpop.f32.mrf.mxu1  ;;  %v1551_v18 = vpop.f32.mrf.mxu0 }
 0x3bb   : > { %v1552_v42 = vadd.f32 %v1551_v18, %v1342_v26 }
 0x3bc   : > { %v1553_v52 = vpop.f32.mrf.mxu0  ;;  %v1602_v37 = vpop.f32.mrf.mxu1 }
 0x3bd   : > { %v1554_v8 = vadd.f32 %v1553_v52, %v1344_v62  ;;  %v1603_v30 = vadd.f32 %v1602_v37, %v1393_v44 }
 0x3be   : > { %v1555_v31 = vpop.f32.mrf.mxu0  ;;  %v1604_v19 = vpop.f32.mrf.mxu1 }
 0x3bf   : > { %v1556_v54 = vadd.f32 %v1555_v31, %v1346_v23 }
 0x3c0   : > { %v1559_v47 = vpop.f32.mrf.mxu0  ;;  %v1606_v51 = vpop.f32.mrf.mxu1 }
 0x3c2   : > { %v1561_v59 = vpop.f32.mrf.mxu0  ;;  %v7198_v56 = vpop.f32.mrf.mxu1 }
 0x3c3   : > { %v1562_v23 = vadd.f32 %v1561_v59, %v1352_v57 }
 0x3c4   : > { %v1563_v53 = vpop.f32.mrf.mxu0  ;;  %v1612_v58 = vpop.f32.mrf.mxu1 }
 0x3c6   : > { %v7200_v20 = vpop.f32.mrf.mxu0  ;;  %v7202_v27 = vpop.f32.mrf.mxu1 }
 0x3c8   : > { %v7206_v45 = vpop.f32.mrf.mxu1  ;;  %v5967_v22 = vpop.f32.mrf.mxu0 }
 0x3ca   : > { %v7208_v63 = vpop.f32.mrf.mxu1  ;;  %v7210_v29 = vpop.f32.mrf.mxu0 }
 0x3cc   : > { %v7212_v50 = vpop.f32.mrf.mxu0  ;;  %v1764_v55 = vpop.f32.mrf.mxu1 }
 0x3cd   : > { %v1885_v4 = vadd.f32 %v1764_v55, %v1550_v21  ;;  %v7223_v21 = vpop.permute.xlu0 %1917  ;;  %v1560_v55 = vadd.f32 %v1559_v47, %v1350_v0  ;;  %v1564_v47 = vadd.f32 %v1563_v53, %v7178_v60  ;;  %v1566_v60 = vadd.f32 %v7200_v20, %v7182_v24 }
 0x3ce   : > { %v7218_v48 = vpop.f32.mrf.mxu0  ;;  %v1766_v1 = vpop.f32.mrf.mxu1 }
 0x3cf   : > { %v1930_v9 = vadd.f32 %v7216_v5, %v1885_v4  ;;  %v1886_v12 = vadd.f32 %v1766_v1, %v1552_v42  ;;  %v1605_v42 = vadd.f32 %v1604_v19, %v7172_v6 }
 0x3d0   : > { %v1768_v2 = vpop.f32.mrf.mxu1  ;;  %v1817_v11 = vpop.f32.mrf.mxu0 }
 0x3d1   : > { %v1931_v3 = vadd.f32 %v7216_v5, %v1886_v12  ;;  %v1890_v35 = vadd.f32 %v1768_v2, %v1554_v8  ;;  %v1887_v10 = vadd.f32 %v1817_v11, %v1603_v30  ;;  %1970 = vrot.lane.b32.xlu1 %v1930_v9, %s6418_s23  ;;  %v1607_v30 = vadd.f32 %v1606_v51, %v7174_v13 }
 0x3d2   : > { %v1770_v26 = vpop.f32.mrf.mxu1  ;;  %v1819_v18 = vpop.f32.mrf.mxu0  ;;  %v1613_v51 = vadd.f32 %v1612_v58, %v7180_v28 }
 0x3d3   : > { %v1932_v62 = vadd.f32 %v7216_v5, %v1887_v10  ;;  %v1891_v44 = vadd.f32 %v1770_v26, %v1556_v54  ;;  %1972 = vrot.lane.b32.xlu0 %v1931_v3, %s6418_s23  ;;  %v1935_v12 = vadd.f32 %v7223_v21, %v1890_v35  ;;  %v1888_v59 = vadd.f32 %v1819_v18, %v1605_v42 }
 0x3d4   : > { %v1774_v52 = vpop.f32.mrf.mxu1  ;;  %v1821_v37 = vpop.f32.mrf.mxu0  ;;  %v1664_v3 = vadd.f32 %v5967_v22, %v7188_v7  ;;  %v1617_v18 = vadd.f32 %v7206_v45, %v7186_v46  ;;  %v1615_v22 = vadd.f32 %v7202_v27, %v7184_v33 }
 0x3d5   : > { %1974 = vrot.lane.b32.xlu1 %v1932_v62, %s6418_s23  ;;  %v1936_v9 = vadd.f32 %v7223_v21, %v1891_v44  ;;  %v1895_v8 = vadd.f32 %v1774_v52, %v1560_v55  ;;  %v1892_v4 = vadd.f32 %v1821_v37, %v1607_v30  ;;  %v1933_v26 = vadd.f32 %v7216_v5, %v1888_v59 }
 0x3d6   : > { %v1776_v2 = vpop.f32.mrf.mxu1  ;;  %v1823_v11 = vpop.f32.mrf.mxu0  ;;  %v1656_v37 = vadd.f32 %v7210_v29, %v7192_v36  ;;  %v1609_v30 = vadd.f32 %v7198_v56, %v7176_v49 }
 0x3d7   : > { %v1896_v31 = vadd.f32 %v1776_v2, %v1562_v23  ;;  %1980 = vrot.lane.b32.xlu0 %v1935_v12, %s6418_s23  ;;  %v1940_v13 = vadd.f32 %v7204_v40, %v1895_v8  ;;  %v1937_v1 = vadd.f32 %v7223_v21, %v1892_v4  ;;  %v1619_v23 = vadd.f32 %v7208_v63, %v7190_v61 }
 0x3d8   : > { %v1778_v10 = vpop.f32.mrf.mxu1  ;;  %v1827_v35 = vpop.f32.mrf.mxu0  ;;  %v1667_v2 = vadd.f32 %v7212_v50, %v7194_v43  ;;  %v1659_v8 = vadd.f32 %v7218_v48, %v7196_v41 }
 0x3d9   : > { %v1941_v0 = vadd.f32 %v7204_v40, %v1896_v31  ;;  %1982 = vrot.lane.b32.xlu1 %v1936_v9, %s6418_s23  ;;  %v1900_v54 = vadd.f32 %v1778_v10, %v1564_v47  ;;  %v1897_v62 = vadd.f32 %v1827_v35, %v1613_v51  ;;  %v1893_v31 = vadd.f32 %v1823_v11, %v1609_v30 }
 0x3da   : > { %v1780_v57 = vpop.f32.mrf.mxu1  ;;  %v1829_v6 = vpop.f32.mrf.mxu0 }
 0x3db   : > { %1992 = vrot.lane.b32.xlu0 %v1941_v0, %s6418_s23  ;;  %v1945_v53 = vadd.f32 %v7214_v17, %v1900_v54  ;;  %v1942_v44 = vadd.f32 %v7204_v40, %v1897_v62  ;;  %v1901_v7 = vadd.f32 %v1780_v57, %v1566_v60  ;;  %v1898_v46 = vadd.f32 %v1829_v6, %v1615_v22 }
 0x3dc   : > { %v5975_v19 = vpop.f32.mrf.mxu1  ;;  %v1831_v58 = vpop.f32.mrf.mxu0  ;;  %v1938_v49 = vadd.f32 %v7223_v21, %v1893_v31 }
 0x3dd   : > { %1990 = vrot.lane.b32.xlu1 %v1940_v13, %s6418_s23  ;;  %v1899_v28 = vadd.f32 %v5975_v19, %v1664_v3  ;;  %v1902_v52 = vadd.f32 %v1831_v58, %v1617_v18  ;;  %v1946_v55 = vadd.f32 %v7214_v17, %v1901_v7  ;;  %v1943_v36 = vadd.f32 %v7204_v40, %v1898_v46  ;;  %v8920_v58 = vld [vmem:[#allocation18_spill] sm:$0xff] }
 0x3de   : > { %v1870_v20 = vpop.f32.mrf.mxu1  ;;  %v1833_v45 = vpop.f32.mrf.mxu0 }
 0x3df   : > { %1984 = vrot.lane.b32.xlu0 %v1937_v1, %s6418_s23  ;;  %v1944_v24 = vadd.f32 %v7204_v40, %v1899_v28  ;;  %v1947_v33 = vadd.f32 %v7214_v17, %v1902_v52  ;;  %v1889_v27 = vadd.f32 %v1870_v20, %v1656_v37  ;;  %v1903_v29 = vadd.f32 %v1833_v45, %v1619_v23  ;;  %v8922_v20 = vld [vmem:[#allocation22_spill] sm:$0xff] }
 0x3e0   : > { %v5976_v12 = vpop.f32.mrf.mxu1 }
 0x3e1   : > { %1976 = vrot.lane.b32.xlu1 %v1933_v26, %s6418_s23  ;;  %v1934_v9 = vadd.f32 %v7216_v5, %v1889_v27  ;;  %v1904_v61 = vadd.f32 %v5976_v12, %v1667_v2  ;;  %v1948_v43 = vadd.f32 %v7214_v17, %v1903_v29  ;;  %v8924_v12 = vld [vmem:[#allocation19_spill] sm:$0xff] }
 0x3e2   : > { %v1873_v63 = vpop.f32.mrf.mxu1 }
 0x3e3   : > { %2000 = vrot.lane.b32.xlu0 %v1945_v53, %s6418_s23  ;;  %v1949_v40 = vadd.f32 %v7214_v17, %v1904_v61  ;;  %v1894_v50 = vadd.f32 %v1873_v63, %v1659_v8 }
 0x3e5   : > { %1994 = vrot.lane.b32.xlu1 %v1942_v44, %s6418_s23  ;;  %v1939_v56 = vadd.f32 %v7223_v21, %v1894_v50 }
 0x3e7   : > { %1998 = vrot.lane.b32.xlu0 %v1944_v24, %s6418_s23 }
 0x3e9   : > { %2002 = vrot.lane.b32.xlu1 %v1946_v55, %s6418_s23 }
 0x3eb   : > { %2004 = vrot.lane.b32.xlu0 %v1947_v33, %s6418_s23 }
 0x3ed   : > { %1996 = vrot.lane.b32.xlu1 %v1943_v36, %s6418_s23 }
 0x3ef   : > { %1978 = vrot.lane.b32.xlu0 %v1934_v9, %s6418_s23 }
 0x3f1   : > { %2006 = vrot.lane.b32.xlu1 %v1948_v43, %s6418_s23 }
 0x3f3   : > { %2008 = vrot.lane.b32.xlu0 %v1949_v40, %s6418_s23  ;;  %v8926_v40 = vld [vmem:[#allocation16_spill] sm:$0xff] }
 0x3f5   : > { %1986 = vrot.lane.b32.xlu1 %v1938_v49, %s6418_s23  ;;  %v8928_v49 = vld [vmem:[#allocation20_spill] sm:$0xff] }
 0x3f7   : > { %1988 = vrot.lane.b32.xlu0 %v1939_v56, %s6418_s23  ;;  %s8736_s23 = scalar_lea.sflag [#allocation4], %s215_s6 }
 0x443   : > { %v1971_v41 = vpop.permute.xlu1 %1970 }
 0x444   : > { %v2047_v5 = vsel %vm6967_vm9, %v1971_v41, 0.0 }
 0x445   : > { %v1973_v48 = vpop.permute.xlu0 %1972  ;;  %v7287_v11 = vadd.f32 %v2047_v5, %v6670_v38 }
 0x446   : > { %v2011_v17 = vsel %vm2010_vm0, %v1971_v41, %v1973_v48 }
 0x447   : > { %v2048_v10 = vsel %vm6991_vm2, %v2011_v17, 0.0  ;;  %v1975_v42 = vpop.permute.xlu1 %1974  ;;  %v2107_v57 = vmul.f32 0.1, %v7287_v11  ;;  %vm2087_vm11 = vcmp.ge.f32.partialorder %v7287_v11, 0.0 }
 0x448   : > { %v2012_v21 = vsel %vm2010_vm0, %v1973_v48, %v1975_v42  ;;  %v7293_v0 = vadd.f32 %v2048_v10, %v6629_v14 }
 0x449   : > { %v1981_v4 = vpop.permute.xlu0 %1980  ;;  %v2049_v59 = vsel %vm6981_vm1, %v2012_v21, 0.0  ;;  %v2127_v3 = vsel %vm2087_vm11, %v7287_v11, %v2107_v57  ;;  %v8931_v57 = vld [vmem:[#allocation17_spill] sm:$0xff] }
 0x44a   : > { %v2052_v35 = vsel %vm6967_vm9, %v1981_v4, 0.0  ;;  %v7314_v6 = vadd.f32 %v2049_v59, %v6662_v34  ;;  %vm2088_vm14 = vcmp.ge.f32.partialorder %v7293_v0, 0.0 }
 0x44b   : > { %v7299_v47 = vadd.f32 %v2052_v35, %v6672_v39  ;;  %v1983_v38 = vpop.permute.xlu1 %1982  ;;  %v2108_v39 = vmul.f32 0.1, %v7293_v0 }
 0x44c   : > { %v2015_v13 = vsel %vm2010_vm0, %v1981_v4, %v1983_v38  ;;  %8919 = vst [vmem:[#allocation35_spill] sm:$0xff] %v7314_v6  ;;  %v2109_v52 = vmul.f32 0.1, %v7314_v6  ;;  %vm2089_vm4 = vcmp.ge.f32.partialorder %v7314_v6, 0.0 }
 0x44d   : > { %8917 = vst [vmem:[#allocation33_spill] sm:$0xff] %v7299_v47  ;;  %v2112_v51 = vmul.f32 0.1, %v7299_v47  ;;  %v2053_v14 = vsel %vm6991_vm2, %v2015_v13, 0.0  ;;  %v1993_v1 = vpop.permute.xlu0 %1992  ;;  %vm2092_vm13 = vcmp.ge.f32.partialorder %v7299_v47, 0.0  ;;  %v2128_v28 = vsel %vm2088_vm14, %v7293_v0, %v2108_v39 }
 0x44e   : > { %v7310_v54 = vadd.f32 %v2053_v14, %v6631_v15  ;;  %v2129_v29 = vsel %vm2089_vm4, %v7314_v6, %v2109_v52  ;;  %v8938_v52 = vld [vmem:[#allocation23_spill] sm:$0xff] }
 0x44f   : > { %v1991_v19 = vpop.permute.xlu1 %1990  ;;  %v2132_v26 = vsel %vm2092_vm13, %v7299_v47, %v2112_v51  ;;  %v8933_v51 = vld [vmem:[#allocation27_spill] sm:$0xff] }
 0x450   : > { %8918 = vst [vmem:[#allocation34_spill] sm:$0xff] %v7310_v54  ;;  %v2057_v62 = vsel %vm6967_vm9, %v1991_v19, 0.0  ;;  %v7321_v60 = vpack.c.bf16 %v2132_v26, %v2127_v3  ;;  %vm2093_vm15 = vcmp.ge.f32.partialorder %v7310_v54, 0.0  ;;  %v2113_v53 = vmul.f32 0.1, %v7310_v54  ;;  %v8935_v3 = vld [vmem:[#allocation21_spill] sm:$0xff] }
 0x451   : > { %v7324_v15 = vpop.permute.xlu0 %1984  ;;  %v7333_v18 = vadd.f32 %v2057_v62, %v8920_v58  ;;  %v2019_v24 = vsel %vm2010_vm0, %v1991_v19, %v1993_v1 }
 0x452   : > { %v2016_v34 = vsel %vm2010_vm0, %v1983_v38, %v7324_v15  ;;  %2187 = vrot.lane.b32.xlu0 %v7321_v60, %s6419_s26  ;;  %v2133_v22 = vsel %vm2093_vm15, %v7310_v54, %v2113_v53  ;;  %v2058_v33 = vsel %vm6991_vm2, %v2019_v24, 0.0 }
 0x453   : > { %8921 = vst [vmem:[#allocation18_spill] sm:$0xff] %v7333_v18  ;;  %v2054_v44 = vsel %vm6981_vm1, %v2016_v34, 0.0  ;;  %v1977_v7 = vpop.permute.xlu1 %1976  ;;  %v7343_v55 = vpack.c.bf16 %v2133_v22, %v2128_v28  ;;  %v2117_v27 = vmul.f32 0.1, %v7333_v18  ;;  %vm2097_vm10 = vcmp.ge.f32.partialorder %v7333_v18, 0.0 }
 0x454   : > { %v7341_v37 = vadd.f32 %v2054_v44, %v8922_v20  ;;  %v2013_v30 = vsel %vm2010_vm0, %v1975_v42, %v1977_v7  ;;  %v7370_v50 = vadd.f32 %v2058_v33, %v8926_v40 }
 0x455   : > { %v2001_v46 = vpop.permute.xlu0 %2000  ;;  %v2137_v5 = vsel %vm2097_vm10, %v7333_v18, %v2117_v27  ;;  %v2050_v10 = vsel %vm7031_vm7, %v2013_v30, 0.0 }
 0x456   : > { %8923 = vst [vmem:[#allocation22_spill] sm:$0xff] %v7341_v37  ;;  %v2062_v45 = vsel %vm6967_vm9, %v2001_v46, 0.0  ;;  %2189 = vrot.lane.b32.xlu0 %v7343_v55, %s6419_s26  ;;  %vm2094_vm8 = vcmp.ge.f32.partialorder %v7341_v37, 0.0  ;;  %v2114_v23 = vmul.f32 0.1, %v7341_v37  ;;  %8927 = vst [vmem:[#allocation16_spill] sm:$0xff] %v7370_v50  ;;  %v7392_v14 = vadd.f32 %v2050_v10, %v8933_v51 }
 0x457   : > { %v7356_v2 = vadd.f32 %v2062_v45, %v8924_v12  ;;  %v1995_v36 = vpop.permute.xlu1 %1994  ;;  %v2118_v13 = vmul.f32 0.1, %v7370_v50  ;;  %vm2098_vm11 = vcmp.ge.f32.partialorder %v7370_v50, 0.0  ;;  %v8940_v45 = vld [vmem:[#allocation25_spill] sm:$0xff] }
 0x458   : > { %v2020_v9 = vsel %vm2010_vm0, %v1993_v1, %v1995_v36  ;;  %v2134_v61 = vsel %vm2094_vm8, %v7341_v37, %v2114_v23  ;;  %8934 = vst [vmem:[#allocation17_spill] sm:$0xff] %v7392_v14  ;;  %vm2090_vm10 = vcmp.ge.f32.partialorder %v7392_v14, 0.0 }
 0x459   : > { %8925 = vst [vmem:[#allocation19_spill] sm:$0xff] %v7356_v2  ;;  %v2122_v63 = vmul.f32 0.1, %v7356_v2  ;;  %v2059_v8 = vsel %vm6981_vm1, %v2020_v9, 0.0  ;;  %v1999_v31 = vpop.permute.xlu0 %1998  ;;  %v7366_v43 = vpack.c.bf16 %v2134_v61, %v2129_v29  ;;  %vm2102_vm12 = vcmp.ge.f32.partialorder %v7356_v2, 0.0  ;;  %v8942_v9 = vld [vmem:[#allocation29_spill] sm:$0xff] }
 0x45a   : > { %v7373_v56 = vadd.f32 %v2059_v8, %v8928_v49  ;;  %v8944_v49 = vld [vmem:[#allocation24_spill] sm:$0xff] }
 0x45b   : > { %2191 = vrot.lane.b32.xlu1 %v7366_v43, %s6419_s26  ;;  %v2003_v41 = vpop.permute.xlu1 %2002  ;;  %v2142_v48 = vsel %vm2102_vm12, %v7356_v2, %v2122_v63 }
 0x45c   : > { %8929 = vst [vmem:[#allocation20_spill] sm:$0xff] %v7373_v56  ;;  %v2023_v42 = vsel %vm2010_vm0, %v2001_v46, %v2003_v41  ;;  %v7382_v21 = vpack.c.bf16 %v2142_v48, %v2137_v5  ;;  %v2119_v19 = vmul.f32 0.1, %v7373_v56  ;;  %vm2099_vm14 = vcmp.ge.f32.partialorder %v7373_v56, 0.0 }
 0x45d   : > { %v2063_v4 = vsel %vm6991_vm2, %v2023_v42, 0.0  ;;  %v2005_v35 = vpop.permute.xlu0 %2004  ;;  %v2138_v46 = vsel %vm2098_vm11, %v7370_v50, %v2118_v13 }
 0x45e   : > { %v7387_v38 = vadd.f32 %v2063_v4, %v8931_v57  ;;  %v2024_v59 = vsel %vm2010_vm0, %v2003_v41, %v2005_v35 }
 0x45f   : > { %v2064_v1 = vsel %vm6981_vm1, %v2024_v59, 0.0  ;;  %2197 = vrot.lane.b32.xlu1 %v7382_v21, %s6419_s26  ;;  %v1997_v39 = vpop.permute.xlu1 %1996 }
 0x460   : > { %8932 = vst [vmem:[#allocation32_spill] sm:$0xff] %v7387_v38  ;;  %v7401_v26 = vadd.f32 %v2064_v1, %v8935_v3  ;;  %v2021_v62 = vsel %vm2010_vm0, %v1995_v36, %v1997_v39  ;;  %v2022_v53 = vsel %vm2010_vm0, %v1997_v39, %v1999_v31  ;;  %vm2103_vm13 = vcmp.ge.f32.partialorder %v7387_v38, 0.0 }
 0x461   : > { %v2060_v34 = vsel %vm7031_vm7, %v2021_v62, 0.0  ;;  %v2061_v58 = vsel %vm7024_vm3, %v2022_v53, 0.0  ;;  %v1979_v44 = vpop.permute.xlu0 %1978  ;;  %v2123_v22 = vmul.f32 0.1, %v7387_v38  ;;  %v2110_v3 = vmul.f32 0.1, %v7392_v14 }
 0x462   : > { %8936 = vst [vmem:[#allocation27_spill] sm:$0xff] %v7401_v26  ;;  %v7413_v24 = vadd.f32 %v2060_v34, %v8938_v52  ;;  %v2014_v20 = vsel %vm2010_vm0, %v1977_v7, %v1979_v44  ;;  %vm2104_vm15 = vcmp.ge.f32.partialorder %v7401_v26, 0.0  ;;  %v7419_v23 = vadd.f32 %v2061_v58, %v8940_v45  ;;  %v8948_v53 = vld [vmem:[#allocation28_spill] sm:$0xff] }
 0x463   : > { %v2051_v33 = vsel %vm7024_vm3, %v2014_v20, 0.0  ;;  %v2007_v27 = vpop.permute.xlu1 %2006  ;;  %v2143_v12 = vsel %vm2103_vm13, %v7387_v38, %v2123_v22  ;;  %v2124_v36 = vmul.f32 0.1, %v7401_v26  ;;  %v2139_v7 = vsel %vm2099_vm14, %v7373_v56, %v2119_v19  ;;  %v8950_v20 = vld [vmem:[#allocation30_spill] sm:$0xff] }
 0x464   : > { %8939 = vst [vmem:[#allocation21_spill] sm:$0xff] %v7413_v24  ;;  %8941 = vst [vmem:[#allocation31_spill] sm:$0xff] %v7419_v23  ;;  %v2025_v29 = vsel %vm2010_vm0, %v2005_v35, %v2007_v27  ;;  %v7426_v30 = vpack.c.bf16 %v2143_v12, %v2138_v46  ;;  %v7430_v61 = vadd.f32 %v2051_v33, %v8942_v9  ;;  %v2120_v40 = vmul.f32 0.1, %v7413_v24  ;;  %v8946_v35 = vld [vmem:[#allocation26_spill] sm:$0xff] }
 0x465   : > { %v2065_v63 = vsel %vm7031_vm7, %v2025_v29, 0.0  ;;  %v2009_v8 = vpop.permute.xlu0 %2008  ;;  %v2144_v31 = vsel %vm2104_vm15, %v7401_v26, %v2124_v36  ;;  %vm2100_vm4 = vcmp.ge.f32.partialorder %v7413_v24, 0.0  ;;  %vm2101_vm8 = vcmp.ge.f32.partialorder %v7419_v23, 0.0 }
 0x466   : > { %8943 = vst [vmem:[#allocation23_spill] sm:$0xff] %v7430_v61  ;;  %v7437_v41 = vadd.f32 %v2065_v63, %v8944_v49  ;;  %v2026_v5 = vsel %vm2010_vm0, %v2007_v27, %v2009_v8  ;;  %2199 = vrot.lane.b32.xlu1 %v7426_v30, %s6419_s26  ;;  %v2154_v48 = vpack.c.bf16 %v2144_v31, %v2139_v7  ;;  %v2121_v4 = vmul.f32 0.1, %v7419_v23  ;;  %v5783_v31 = vld [vmem:[%s8798_s2 + $0x50] sm:$0xff] }
 0x467   : > { %v2066_v10 = vsel %vm7024_vm3, %v2026_v5, 0.0  ;;  %v1987_v42 = vpop.permute.xlu1 %1986  ;;  %v2111_v51 = vmul.f32 0.1, %v7430_v61  ;;  %v2140_v19 = vsel %vm2100_vm4, %v7413_v24, %v2120_v40  ;;  %v2130_v36 = vsel %vm2090_vm10, %v7392_v14, %v2110_v3 }
 0x468   : > { %8945 = vst [vmem:[#allocation25_spill] sm:$0xff] %v7437_v41  ;;  %v7449_v57 = vadd.f32 %v2066_v10, %v8946_v35  ;;  %2201 = vrot.lane.b32.xlu0 %v2154_v48, %s6419_s26  ;;  %v2017_v59 = vsel %vm2010_vm0, %v7324_v15, %v1987_v42  ;;  %vm2105_vm12 = vcmp.ge.f32.partialorder %v7437_v41, 0.0  ;;  %v2125_v13 = vmul.f32 0.1, %v7437_v41 }
 0x469   : > { %v2055_v1 = vsel %vm7031_vm7, %v2017_v59, 0.0  ;;  %v1989_v39 = vpop.permute.xlu0 %1988  ;;  %v2141_v52 = vsel %vm2101_vm8, %v7419_v23, %v2121_v4  ;;  %vm2207_vm15 = vcmask 1006592   ;;  %vm2631_vm4 = vcmask 982016  }
 0x46a   : > { %8947 = vst [vmem:[#allocation29_spill] sm:$0xff] %v7449_v57  ;;  %v2126_v62 = vmul.f32 0.1, %v7449_v57  ;;  %v7463_v34 = vadd.f32 %v2055_v1, %v8948_v53  ;;  %v2018_v15 = vsel %vm2010_vm0, %v1987_v42, %v1989_v39  ;;  %v2145_v58 = vsel %vm2105_vm12, %v7437_v41, %v2125_v13  ;;  %v6203_v13 = vld [vmem:[#allocation5 + $0x70] sm:$0xff]  }
 0x46b   : > { %v2056_v44 = vsel %vm7024_vm3, %v2018_v15, 0.0  ;;  %v2155_v22 = vpack.c.bf16 %v2145_v58, %v2140_v19  ;;  %vm2106_vm11 = vcmp.ge.f32.partialorder %v7449_v57, 0.0  ;;  %vm2091_vm0 = vcmp.ge.f32.partialorder %v7430_v61, 0.0 }
 0x46c   : > { %8949 = vst [vmem:[#allocation24_spill] sm:$0xff] %v7463_v34  ;;  %v7474_v46 = vadd.f32 %v2056_v44, %v8950_v20  ;;  %v2146_v45 = vsel %vm2106_vm11, %v7449_v57, %v2126_v62  ;;  %vm2095_vm13 = vcmp.ge.f32.partialorder %v7463_v34, 0.0  ;;  %v2115_v33 = vmul.f32 0.1, %v7463_v34  ;;  %v6204_v44 = vld [vmem:[#allocation5 + $0x78] sm:$0xff]  }
 0x46d   : > { %2203 = vrot.lane.b32.xlu1 %v2155_v22, %s6419_s26  ;;  %v2156_v27 = vpack.c.bf16 %v2146_v45, %v2141_v52  ;;  %v2131_v9 = vsel %vm2091_vm0, %v7430_v61, %v2111_v51  ;;  %v8952_v62 = vmov 0  }
 0x46e   : > { %8951 = vst [vmem:[#allocation26_spill] sm:$0xff] %v7474_v46  ;;  %v2116_v12 = vmul.f32 0.1, %v7474_v46  ;;  %v2135_v29 = vsel %vm2095_vm13, %v7463_v34, %v2115_v33  ;;  %vm2096_vm14 = vcmp.ge.f32.partialorder %v7474_v46, 0.0 }
 0x46f   : > { %2205 = vrot.lane.b32.xlu0 %v2156_v27, %s6419_s26  ;;  %v2150_v7 = vpack.c.bf16 %v2135_v29, %v2130_v36 }
 0x470   : > { %v2136_v63 = vsel %vm2096_vm14, %v7474_v46, %v2116_v12 }
 0x471   : > { %2193 = vrot.lane.b32.xlu1 %v2150_v7, %s6419_s26  ;;  %v2151_v8 = vpack.c.bf16 %v2136_v63, %v2131_v9 }
 0x473   : > { %2195 = vrot.lane.b32.xlu0 %v2151_v8, %s6419_s26 }
 0x475   : > { %2409 = vrot.lane.b32.xlu1 %v7426_v30, %s6415_s27 }
 0x477   : > { %2411 = vrot.lane.b32.xlu0 %v2154_v48, %s6415_s27 }
 0x479   : > { %2407 = vrot.lane.b32.xlu1 %v7382_v21, %s6415_s27 }
 0x47b   : > { %2413 = vrot.lane.b32.xlu0 %v2155_v22, %s6415_s27 }
 0x47d   : > { %2415 = vrot.lane.b32.xlu1 %v2156_v27, %s6415_s27 }
 0x47f   : > { %2399 = vrot.lane.b32.xlu0 %v7343_v55, %s6415_s27 }
 0x481   : > { %2401 = vrot.lane.b32.xlu1 %v7366_v43, %s6415_s27 }
 0x483   : > { %2397 = vrot.lane.b32.xlu0 %v7321_v60, %s6415_s27 }
 0x485   : > { %2403 = vrot.lane.b32.xlu1 %v2150_v7, %s6415_s27 }
 0x487   : > { %2405 = vrot.lane.b32.xlu0 %v2151_v8, %s6415_s27  ;;  %s6425_s27 = smov 117  }
 0x489   : > { %2623 = vrot.lane.b32.xlu1 %v7426_v30, %s6420_s20  ;;  %v5784_v30 = vld [vmem:[%s8798_s2 + $0x58] sm:$0xff] }
 0x48b   : > { %2625 = vrot.lane.b32.xlu0 %v2154_v48, %s6420_s20 }
 0x48d   : > { %2621 = vrot.lane.b32.xlu1 %v7382_v21, %s6420_s20 }
 0x48f   : > { %2613 = vrot.lane.b32.xlu0 %v7343_v55, %s6420_s20  ;;  %v5781_v55 = vld [vmem:[%s8798_s2 + $0x40] sm:$0xff] }
 0x491   : > { %2615 = vrot.lane.b32.xlu1 %v7366_v43, %s6420_s20 }
 0x493   : > { %2611 = vrot.lane.b32.xlu0 %v7321_v60, %s6420_s20  ;;  %v5782_v60 = vld [vmem:[%s8798_s2 + $0x48] sm:$0xff] }
 0x495   : > { %2627 = vrot.lane.b32.xlu1 %v2155_v22, %s6420_s20 }
 0x497   : > { %2629 = vrot.lane.b32.xlu0 %v2156_v27, %s6420_s20 }
 0x499   : > { %2617 = vrot.lane.b32.xlu1 %v2150_v7, %s6420_s20 }
 0x49b   : > { %2619 = vrot.lane.b32.xlu0 %v2151_v8, %s6420_s20  ;;  %s6430_s20 = smov [#allocation7]  }
 0x49c   : > { %s6285_s11 = sshll.u32 %s6430_s20, 4  ;;  %s6286_s11 = int_to_ptr.vmem [resolvable:$false] %s6285_s11 }
 0x49d   : > { %2848 = vperm.xlu1 %6190, %v5783_v31  }
 0x49f   : > { %2853 = vperm.xlu0 %6189, %v5784_v30   ;;  %v6205_v30 = vld [vmem:[#allocation5 + $0x60] sm:$0xff]  }
 0x4a1   : > { %2838 = vperm.xlu1 %6190, %v5781_v55  }
 0x4a3   : > { %2843 = vperm.xlu0 %6189, %v5782_v60  }
 0x4c4   : > { %v2188_v21 = vpop.permute.xlu0 %2187 }
 0x4c8   : > { %v2190_v49 = vpop.permute.xlu0 %2189 }
 0x4c9   : > { %v2208_v59 = vsel %vm2207_vm15, %v2188_v21, %v2190_v49 }
 0x4cd   : > { %v2192_v43 = vpop.permute.xlu1 %2191 }
 0x4ce   : > { %v2209_v4 = vsel %vm2207_vm15, %v2190_v49, %v2192_v43 }
 0x4d1   : > { %v2198_v40 = vpop.permute.xlu1 %2197 }
 0x4d8   : > { %v2200_v5 = vpop.permute.xlu1 %2199 }
 0x4d9   : > { %v2212_v42 = vsel %vm2207_vm15, %v2198_v40, %v2200_v5 }
 0x4da   : > { %v2202_v48 = vpop.permute.xlu0 %2201 }
 0x4db   : > { %v2213_v10 = vsel %vm2207_vm15, %v2200_v5, %v2202_v48 }
 0x4dc   : > { %2244 = vmatprep.subr.bf16.mxu0 %v2213_v10 }
 0x4dd   : > { %2245 = vmatpush1.bf16.msra.mxu0 %v2212_v42 }
 0x4de   : > { %2246 = vmatprep.subr.bf16.mxu0 %v2209_v4 }
 0x4df   : > { %v2204_v35 = vpop.permute.xlu1 %2203 }
 0x4e0   : > { %v2214_v19 = vsel %vm2207_vm15, %v2202_v48, %v2204_v35  ;;  %v6206_v48 = vld [vmem:[#allocation5 + $0x68] sm:$0xff]  }
 0x4e1   : > { %2247 = vmatpush1.bf16.msra.mxu0 %v2208_v59  ;;  %v2206_v51 = vpop.permute.xlu0 %2205 }
 0x4e2   : > { %5977 = vmatprep.subr.bf16.mxu0 %v2206_v51  ;;  %v2215_v1 = vsel %vm2207_vm15, %v2204_v35, %v2206_v51 }
 0x4e3   : > { %2297 = vmatprep.subr.bf16.mxu1 %v2215_v1  ;;  %v2194_v39 = vpop.permute.xlu1 %2193 }
 0x4e4   : > { %5759 = vmatmul.mubr.msk.bf16.vlgmr.msra.gmra.mxu0 %vm423_vm5, %v6203_v13  ;;  %2298 = vmatpush1.bf16.msra.mxu1 %v2214_v19  ;;  %v2210_v58 = vsel %vm2207_vm15, %v2192_v43, %v2194_v39 }
 0x4e5   : > { %5978 = vmatpush3.bf16.msra.mxu0 %v2206_v51  ;;  %v2196_v3 = vpop.permute.xlu0 %2195  ;;  %2274 = vmatprep.mubr.bf16.mxu0 %v8952_v62 }
 0x4e6   : > { %5979 = vmatprep.subr.bf16.mxu0 %v2196_v3  ;;  %v2211_v53 = vsel %vm2207_vm15, %v2194_v39, %v2196_v3 }
 0x4e7   : > { %2299 = vmatprep.subr.bf16.mxu1 %v2211_v53  ;;  %v2410_v15 = vpop.permute.xlu1 %2409 }
 0x4e8   : > { %2300 = vmatpush1.bf16.msra.mxu1 %v2210_v58 }
 0x4e9   : > { %5980 = vmatpush3.bf16.msra.mxu0 %v2196_v3  ;;  %v2412_v22 = vpop.permute.xlu0 %2411  ;;  %v6207_v3 = vld [vmem:[#allocation5 + $0x80] sm:$0xff]  }
 0x4ea   : > { %v2422_v52 = vsel %vm791_vm6, %v2410_v15, %v2412_v22 }
 0x4eb   : > { %5761 = vmatmul.mubr.msk.bf16.vlgmr.msra.gmra.mxu1 %vm423_vm5, %v6203_v13  ;;  %2453 = vmatprep.subr.bf16.mxu1 %v2422_v52  ;;  %v2408_v20 = vpop.permute.xlu1 %2407 }
 0x4ec   : > { %5760 = vmatmul.mubr.msk.bf16.gmra.mxu0 %vm423_vm5, %v6204_v44  ;;  %v2421_v45 = vsel %vm791_vm6, %v2408_v20, %v2410_v15  ;;  %2327 = vmatprep.mubr.bf16.mxu1 %v8952_v62 }
 0x4ed   : > { %v2414_v33 = vpop.permute.xlu0 %2413  ;;  %2454 = vmatpush1.bf16.msra.mxu1 %v2421_v45  ;;  %5981 = vmatprep.mubr.msk.bf16.mxu0 %vm423_vm5, %v6203_v13 }
 0x4ee   : > { %v2423_v7 = vsel %vm791_vm6, %v2412_v22, %v2414_v33  ;;  %v6208_v22 = vld [vmem:[#allocation5 + $0x88] sm:$0xff]  }
 0x4ef   : > { %v2416_v27 = vpop.permute.xlu1 %2415 }
 0x4f0   : > { %v2424_v12 = vsel %vm791_vm6, %v2414_v33, %v2416_v27 }
 0x4f1   : > { %v2400_v36 = vpop.permute.xlu0 %2399  ;;  %2506 = vmatprep.subr.bf16.mxu0 %v2424_v12 }
 0x4f3   : > { %5762 = vmatmul.mubr.msk.bf16.gmra.mxu1 %vm423_vm5, %v6204_v44  ;;  %v2402_v29 = vpop.permute.xlu1 %2401 }
 0x4f4   : > { %5982 = vmatmul.mubr.msk.bf16.vlgmr.msra.gmra.mxu0 %vm423_vm5, %v6204_v44  ;;  %v2418_v9 = vsel %vm791_vm6, %v2400_v36, %v2402_v29  ;;  %2473 = vmatprep.mubr.bf16.mxu1 %v8952_v62 }
 0x4f5   : > { %2507 = vmatpush1.bf16.msra.mxu0 %v2423_v7  ;;  %v2398_v63 = vpop.permute.xlu0 %2397  ;;  %2455 = vmatprep.subr.bf16.mxu1 %v2418_v9 }
 0x4f6   : > { %v2417_v8 = vsel %vm791_vm6, %v2398_v63, %v2400_v36  ;;  %2526 = vmatprep.mubr.bf16.mxu0 %v8952_v62 }
 0x4f7   : > { %2456 = vmatpush1.bf16.msra.mxu1 %v2417_v8  ;;  %v2404_v31 = vpop.permute.xlu1 %2403 }
 0x4f8   : > { %5985 = vmatprep.subr.bf16.mxu1 %v2416_v27  ;;  %v2419_v21 = vsel %vm791_vm6, %v2402_v29, %v2404_v31 }
 0x4f9   : > { %v2406_v55 = vpop.permute.xlu0 %2405 }
 0x4fa   : > { %v2420_v60 = vsel %vm791_vm6, %v2404_v31, %v2406_v55  ;;  %vm2936_vm6 = vcmask 39936  }
 0x4fb   : > { %5767 = vmatmul.mubr.msk.bf16.vlgmr.msra.gmra.mxu1 %vm423_vm5, %v6205_v30  ;;  %2508 = vmatprep.subr.bf16.mxu0 %v2420_v60  ;;  %v2624_v43 = vpop.permute.xlu1 %2623 }
 0x4fc   : > { %5986 = vmatpush3.bf16.msra.mxu1 %v2416_v27  ;;  %2509 = vmatpush1.bf16.msra.mxu0 %v2419_v21 }
 0x4fd   : > { %5987 = vmatprep.subr.bf16.mxu1 %v2406_v55  ;;  %v2626_v40 = vpop.permute.xlu0 %2625  ;;  %2483 = vmatprep.mubr.bf16.mxu1 %v8952_v62 }
 0x4fe   : > { %v2637_v49 = vsel %vm2631_vm4, %v2624_v43, %v2626_v40 }
 0x4ff   : > { %5769 = vmatmul.mubr.msk.bf16.vlgmr.msra.gmra.mxu0 %vm423_vm5, %v6205_v30  ;;  %2668 = vmatprep.subr.bf16.mxu0 %v2637_v49  ;;  %v2622_v5 = vpop.permute.xlu1 %2621 }
 0x500   : > { %5988 = vmatpush3.bf16.msra.mxu1 %v2406_v55  ;;  %v2636_v10 = vsel %vm2631_vm4, %v2622_v5, %v2624_v43  ;;  %2536 = vmatprep.mubr.bf16.mxu0 %v8952_v62 }
 0x501   : > { %v2614_v42 = vpop.permute.xlu0 %2613  ;;  %2669 = vmatpush1.bf16.msra.mxu0 %v2636_v10 }
 0x503   : > { %5768 = vmatmul.mubr.msk.bf16.gmra.mxu1 %vm423_vm5, %v6206_v48  ;;  %v2616_v4 = vpop.permute.xlu1 %2615 }
 0x504   : > { %v2633_v35 = vsel %vm2631_vm4, %v2614_v42, %v2616_v4  ;;  %5989 = vmatprep.mubr.msk.bf16.mxu1 %vm423_vm5, %v6205_v30 }
 0x505   : > { %v2612_v59 = vpop.permute.xlu0 %2611  ;;  %2670 = vmatprep.subr.bf16.mxu0 %v2633_v35 }
 0x506   : > { %v2632_v13 = vsel %vm2631_vm4, %v2612_v59, %v2614_v42 }
 0x507   : > { %5770 = vmatmul.mubr.msk.bf16.gmra.mxu0 %vm423_vm5, %v6206_v48  ;;  %v2628_v51 = vpop.permute.xlu1 %2627 }
 0x508   : > { %2671 = vmatpush1.bf16.msra.mxu0 %v2632_v13  ;;  %2688 = vmatprep.mubr.bf16.mxu0 %v8952_v62  ;;  %v2638_v19 = vsel %vm2631_vm4, %v2626_v40, %v2628_v51 }
 0x509   : > { %v2630_v1 = vpop.permute.xlu0 %2629 }
 0x50a   : > { %5993 = vmatprep.subr.bf16.mxu0 %v2630_v1  ;;  %v2639_v39 = vsel %vm2631_vm4, %v2628_v51, %v2630_v1 }
 0x50b   : > { %5990 = vmatmul.mubr.msk.bf16.vlgmr.msra.gmra.mxu1 %vm423_vm5, %v6206_v48  ;;  %2721 = vmatprep.subr.bf16.mxu1 %v2639_v39  ;;  %v2618_v53 = vpop.permute.xlu1 %2617 }
 0x50c   : > { %2722 = vmatpush1.bf16.msra.mxu1 %v2638_v19  ;;  %2741 = vmatprep.mubr.bf16.mxu1 %v8952_v62  ;;  %v2634_v44 = vsel %vm2631_vm4, %v2616_v4, %v2618_v53 }
 0x50d   : > { %v2620_v15 = vpop.permute.xlu0 %2619 }
 0x50e   : > { %v2635_v58 = vsel %vm2631_vm4, %v2618_v53, %v2620_v15 }
 0x50f   : > { %5775 = vmatmul.mubr.msk.bf16.vlgmr.msra.gmra.mxu0 %vm423_vm5, %v6207_v3  ;;  %2723 = vmatprep.subr.bf16.mxu1 %v2635_v58 }
 0x510   : > { %5994 = vmatpush3.bf16.msra.mxu0 %v2630_v1  ;;  %2724 = vmatpush1.bf16.msra.mxu1 %v2634_v44 }
 0x511   : > { %5995 = vmatprep.subr.bf16.mxu0 %v2620_v15  ;;  %2698 = vmatprep.mubr.bf16.mxu0 %v8952_v62 }
 0x513   : > { %5777 = vmatmul.mubr.msk.bf16.vlgmr.msra.gmra.mxu1 %vm423_vm5, %v6207_v3 }
 0x514   : > { %5996 = vmatpush3.bf16.msra.mxu0 %v2620_v15  ;;  %2751 = vmatprep.mubr.bf16.mxu1 %v8952_v62 }
 0x517   : > { %5776 = vmatmul.mubr.msk.bf16.gmra.mxu0 %vm423_vm5, %v6208_v22 }
 0x518   : > { %5997 = vmatprep.mubr.msk.bf16.mxu0 %vm423_vm5, %v6207_v3  ;;  %v7612_v15 = vpop.permute.xlu1 %2848 }
 0x51a   : > { %v7622_v61 = vpop.permute.xlu0 %2853 }
 0x51b   : > { %5778 = vmatmul.mubr.msk.bf16.gmra.mxu1 %vm423_vm5, %v6208_v22 }
 0x51c   : > { %3170 = vmatprep.mubr.bf16.mxu1 %v8952_v62  ;;  %v7624_v23 = vpop.permute.xlu1 %2838 }
 0x51f   : > { %5998 = vmatmul.mubr.msk.bf16.vlgmr.msra.gmra.mxu0 %vm423_vm5, %v6208_v22 }
 0x520   : > { %3223 = vmatprep.mubr.bf16.mxu0 %v8952_v62 }
 0x5a4   : > { %v2266_v52 = vpop.f32.mrf.mxu0 }
 0x5a6   : > { %v2268_v20 = vpop.f32.mrf.mxu0 }
 0x5a8   : > { %v2270_v45 = vpop.f32.mrf.mxu0 }
 0x5aa   : > { %v7578_v33 = vpop.f32.mrf.mxu0 }
 0x5ab   : > { %v2319_v27 = vpop.f32.mrf.mxu1 }
 0x5ac   : > { %v7580_v12 = vpop.f32.mrf.mxu0 }
 0x5ad   : > { %v2321_v36 = vpop.f32.mrf.mxu1 }
 0x5ae   : > { %v7582_v29 = vpop.f32.mrf.mxu0 }
 0x5af   : > { %v2323_v7 = vpop.f32.mrf.mxu1 }
 0x5b0   : > { %v7584_v9 = vpop.f32.mrf.mxu0 }
 0x5b1   : > { %v7586_v63 = vpop.f32.mrf.mxu1 }
 0x5b2   : > { %v7588_v8 = vpop.f32.mrf.mxu0 }
 0x5b3   : > { %v7590_v31 = vpop.f32.mrf.mxu1 }
 0x5b4   : > { %v7592_v30 = vpop.f32.mrf.mxu0 }
 0x5b5   : > { %v7594_v55 = vpop.f32.mrf.mxu1 }
 0x5b6   : > { %v7596_v60 = vpop.f32.mrf.mxu0 }
 0x5b7   : > { %v7598_v43 = vpop.f32.mrf.mxu1 }
 0x5b8   : > { %v7600_v21 = vpop.f32.mrf.mxu0 }
 0x5b9   : > { %v7602_v40 = vpop.f32.mrf.mxu1 }
 0x5ba   : > { %v7604_v5 = vpop.f32.mrf.mxu0 }
 0x5bb   : > { %v2475_v49 = vpop.f32.mrf.mxu1 }
 0x5bc   : > { %v2476_v34 = vadd.f32 %v2475_v49, %v2266_v52 }
 0x5bd   : > { %v2477_v48 = vpop.f32.mrf.mxu1 }
 0x5be   : > { %v2478_v24 = vadd.f32 %v2477_v48, %v2268_v20 }
 0x5bf   : > { %v2479_v10 = vpop.f32.mrf.mxu1  ;;  %v2528_v42 = vpop.f32.mrf.mxu0 }
 0x5c0   : > { %v2480_v56 = vadd.f32 %v2479_v10, %v2270_v45  ;;  %v2529_v50 = vadd.f32 %v2528_v42, %v2319_v27 }
 0x5c1   : > { %v2481_v4 = vpop.f32.mrf.mxu1  ;;  %v2530_v35 = vpop.f32.mrf.mxu0 }
 0x5c2   : > { %v2531_v52 = vadd.f32 %v2530_v35, %v2321_v36 }
 0x5c3   : > { %v2485_v59 = vpop.f32.mrf.mxu1  ;;  %v2532_v13 = vpop.f32.mrf.mxu0 }
 0x5c4   : > { %v2533_v48 = vadd.f32 %v2532_v13, %v2323_v7  ;;  %v2486_v7 = vadd.f32 %v2485_v59, %v7580_v12 }
 0x5c5   : > { %v2487_v51 = vpop.f32.mrf.mxu1  ;;  %v7606_v1 = vpop.f32.mrf.mxu0 }
 0x5c7   : > { %v2489_v39 = vpop.f32.mrf.mxu1  ;;  %v2538_v19 = vpop.f32.mrf.mxu0 }
 0x5c8   : > { %v2539_v13 = vadd.f32 %v2538_v19, %v7590_v31 }
 0x5c9   : > { %v7608_v3 = vpop.f32.mrf.mxu1  ;;  %v7610_v53 = vpop.f32.mrf.mxu0 }
 0x5cb   : > { %v2542_v58 = vpop.f32.mrf.mxu0  ;;  %v7614_v44 = vpop.f32.mrf.mxu1 }
 0x5cd   : > { %v7616_v22 = vpop.f32.mrf.mxu0  ;;  %v7618_v46 = vpop.f32.mrf.mxu1 }
 0x5cf   : > { %v7620_v57 = vpop.f32.mrf.mxu1  ;;  %v2690_v41 = vpop.f32.mrf.mxu0 }
 0x5d0   : > { %v2811_v26 = vadd.f32 %v2690_v41, %v2476_v34  ;;  %v7631_v34 = vpop.permute.xlu0 %2843 }
 0x5d1   : > { %v7626_v14 = vpop.f32.mrf.mxu1  ;;  %v2692_v38 = vpop.f32.mrf.mxu0 }
 0x5d2   : > { %v2856_v2 = vadd.f32 %v7624_v23, %v2811_v26  ;;  %v2812_v37 = vadd.f32 %v2692_v38, %v2478_v24  ;;  %v2482_v24 = vadd.f32 %v2481_v4, %v7578_v33  ;;  %v2490_v4 = vadd.f32 %v2489_v39, %v7584_v9 }
 0x5d3   : > { %v2694_v18 = vpop.f32.mrf.mxu0  ;;  %v2743_v6 = vpop.f32.mrf.mxu1  ;;  %v2541_v9 = vadd.f32 %v7610_v53, %v7594_v55 }
 0x5d4   : > { %v2857_v49 = vadd.f32 %v7624_v23, %v2812_v37  ;;  %v2816_v54 = vadd.f32 %v2694_v18, %v2480_v56  ;;  %v2813_v47 = vadd.f32 %v2743_v6, %v2529_v50  ;;  %2896 = vrot.lane.b32.xlu1 %v2856_v2, %s6421_s3  ;;  %v2488_v50 = vadd.f32 %v2487_v51, %v7582_v29 }
 0x5d5   : > { %v2696_v20 = vpop.f32.mrf.mxu0  ;;  %v2745_v41 = vpop.f32.mrf.mxu1 }
 0x5d6   : > { %v2858_v45 = vadd.f32 %v7624_v23, %v2813_v47  ;;  %v2814_v27 = vadd.f32 %v2745_v41, %v2531_v52  ;;  %2898 = vrot.lane.b32.xlu0 %v2857_v49, %s6421_s3  ;;  %v2861_v18 = vadd.f32 %v7631_v34, %v2816_v54  ;;  %v2817_v56 = vadd.f32 %v2696_v20, %v2482_v24 }
 0x5d7   : > { %v2700_v38 = vpop.f32.mrf.mxu0  ;;  %v2747_v26 = vpop.f32.mrf.mxu1  ;;  %v2543_v49 = vadd.f32 %v2542_v58, %v7598_v43  ;;  %v2492_v58 = vadd.f32 %v7608_v3, %v7588_v8  ;;  %v2545_v24 = vadd.f32 %v7616_v22, %v7602_v40  ;;  %v2585_v22 = vadd.f32 %v7626_v14, %v7604_v5 }
 0x5d8   : > { %v2818_v6 = vadd.f32 %v2747_v26, %v2533_v48  ;;  %2900 = vrot.lane.b32.xlu1 %v2858_v45, %s6421_s3  ;;  %v2859_v36 = vadd.f32 %v7624_v23, %v2814_v27  ;;  %v2862_v35 = vadd.f32 %v7631_v34, %v2817_v56  ;;  %v2821_v29 = vadd.f32 %v2700_v38, %v2486_v7 }
 0x5d9   : > { %v2702_v37 = vpop.f32.mrf.mxu0  ;;  %v2749_v2 = vpop.f32.mrf.mxu1  ;;  %v2590_v48 = vadd.f32 %v7614_v44, %v7592_v30  ;;  %v2582_v38 = vadd.f32 %v7618_v46, %v7596_v60 }
 0x5da   : > { %2906 = vrot.lane.b32.xlu0 %v2861_v18, %s6421_s3  ;;  %v2863_v10 = vadd.f32 %v7631_v34, %v2818_v6  ;;  %v2822_v33 = vadd.f32 %v2702_v37, %v2488_v50  ;;  %v2866_v20 = vadd.f32 %v7612_v15, %v2821_v29  ;;  %v2593_v6 = vadd.f32 %v7620_v57, %v7600_v21 }
 0x5db   : > { %v2753_v47 = vpop.f32.mrf.mxu1  ;;  %v2704_v54 = vpop.f32.mrf.mxu0  ;;  %v2535_v37 = vadd.f32 %v7606_v1, %v7586_v63 }
 0x5dc   : > { %2902 = vrot.lane.b32.xlu1 %v2859_v36, %s6421_s3  ;;  %v2867_v51 = vadd.f32 %v7612_v15, %v2822_v33  ;;  %v2826_v52 = vadd.f32 %v2704_v54, %v2490_v4  ;;  %v2823_v41 = vadd.f32 %v2753_v47, %v2539_v13 }
 0x5dd   : > { %v2755_v42 = vpop.f32.mrf.mxu1  ;;  %v2706_v12 = vpop.f32.mrf.mxu0  ;;  %v2819_v56 = vadd.f32 %v2749_v2, %v2535_v37 }
 0x5de   : > { %2910 = vrot.lane.b32.xlu0 %v2863_v10, %s6421_s3  ;;  %v2871_v39 = vadd.f32 %v7622_v61, %v2826_v52  ;;  %v2868_v45 = vadd.f32 %v7612_v15, %v2823_v41  ;;  %v2824_v43 = vadd.f32 %v2755_v42, %v2541_v9  ;;  %v2827_v26 = vadd.f32 %v2706_v12, %v2492_v58 }
 0x5df   : > { %v2757_v59 = vpop.f32.mrf.mxu1  ;;  %v5999_v19 = vpop.f32.mrf.mxu0  ;;  %v2864_v63 = vadd.f32 %v7631_v34, %v2819_v56 }
 0x5e0   : > { %2908 = vrot.lane.b32.xlu1 %v2862_v35, %s6421_s3  ;;  %v2828_v31 = vadd.f32 %v2757_v59, %v2543_v49  ;;  %v2825_v55 = vadd.f32 %v5999_v19, %v2590_v48  ;;  %v2869_v30 = vadd.f32 %v7612_v15, %v2824_v43  ;;  %v2872_v46 = vadd.f32 %v7622_v61, %v2827_v26 }
 0x5e1   : > { %v2796_v53 = vpop.f32.mrf.mxu0  ;;  %v2759_v44 = vpop.f32.mrf.mxu1 }
 0x5e2   : > { %2918 = vrot.lane.b32.xlu0 %v2867_v51, %s6421_s3  ;;  %v2873_v27 = vadd.f32 %v7622_v61, %v2828_v31  ;;  %v2870_v8 = vadd.f32 %v7612_v15, %v2825_v55  ;;  %v2815_v3 = vadd.f32 %v2796_v53, %v2582_v38  ;;  %v2829_v60 = vadd.f32 %v2759_v44, %v2545_v24 }
 0x5e3   : > { %v6000_v18 = vpop.f32.mrf.mxu0 }
 0x5e4   : > { %2916 = vrot.lane.b32.xlu1 %v2866_v20, %s6421_s3  ;;  %v2860_v50 = vadd.f32 %v7624_v23, %v2815_v3  ;;  %v2830_v40 = vadd.f32 %v6000_v18, %v2593_v6  ;;  %v2874_v57 = vadd.f32 %v7622_v61, %v2829_v60 }
 0x5e5   : > { %v2799_v15 = vpop.f32.mrf.mxu0 }
 0x5e6   : > { %2926 = vrot.lane.b32.xlu0 %v2871_v39, %s6421_s3  ;;  %v2875_v21 = vadd.f32 %v7622_v61, %v2830_v40  ;;  %v2820_v36 = vadd.f32 %v2799_v15, %v2585_v22 }
 0x5e8   : > { %2920 = vrot.lane.b32.xlu1 %v2868_v45, %s6421_s3  ;;  %v2865_v23 = vadd.f32 %v7631_v34, %v2820_v36 }
 0x5ea   : > { %2930 = vrot.lane.b32.xlu0 %v2873_v27, %s6421_s3 }
 0x5ec   : > { %2922 = vrot.lane.b32.xlu1 %v2869_v30, %s6421_s3 }
 0x5ee   : > { %2924 = vrot.lane.b32.xlu0 %v2870_v8, %s6421_s3 }
 0x5f0   : > { %2928 = vrot.lane.b32.xlu1 %v2872_v46, %s6421_s3 }
 0x5f2   : > { %2904 = vrot.lane.b32.xlu0 %v2860_v50, %s6421_s3 }
 0x5f4   : > { %2932 = vrot.lane.b32.xlu1 %v2874_v57, %s6421_s3 }
 0x5f6   : > { %2934 = vrot.lane.b32.xlu0 %v2875_v21, %s6421_s3 }
 0x5f8   : > { %2912 = vrot.lane.b32.xlu1 %v2864_v63, %s6421_s3 }
 0x5fa   : > { %2914 = vrot.lane.b32.xlu0 %v2865_v23, %s6421_s3  ;;  %s5864_s3 = sshll.u32 %s6389_s18, 2 }
 0x646   : > { %v2897_v14 = vpop.permute.xlu1 %2896 }
 0x647   : > { %v2973_v1 = vsel %vm6967_vm9, %v2897_v14, 0.0 }
 0x648   : > { %v2899_v5 = vpop.permute.xlu0 %2898  ;;  %v3013_v2 = vmul.f32 0.1, %v2973_v1  ;;  %vm2993_vm8 = vcmp.ge.f32.partialorder %v2973_v1, 0.0 }
 0x649   : > { %v2937_v7 = vsel %vm2936_vm6, %v2897_v14, %v2899_v5 }
 0x64a   : > { %v2901_v61 = vpop.permute.xlu1 %2900  ;;  %v3033_v42 = vsel %vm2993_vm8, %v2973_v1, %v3013_v2  ;;  %v2974_v4 = vsel %vm6991_vm2, %v2937_v7, 0.0 }
 0x64b   : > { %v2938_v10 = vsel %vm2936_vm6, %v2899_v5, %v2901_v61  ;;  %vm2994_vm12 = vcmp.ge.f32.partialorder %v2974_v4, 0.0  ;;  %v3014_v20 = vmul.f32 0.1, %v2974_v4 }
 0x64c   : > { %v2907_v47 = vpop.permute.xlu0 %2906  ;;  %v2975_v35 = vsel %vm6981_vm1, %v2938_v10, 0.0 }
 0x64d   : > { %v2978_v34 = vsel %vm6967_vm9, %v2907_v47, 0.0  ;;  %v3015_v12 = vmul.f32 0.1, %v2975_v35  ;;  %vm2995_vm11 = vcmp.ge.f32.partialorder %v2975_v35, 0.0  ;;  %v3034_v55 = vsel %vm2994_vm12, %v2974_v4, %v3014_v20 }
 0x64e   : > { %vm2998_vm10 = vcmp.ge.f32.partialorder %v2978_v34, 0.0  ;;  %v3018_v33 = vmul.f32 0.1, %v2978_v34  ;;  %v7698_v54 = vpop.permute.xlu1 %2902 }
 0x64f   : > { %v3035_v45 = vsel %vm2995_vm11, %v2975_v35, %v3015_v12  ;;  %v2939_v22 = vsel %vm2936_vm6, %v2901_v61, %v7698_v54 }
 0x650   : > { %v3038_v29 = vsel %vm2998_vm10, %v2978_v34, %v3018_v33  ;;  %v7704_v13 = vpop.permute.xlu0 %2910  ;;  %v2976_v14 = vsel %vm7031_vm7, %v2939_v22, 0.0 }
 0x651   : > { %v7706_v51 = vpack.c.bf16 %v3038_v29, %v3033_v42 }
 0x652   : > { %v2909_v52 = vpop.permute.xlu1 %2908 }
 0x653   : > { %v2941_v59 = vsel %vm2936_vm6, %v2907_v47, %v2909_v52  ;;  %v2942_v49 = vsel %vm2936_vm6, %v2909_v52, %v7704_v13  ;;  %3093 = vrot.lane.b32.xlu0 %v7706_v51, %s6422_s29 }
 0x654   : > { %v2979_v41 = vsel %vm6991_vm2, %v2941_v59, 0.0  ;;  %v2980_v9 = vsel %vm6981_vm1, %v2942_v49, 0.0  ;;  %v2919_v39 = vpop.permute.xlu0 %2918 }
 0x655   : > { %vm2999_vm13 = vcmp.ge.f32.partialorder %v2979_v41, 0.0  ;;  %vm3000_vm0 = vcmp.ge.f32.partialorder %v2980_v9, 0.0  ;;  %v3019_v31 = vmul.f32 0.1, %v2979_v41  ;;  %v3020_v19 = vmul.f32 0.1, %v2980_v9 }
 0x656   : > { %v2917_v48 = vpop.permute.xlu1 %2916 }
 0x657   : > { %v3039_v43 = vsel %vm2999_vm13, %v2979_v41, %v3019_v31  ;;  %v3040_v58 = vsel %vm3000_vm0, %v2980_v9, %v3020_v19  ;;  %v2983_v27 = vsel %vm6967_vm9, %v2917_v48, 0.0  ;;  %v2945_v24 = vsel %vm2936_vm6, %v2917_v48, %v2919_v39 }
 0x658   : > { %v3023_v53 = vmul.f32 0.1, %v2983_v27  ;;  %v2927_v38 = vpop.permute.xlu0 %2926  ;;  %v7720_v26 = vpack.c.bf16 %v3040_v58, %v3035_v45  ;;  %vm3003_vm14 = vcmp.ge.f32.partialorder %v2983_v27, 0.0  ;;  %v7724_v44 = vpack.c.bf16 %v3039_v43, %v3034_v55 }
 0x659   : > { %v2988_v30 = vsel %vm6967_vm9, %v2927_v38, 0.0  ;;  %v2984_v37 = vsel %vm6991_vm2, %v2945_v24, 0.0  ;;  %v3016_v48 = vmul.f32 0.1, %v2976_v14 }
 0x65a   : > { %vm3008_vm4 = vcmp.ge.f32.partialorder %v2988_v30, 0.0  ;;  %v3028_v8 = vmul.f32 0.1, %v2988_v30  ;;  %3097 = vrot.lane.b32.xlu1 %v7720_v26, %s6422_s29  ;;  %v2921_v3 = vpop.permute.xlu1 %2920  ;;  %3095 = vrot.lane.b32.xlu0 %v7724_v44, %s6422_s29  ;;  %v3043_v6 = vsel %vm3003_vm14, %v2983_v27, %v3023_v53  ;;  %v3024_v56 = vmul.f32 0.1, %v2984_v37 }
 0x65b   : > { %v2946_v18 = vsel %vm2936_vm6, %v2919_v39, %v2921_v3  ;;  %vm3004_vm8 = vcmp.ge.f32.partialorder %v2984_v37, 0.0 }
 0x65c   : > { %v3048_v46 = vsel %vm3008_vm4, %v2988_v30, %v3028_v8  ;;  %v2931_v60 = vpop.permute.xlu0 %2930  ;;  %v2985_v40 = vsel %vm6981_vm1, %v2946_v18, 0.0  ;;  %v3044_v2 = vsel %vm3004_vm8, %v2984_v37, %v3024_v56 }
 0x65d   : > { %v7734_v50 = vpack.c.bf16 %v3048_v46, %v3043_v6  ;;  %v3025_v36 = vmul.f32 0.1, %v2985_v40  ;;  %vm3005_vm10 = vcmp.ge.f32.partialorder %v2985_v40, 0.0 }
 0x65e   : > { %v2923_v15 = vpop.permute.xlu1 %2922 }
 0x65f   : > { %3103 = vrot.lane.b32.xlu1 %v7734_v50, %s6422_s29  ;;  %v2947_v57 = vsel %vm2936_vm6, %v2921_v3, %v2923_v15  ;;  %v3045_v34 = vsel %vm3005_vm10, %v2985_v40, %v3025_v36  ;;  %vm2996_vm10 = vcmp.ge.f32.partialorder %v2976_v14, 0.0 }
 0x660   : > { %v2925_v21 = vpop.permute.xlu0 %2924  ;;  %v2986_v5 = vsel %vm7031_vm7, %v2947_v57, 0.0  ;;  %v3036_v22 = vsel %vm2996_vm10, %v2976_v14, %v3016_v48 }
 0x661   : > { %v2948_v63 = vsel %vm2936_vm6, %v2923_v15, %v2925_v21  ;;  %v3026_v4 = vmul.f32 0.1, %v2986_v5  ;;  %vm3006_vm13 = vcmp.ge.f32.partialorder %v2986_v5, 0.0 }
 0x662   : > { %v2929_v23 = vpop.permute.xlu1 %2928  ;;  %v2987_v61 = vsel %vm7024_vm3, %v2948_v63, 0.0  ;;  %v5812_v63 = vld [vmem:[%s8798_s2 + $0x78] sm:$0xff] }
 0x663   : > { %v2949_v1 = vsel %vm2936_vm6, %v2927_v38, %v2929_v23  ;;  %v2950_v47 = vsel %vm2936_vm6, %v2929_v23, %v2931_v60  ;;  %vm3007_vm0 = vcmp.ge.f32.partialorder %v2987_v61, 0.0  ;;  %v3027_v49 = vmul.f32 0.1, %v2987_v61  ;;  %v5811_v23 = vld [vmem:[%s8798_s2 + $0x70] sm:$0xff] }
 0x664   : > { %v2989_v7 = vsel %vm6991_vm2, %v2949_v1, 0.0  ;;  %v2905_v10 = vpop.permute.xlu0 %2904  ;;  %v2990_v33 = vsel %vm6981_vm1, %v2950_v47, 0.0  ;;  %v3046_v45 = vsel %vm3006_vm13, %v2986_v5, %v3026_v4  ;;  %vm3537_vm13 = vcmask 990208  }
 0x665   : > { %vm3009_vm12 = vcmp.ge.f32.partialorder %v2989_v7, 0.0  ;;  %v3029_v42 = vmul.f32 0.1, %v2989_v7  ;;  %vm3010_vm11 = vcmp.ge.f32.partialorder %v2990_v33, 0.0  ;;  %v3030_v35 = vmul.f32 0.1, %v2990_v33 }
 0x666   : > { %v2940_v29 = vsel %vm2936_vm6, %v7698_v54, %v2905_v10  ;;  %v2933_v52 = vpop.permute.xlu1 %2932  ;;  %v3047_v30 = vsel %vm3007_vm0, %v2987_v61, %v3027_v49 }
 0x667   : > { %v3049_v12 = vsel %vm3009_vm12, %v2989_v7, %v3029_v42  ;;  %v2951_v59 = vsel %vm2936_vm6, %v2931_v60, %v2933_v52  ;;  %v3050_v20 = vsel %vm3010_vm11, %v2990_v33, %v3030_v35  ;;  %v2977_v41 = vsel %vm7024_vm3, %v2940_v29, 0.0  ;;  %v6209_v35 = vld [vmem:[#allocation5 + $0xa0] sm:$0xff]  }
 0x668   : > { %v2991_v9 = vsel %vm7031_vm7, %v2951_v59, 0.0  ;;  %v2935_v39 = vpop.permute.xlu0 %2934  ;;  %v3060_v54 = vpack.c.bf16 %v3050_v20, %v3045_v34  ;;  %v3059_v58 = vpack.c.bf16 %v3049_v12, %v3044_v2  ;;  %v3017_v24 = vmul.f32 0.1, %v2977_v41 }
 0x669   : > { %vm3011_vm14 = vcmp.ge.f32.partialorder %v2991_v9, 0.0  ;;  %v3031_v31 = vmul.f32 0.1, %v2991_v9  ;;  %v2952_v19 = vsel %vm2936_vm6, %v2933_v52, %v2935_v39  ;;  %vm2997_vm12 = vcmp.ge.f32.partialorder %v2977_v41, 0.0 }
 0x66a   : > { %v2992_v43 = vsel %vm7024_vm3, %v2952_v19, 0.0  ;;  %v2913_v27 = vpop.permute.xlu1 %2912  ;;  %3107 = vrot.lane.b32.xlu0 %v3060_v54, %s6422_s29  ;;  %3105 = vrot.lane.b32.xlu1 %v3059_v58, %s6422_s29  ;;  %v3037_v56 = vsel %vm2997_vm12, %v2977_v41, %v3017_v24 }
 0x66b   : > { %v3051_v55 = vsel %vm3011_vm14, %v2991_v9, %v3031_v31  ;;  %vm3012_vm4 = vcmp.ge.f32.partialorder %v2992_v43, 0.0  ;;  %v3032_v53 = vmul.f32 0.1, %v2992_v43  ;;  %v2943_v38 = vsel %vm2936_vm6, %v7704_v13, %v2913_v27  ;;  %v6210_v9 = vld [vmem:[#allocation5 + $0xa8] sm:$0xff]  }
 0x66c   : > { %v2981_v8 = vsel %vm7031_vm7, %v2943_v38, 0.0  ;;  %v2915_v3 = vpop.permute.xlu0 %2914  ;;  %v3061_v18 = vpack.c.bf16 %v3051_v55, %v3046_v45  ;;  %v6211_v38 = vld [vmem:[#allocation5 + $0x90] sm:$0xff]  }
 0x66d   : > { %v3052_v6 = vsel %vm3012_vm4, %v2992_v43, %v3032_v53  ;;  %vm3001_vm8 = vcmp.ge.f32.partialorder %v2981_v8, 0.0  ;;  %v3021_v46 = vmul.f32 0.1, %v2981_v8  ;;  %v2944_v60 = vsel %vm2936_vm6, %v2913_v27, %v2915_v3 }
 0x66e   : > { %v3062_v37 = vpack.c.bf16 %v3052_v6, %v3047_v30  ;;  %v2982_v13 = vsel %vm7024_vm3, %v2944_v60, 0.0  ;;  %3109 = vrot.lane.b32.xlu0 %v3061_v18, %s6422_s29  ;;  %vm3113_vm6 = vcmask 998400   ;;  %v6212_v60 = vld [vmem:[#allocation5 + $0x98] sm:$0xff]  }
 0x66f   : > { %v3041_v40 = vsel %vm3001_vm8, %v2981_v8, %v3021_v46  ;;  %vm3002_vm11 = vcmp.ge.f32.partialorder %v2982_v13, 0.0  ;;  %v3022_v15 = vmul.f32 0.1, %v2982_v13 }
 0x670   : > { %3111 = vrot.lane.b32.xlu1 %v3062_v37, %s6422_s29  ;;  %v3056_v36 = vpack.c.bf16 %v3041_v40, %v3036_v22 }
 0x671   : > { %v3042_v57 = vsel %vm3002_vm11, %v2982_v13, %v3022_v15 }
 0x672   : > { %v3057_v21 = vpack.c.bf16 %v3042_v57, %v3037_v56 }
 0x674   : > { %3101 = vrot.lane.b32.xlu0 %v3057_v21, %s6422_s29  ;;  %3099 = vrot.lane.b32.xlu1 %v3056_v36, %s6422_s29 }
 0x678   : > { %3317 = vrot.lane.b32.xlu0 %v3060_v54, %s6419_s26  ;;  %3315 = vrot.lane.b32.xlu1 %v3059_v58, %s6419_s26 }
 0x67c   : > { %3305 = vrot.lane.b32.xlu0 %v7724_v44, %s6419_s26  ;;  %3313 = vrot.lane.b32.xlu1 %v7734_v50, %s6419_s26 }
 0x680   : > { %3303 = vrot.lane.b32.xlu0 %v7706_v51, %s6419_s26  ;;  %3307 = vrot.lane.b32.xlu1 %v7720_v26, %s6419_s26 }
 0x684   : > { %3321 = vrot.lane.b32.xlu0 %v3062_v37, %s6419_s26  ;;  %3319 = vrot.lane.b32.xlu1 %v3061_v18, %s6419_s26 }
 0x688   : > { %3311 = vrot.lane.b32.xlu0 %v3057_v21, %s6419_s26  ;;  %3309 = vrot.lane.b32.xlu1 %v3056_v36, %s6419_s26 }
 0x68c   : > { %3531 = vrot.lane.b32.xlu0 %v3060_v54, %s6423_s30  ;;  %3529 = vrot.lane.b32.xlu1 %v3059_v58, %s6423_s30 }
 0x690   : > { %3533 = vrot.lane.b32.xlu0 %v3061_v18, %s6423_s30  ;;  %3527 = vrot.lane.b32.xlu1 %v7734_v50, %s6423_s30 }
 0x694   : > { %3519 = vrot.lane.b32.xlu0 %v7724_v44, %s6423_s30  ;;  %3535 = vrot.lane.b32.xlu1 %v3062_v37, %s6423_s30  ;;  %v5810_v44 = vld [vmem:[%s8798_s2 + $0x68] sm:$0xff] }
 0x698   : > { %3517 = vrot.lane.b32.xlu0 %v7706_v51, %s6423_s30  ;;  %3521 = vrot.lane.b32.xlu1 %v7720_v26, %s6423_s30  ;;  %v5809_v51 = vld [vmem:[%s8798_s2 + $0x60] sm:$0xff] }
 0x69c   : > { %3525 = vrot.lane.b32.xlu0 %v3057_v21, %s6423_s30  ;;  %3523 = vrot.lane.b32.xlu1 %v3056_v36, %s6423_s30 }
 0x6a0   : > { %3759 = vperm.xlu0 %6189, %v5812_v63   ;;  %3754 = vperm.xlu1 %6190, %v5811_v23  }
 0x6a4   : > { %3749 = vperm.xlu0 %6189, %v5810_v44   ;;  %3744 = vperm.xlu1 %6190, %v5809_v51   ;;  %v6213_v44 = vld [vmem:[#allocation5 + $0xb0] sm:$0xff]  }
 0x6c5   : > { %v3094_v50 = vpop.permute.xlu0 %3093 }
 0x6cc   : > { %v3098_v26 = vpop.permute.xlu1 %3097  ;;  %v3096_v14 = vpop.permute.xlu0 %3095 }
 0x6cd   : > { %v3115_v10 = vsel %vm3113_vm6, %v3096_v14, %v3098_v26  ;;  %v3114_v42 = vsel %vm3113_vm6, %v3094_v50, %v3096_v14 }
 0x6d1   : > { %v3104_v5 = vpop.permute.xlu1 %3103 }
 0x6dc   : > { %v3108_v1 = vpop.permute.xlu0 %3107  ;;  %v3106_v2 = vpop.permute.xlu1 %3105 }
 0x6dd   : > { %v3119_v61 = vsel %vm3113_vm6, %v3106_v2, %v3108_v1  ;;  %v3118_v47 = vsel %vm3113_vm6, %v3104_v5, %v3106_v2  ;;  %v6214_v5 = vld [vmem:[#allocation5 + $0xb8] sm:$0xff]  }
 0x6de   : > { %3150 = vmatprep.subr.bf16.mxu1 %v3119_v61 }
 0x6df   : > { %3151 = vmatpush1.bf16.msra.mxu1 %v3118_v47 }
 0x6e0   : > { %v3110_v7 = vpop.permute.xlu0 %3109  ;;  %3152 = vmatprep.subr.bf16.mxu1 %v3115_v10 }
 0x6e1   : > { %v3120_v4 = vsel %vm3113_vm6, %v3108_v1, %v3110_v7 }
 0x6e2   : > { %v3112_v34 = vpop.permute.xlu1 %3111 }
 0x6e3   : > { %v3121_v33 = vsel %vm3113_vm6, %v3110_v7, %v3112_v34  ;;  %3153 = vmatpush1.bf16.msra.mxu1 %v3114_v42 }
 0x6e4   : > { %3203 = vmatprep.subr.bf16.mxu0 %v3121_v33  ;;  %6001 = vmatprep.subr.bf16.mxu1 %v3112_v34 }
 0x6e5   : > { %3204 = vmatpush1.bf16.msra.mxu0 %v3120_v4 }
 0x6e6   : > { %v3102_v29 = vpop.permute.xlu0 %3101  ;;  %v3100_v52 = vpop.permute.xlu1 %3099  ;;  %5787 = vmatmul.mubr.msk.bf16.vlgmr.msra.gmra.mxu1 %vm423_vm5, %v6209_v35 }
 0x6e7   : > { %v3117_v12 = vsel %vm3113_vm6, %v3100_v52, %v3102_v29  ;;  %v3116_v59 = vsel %vm3113_vm6, %v3098_v26, %v3100_v52  ;;  %6002 = vmatpush3.bf16.msra.mxu1 %v3112_v34  ;;  %3180 = vmatprep.mubr.bf16.mxu1 %v8952_v62 }
 0x6e8   : > { %3205 = vmatprep.subr.bf16.mxu0 %v3117_v12  ;;  %6003 = vmatprep.subr.bf16.mxu1 %v3102_v29 }
 0x6e9   : > { %3206 = vmatpush1.bf16.msra.mxu0 %v3116_v59 }
 0x6ea   : > { %v3318_v49 = vpop.permute.xlu0 %3317  ;;  %v3316_v20 = vpop.permute.xlu1 %3315 }
 0x6eb   : > { %v3328_v41 = vsel %vm2207_vm15, %v3316_v20, %v3318_v49  ;;  %6004 = vmatpush3.bf16.msra.mxu1 %v3102_v29 }
 0x6ec   : > { %5789 = vmatmul.mubr.msk.bf16.vlgmr.msra.gmra.mxu0 %vm423_vm5, %v6209_v35  ;;  %3359 = vmatprep.subr.bf16.mxu0 %v3328_v41 }
 0x6ed   : > { %3233 = vmatprep.mubr.bf16.mxu0 %v8952_v62 }
 0x6ee   : > { %v3306_v39 = vpop.permute.xlu0 %3305  ;;  %v3314_v31 = vpop.permute.xlu1 %3313  ;;  %5788 = vmatmul.mubr.msk.bf16.gmra.mxu1 %vm423_vm5, %v6210_v9 }
 0x6ef   : > { %v3327_v19 = vsel %vm2207_vm15, %v3314_v31, %v3316_v20  ;;  %6005 = vmatprep.mubr.msk.bf16.mxu1 %vm423_vm5, %v6209_v35 }
 0x6f0   : > { %3360 = vmatpush1.bf16.msra.mxu0 %v3327_v19 }
 0x6f2   : > { %v3304_v54 = vpop.permute.xlu0 %3303  ;;  %v3308_v48 = vpop.permute.xlu1 %3307 }
 0x6f3   : > { %v3323_v45 = vsel %vm2207_vm15, %v3304_v54, %v3306_v39  ;;  %v3324_v43 = vsel %vm2207_vm15, %v3306_v39, %v3308_v48 }
 0x6f4   : > { %5790 = vmatmul.mubr.msk.bf16.gmra.mxu0 %vm423_vm5, %v6210_v9  ;;  %3361 = vmatprep.subr.bf16.mxu0 %v3324_v43 }
 0x6f5   : > { %3362 = vmatpush1.bf16.msra.mxu0 %v3323_v45  ;;  %3379 = vmatprep.mubr.bf16.mxu0 %v8952_v62 }
 0x6f6   : > { %v3322_v58 = vpop.permute.xlu0 %3321  ;;  %v3320_v27 = vpop.permute.xlu1 %3319  ;;  %6006 = vmatmul.mubr.msk.bf16.vlgmr.msra.gmra.mxu1 %vm423_vm5, %v6210_v9 }
 0x6f7   : > { %6009 = vmatprep.subr.bf16.mxu0 %v3322_v58  ;;  %v3330_v55 = vsel %vm2207_vm15, %v3320_v27, %v3322_v58  ;;  %v3329_v53 = vsel %vm2207_vm15, %v3318_v49, %v3320_v27  ;;  %3432 = vmatprep.mubr.bf16.mxu1 %v8952_v62 }
 0x6f8   : > { %3412 = vmatprep.subr.bf16.mxu1 %v3330_v55 }
 0x6f9   : > { %3413 = vmatpush1.bf16.msra.mxu1 %v3329_v53 }
 0x6fa   : > { %v3312_v30 = vpop.permute.xlu0 %3311  ;;  %v3310_v24 = vpop.permute.xlu1 %3309 }
 0x6fb   : > { %v3326_v8 = vsel %vm2207_vm15, %v3310_v24, %v3312_v30  ;;  %v3325_v3 = vsel %vm2207_vm15, %v3308_v48, %v3310_v24  ;;  %vm3842_vm15 = vcmask 48128  }
 0x6fc   : > { %5795 = vmatmul.mubr.msk.bf16.vlgmr.msra.gmra.mxu0 %vm423_vm5, %v6211_v38  ;;  %3414 = vmatprep.subr.bf16.mxu1 %v3326_v8 }
 0x6fd   : > { %6010 = vmatpush3.bf16.msra.mxu0 %v3322_v58  ;;  %3415 = vmatpush1.bf16.msra.mxu1 %v3325_v3 }
 0x6fe   : > { %6011 = vmatprep.subr.bf16.mxu0 %v3312_v30  ;;  %v3532_v18 = vpop.permute.xlu0 %3531  ;;  %v3530_v6 = vpop.permute.xlu1 %3529  ;;  %3389 = vmatprep.mubr.bf16.mxu0 %v8952_v62 }
 0x6ff   : > { %v3543_v46 = vsel %vm3537_vm13, %v3530_v6, %v3532_v18 }
 0x700   : > { %5797 = vmatmul.mubr.msk.bf16.vlgmr.msra.gmra.mxu1 %vm423_vm5, %v6211_v38  ;;  %3574 = vmatprep.subr.bf16.mxu1 %v3543_v46 }
 0x701   : > { %6012 = vmatpush3.bf16.msra.mxu0 %v3312_v30  ;;  %3442 = vmatprep.mubr.bf16.mxu1 %v8952_v62 }
 0x702   : > { %v3534_v37 = vpop.permute.xlu0 %3533  ;;  %v3528_v13 = vpop.permute.xlu1 %3527 }
 0x703   : > { %v3542_v40 = vsel %vm3537_vm13, %v3528_v13, %v3530_v6  ;;  %v3544_v23 = vsel %vm3537_vm13, %v3532_v18, %v3534_v37 }
 0x704   : > { %5796 = vmatmul.mubr.msk.bf16.gmra.mxu0 %vm423_vm5, %v6212_v60  ;;  %3575 = vmatpush1.bf16.msra.mxu1 %v3542_v40 }
 0x705   : > { %6013 = vmatprep.mubr.msk.bf16.mxu0 %vm423_vm5, %v6211_v38 }
 0x706   : > { %v3520_v15 = vpop.permute.xlu0 %3519  ;;  %v3536_v22 = vpop.permute.xlu1 %3535 }
 0x707   : > { %v3545_v56 = vsel %vm3537_vm13, %v3534_v37, %v3536_v22 }
 0x708   : > { %5798 = vmatmul.mubr.msk.bf16.gmra.mxu1 %vm423_vm5, %v6212_v60  ;;  %3627 = vmatprep.subr.bf16.mxu0 %v3545_v56 }
 0x709   : > { %3594 = vmatprep.mubr.bf16.mxu1 %v8952_v62 }
 0x70a   : > { %v3518_v57 = vpop.permute.xlu0 %3517  ;;  %v3522_v21 = vpop.permute.xlu1 %3521 }
 0x70b   : > { %v3538_v36 = vsel %vm3537_vm13, %v3518_v57, %v3520_v15  ;;  %v3539_v63 = vsel %vm3537_vm13, %v3520_v15, %v3522_v21 }
 0x70c   : > { %6014 = vmatmul.mubr.msk.bf16.vlgmr.msra.gmra.mxu0 %vm423_vm5, %v6212_v60  ;;  %3576 = vmatprep.subr.bf16.mxu1 %v3539_v63 }
 0x70d   : > { %3628 = vmatpush1.bf16.msra.mxu0 %v3544_v23  ;;  %3577 = vmatpush1.bf16.msra.mxu1 %v3538_v36 }
 0x70e   : > { %v3526_v51 = vpop.permute.xlu0 %3525  ;;  %6017 = vmatprep.subr.bf16.mxu1 %v3536_v22  ;;  %v3524_v26 = vpop.permute.xlu1 %3523  ;;  %3647 = vmatprep.mubr.bf16.mxu0 %v8952_v62 }
 0x70f   : > { %v3541_v50 = vsel %vm3537_vm13, %v3524_v26, %v3526_v51  ;;  %v3540_v14 = vsel %vm3537_vm13, %v3522_v21, %v3524_v26 }
 0x710   : > { %5803 = vmatmul.mubr.msk.bf16.vlgmr.msra.gmra.mxu1 %vm423_vm5, %v6213_v44  ;;  %3629 = vmatprep.subr.bf16.mxu0 %v3541_v50 }
 0x711   : > { %3630 = vmatpush1.bf16.msra.mxu0 %v3540_v14  ;;  %6018 = vmatpush3.bf16.msra.mxu1 %v3536_v22 }
 0x712   : > { %6019 = vmatprep.subr.bf16.mxu1 %v3526_v51  ;;  %3604 = vmatprep.mubr.bf16.mxu1 %v8952_v62 }
 0x714   : > { %5805 = vmatmul.mubr.msk.bf16.vlgmr.msra.gmra.mxu0 %vm423_vm5, %v6213_v44 }
 0x715   : > { %6020 = vmatpush3.bf16.msra.mxu1 %v3526_v51  ;;  %3657 = vmatprep.mubr.bf16.mxu0 %v8952_v62 }
 0x718   : > { %5804 = vmatmul.mubr.msk.bf16.gmra.mxu1 %vm423_vm5, %v6214_v5 }
 0x719   : > { %6021 = vmatprep.mubr.msk.bf16.mxu1 %vm423_vm5, %v6213_v44 }
 0x71b   : > { %v7896_v3 = vpop.permute.xlu1 %3754  ;;  %v7906_v15 = vpop.permute.xlu0 %3759 }
 0x71c   : > { %5806 = vmatmul.mubr.msk.bf16.gmra.mxu0 %vm423_vm5, %v6214_v5 }
 0x71d   : > { %4096 = vmatprep.mubr.bf16.mxu0 %v8952_v62 }
 0x71f   : > { %v7908_v22 = vpop.permute.xlu1 %3744 }
 0x720   : > { %6022 = vmatmul.mubr.msk.bf16.vlgmr.msra.gmra.mxu1 %vm423_vm5, %v6214_v5 }
 0x721   : > { %4149 = vmatprep.mubr.bf16.mxu1 %v8952_v62 }
 0x7a6   : > { %v3172_v1 = vpop.f32.mrf.mxu1 }
 0x7a8   : > { %v3174_v2 = vpop.f32.mrf.mxu1 }
 0x7aa   : > { %v3176_v61 = vpop.f32.mrf.mxu1 }
 0x7ac   : > { %v3225_v47 = vpop.f32.mrf.mxu0  ;;  %v3178_v7 = vpop.f32.mrf.mxu1 }
 0x7ae   : > { %v7864_v10 = vpop.f32.mrf.mxu0  ;;  %v3182_v34 = vpop.f32.mrf.mxu1 }
 0x7b0   : > { %v7866_v33 = vpop.f32.mrf.mxu0  ;;  %v3184_v42 = vpop.f32.mrf.mxu1 }
 0x7b2   : > { %v7868_v4 = vpop.f32.mrf.mxu0  ;;  %v7870_v35 = vpop.f32.mrf.mxu1 }
 0x7b4   : > { %v7872_v29 = vpop.f32.mrf.mxu0  ;;  %v7874_v52 = vpop.f32.mrf.mxu1 }
 0x7b6   : > { %v7876_v12 = vpop.f32.mrf.mxu0  ;;  %v7878_v59 = vpop.f32.mrf.mxu1 }
 0x7b8   : > { %v7880_v49 = vpop.f32.mrf.mxu0  ;;  %v7882_v20 = vpop.f32.mrf.mxu1 }
 0x7ba   : > { %v7884_v41 = vpop.f32.mrf.mxu0  ;;  %v7886_v9 = vpop.f32.mrf.mxu1 }
 0x7bc   : > { %v3381_v39 = vpop.f32.mrf.mxu0  ;;  %v7888_v31 = vpop.f32.mrf.mxu1 }
 0x7bd   : > { %v3382_v37 = vadd.f32 %v3381_v39, %v3172_v1 }
 0x7be   : > { %v3383_v19 = vpop.f32.mrf.mxu0 }
 0x7bf   : > { %v3384_v56 = vadd.f32 %v3383_v19, %v3174_v2 }
 0x7c0   : > { %v3385_v54 = vpop.f32.mrf.mxu0  ;;  %v3434_v48 = vpop.f32.mrf.mxu1 }
 0x7c1   : > { %v3386_v63 = vadd.f32 %v3385_v54, %v3176_v61  ;;  %v3435_v23 = vadd.f32 %v3434_v48, %v3225_v47 }
 0x7c2   : > { %v3387_v45 = vpop.f32.mrf.mxu0  ;;  %v3436_v43 = vpop.f32.mrf.mxu1 }
 0x7c3   : > { %v3388_v14 = vadd.f32 %v3387_v45, %v3178_v7 }
 0x7c4   : > { %v3391_v58 = vpop.f32.mrf.mxu0  ;;  %v3438_v27 = vpop.f32.mrf.mxu1 }
 0x7c6   : > { %v3393_v55 = vpop.f32.mrf.mxu0  ;;  %v7890_v53 = vpop.f32.mrf.mxu1 }
 0x7c7   : > { %v3394_v7 = vadd.f32 %v3393_v55, %v3184_v42 }
 0x7c8   : > { %v3395_v38 = vpop.f32.mrf.mxu0  ;;  %v3444_v30 = vpop.f32.mrf.mxu1 }
 0x7c9   : > { %v3396_v55 = vadd.f32 %v3395_v38, %v7870_v35 }
 0x7ca   : > { %v7892_v24 = vpop.f32.mrf.mxu0  ;;  %v7894_v8 = vpop.f32.mrf.mxu1 }
 0x7cb   : > { %v3398_v35 = vadd.f32 %v7892_v24, %v7874_v52 }
 0x7cc   : > { %v7898_v18 = vpop.f32.mrf.mxu1  ;;  %v6015_v6 = vpop.f32.mrf.mxu0 }
 0x7ce   : > { %v7900_v46 = vpop.f32.mrf.mxu1  ;;  %v7902_v60 = vpop.f32.mrf.mxu0 }
 0x7d0   : > { %v7904_v13 = vpop.f32.mrf.mxu0  ;;  %v3596_v40 = vpop.f32.mrf.mxu1 }
 0x7d1   : > { %v3717_v57 = vadd.f32 %v3596_v40, %v3382_v37  ;;  %v7915_v37 = vpop.permute.xlu0 %3749  ;;  %v3392_v40 = vadd.f32 %v3391_v58, %v3182_v34 }
 0x7d2   : > { %v7910_v21 = vpop.f32.mrf.mxu0  ;;  %v3598_v36 = vpop.f32.mrf.mxu1 }
 0x7d3   : > { %v3762_v44 = vadd.f32 %v7908_v22, %v3717_v57  ;;  %v3718_v51 = vadd.f32 %v3598_v36, %v3384_v56  ;;  %v3439_v36 = vadd.f32 %v3438_v27, %v7866_v33  ;;  %v3445_v27 = vadd.f32 %v3444_v30, %v7872_v29 }
 0x7d4   : > { %v3600_v26 = vpop.f32.mrf.mxu1  ;;  %v3649_v50 = vpop.f32.mrf.mxu0 }
 0x7d5   : > { %v3763_v5 = vadd.f32 %v7908_v22, %v3718_v51  ;;  %v3722_v1 = vadd.f32 %v3600_v26, %v3386_v63  ;;  %v3719_v39 = vadd.f32 %v3649_v50, %v3435_v23  ;;  %3802 = vrot.lane.b32.xlu1 %v3762_v44, %s6424_s12  ;;  %v3437_v26 = vadd.f32 %v3436_v43, %v7864_v10 }
 0x7d6   : > { %v3602_v2 = vpop.f32.mrf.mxu1  ;;  %v3651_v19 = vpop.f32.mrf.mxu0 }
 0x7d7   : > { %v3764_v61 = vadd.f32 %v7908_v22, %v3719_v39  ;;  %v3723_v47 = vadd.f32 %v3602_v2, %v3388_v14  ;;  %3804 = vrot.lane.b32.xlu0 %v3763_v5, %s6424_s12  ;;  %v3767_v45 = vadd.f32 %v7915_v37, %v3722_v1  ;;  %v3720_v14 = vadd.f32 %v3651_v19, %v3437_v26 }
 0x7d8   : > { %v3606_v54 = vpop.f32.mrf.mxu1  ;;  %v3653_v48 = vpop.f32.mrf.mxu0  ;;  %v3496_v39 = vadd.f32 %v6015_v6, %v7878_v59  ;;  %v3449_v19 = vadd.f32 %v7898_v18, %v7880_v49  ;;  %v3447_v6 = vadd.f32 %v7894_v8, %v7876_v12 }
 0x7d9   : > { %3806 = vrot.lane.b32.xlu1 %v3764_v61, %s6424_s12  ;;  %v3768_v63 = vadd.f32 %v7915_v37, %v3723_v47  ;;  %v3727_v23 = vadd.f32 %v3606_v54, %v3392_v40  ;;  %v3724_v50 = vadd.f32 %v3653_v48, %v3439_v36  ;;  %v3765_v2 = vadd.f32 %v7908_v22, %v3720_v14 }
 0x7da   : > { %v3608_v56 = vpop.f32.mrf.mxu1  ;;  %v3655_v57 = vpop.f32.mrf.mxu0  ;;  %v3488_v48 = vadd.f32 %v7902_v60, %v7882_v20  ;;  %v3441_v36 = vadd.f32 %v7890_v53, %v7868_v4 }
 0x7db   : > { %v3728_v44 = vadd.f32 %v3608_v56, %v3394_v7  ;;  %3812 = vrot.lane.b32.xlu0 %v3767_v45, %s6424_s12  ;;  %v3772_v33 = vadd.f32 %v7896_v3, %v3727_v23  ;;  %v3769_v5 = vadd.f32 %v7915_v37, %v3724_v50  ;;  %v3451_v7 = vadd.f32 %v7900_v46, %v7884_v41 }
 0x7dc   : > { %v3610_v51 = vpop.f32.mrf.mxu1  ;;  %v3659_v42 = vpop.f32.mrf.mxu0  ;;  %v3499_v56 = vadd.f32 %v7904_v13, %v7886_v9  ;;  %v3491_v23 = vadd.f32 %v7910_v21, %v7888_v31 }
 0x7dd   : > { %v3773_v34 = vadd.f32 %v7896_v3, %v3728_v44  ;;  %3814 = vrot.lane.b32.xlu1 %v3768_v63, %s6424_s12  ;;  %v3732_v1 = vadd.f32 %v3610_v51, %v3396_v55  ;;  %v3729_v61 = vadd.f32 %v3659_v42, %v3445_v27  ;;  %v3725_v44 = vadd.f32 %v3655_v57, %v3441_v36  ;;  %v8953_v55 = vld [vmem:[#allocation33_spill] sm:$0xff] }
 0x7de   : > { %v3612_v58 = vpop.f32.mrf.mxu1  ;;  %v3661_v10 = vpop.f32.mrf.mxu0 }
 0x7df   : > { %3824 = vrot.lane.b32.xlu0 %v3773_v34, %s6424_s12  ;;  %v3777_v38 = vadd.f32 %v7906_v15, %v3732_v1  ;;  %v3774_v47 = vadd.f32 %v7896_v3, %v3729_v61  ;;  %v3733_v59 = vadd.f32 %v3612_v58, %v3398_v35  ;;  %v3730_v49 = vadd.f32 %v3661_v10, %v3447_v6  ;;  %v8955_v10 = vld [vmem:[#allocation34_spill] sm:$0xff] }
 0x7e0   : > { %v6023_v43 = vpop.f32.mrf.mxu1  ;;  %v3663_v30 = vpop.f32.mrf.mxu0  ;;  %v3770_v4 = vadd.f32 %v7915_v37, %v3725_v44 }
 0x7e1   : > { %3822 = vrot.lane.b32.xlu1 %v3772_v33, %s6424_s12  ;;  %v3731_v29 = vadd.f32 %v6023_v43, %v3496_v39  ;;  %v3734_v54 = vadd.f32 %v3663_v30, %v3449_v19  ;;  %v3778_v40 = vadd.f32 %v7906_v15, %v3733_v59  ;;  %v3775_v20 = vadd.f32 %v7896_v3, %v3730_v49 }
 0x7e2   : > { %v3702_v24 = vpop.f32.mrf.mxu1  ;;  %v3665_v18 = vpop.f32.mrf.mxu0 }
 0x7e3   : > { %3816 = vrot.lane.b32.xlu0 %v3769_v5, %s6424_s12  ;;  %v3776_v52 = vadd.f32 %v7896_v3, %v3731_v29  ;;  %v3779_v12 = vadd.f32 %v7906_v15, %v3734_v54  ;;  %v3721_v8 = vadd.f32 %v3702_v24, %v3488_v48  ;;  %v3735_v60 = vadd.f32 %v3665_v18, %v3451_v7 }
 0x7e4   : > { %v6024_v45 = vpop.f32.mrf.mxu1 }
 0x7e5   : > { %3808 = vrot.lane.b32.xlu1 %v3765_v2, %s6424_s12  ;;  %v3766_v63 = vadd.f32 %v7908_v22, %v3721_v8  ;;  %v3736_v41 = vadd.f32 %v6024_v45, %v3499_v56  ;;  %v3780_v9 = vadd.f32 %v7906_v15, %v3735_v60  ;;  %v8957_v2 = vld [vmem:[#allocation35_spill] sm:$0xff] }
 0x7e6   : > { %v3705_v46 = vpop.f32.mrf.mxu1 }
 0x7e7   : > { %3832 = vrot.lane.b32.xlu0 %v3777_v38, %s6424_s12  ;;  %v3781_v3 = vadd.f32 %v7906_v15, %v3736_v41  ;;  %v3726_v13 = vadd.f32 %v3705_v46, %v3491_v23  ;;  %v8962_v41 = vld [vmem:[#allocation19_spill] sm:$0xff] }
 0x7e9   : > { %3826 = vrot.lane.b32.xlu1 %v3774_v47, %s6424_s12  ;;  %v3771_v53 = vadd.f32 %v7915_v37, %v3726_v13 }
 0x7eb   : > { %3830 = vrot.lane.b32.xlu0 %v3776_v52, %s6424_s12  ;;  %v8958_v52 = vld [vmem:[#allocation18_spill] sm:$0xff] }
 0x7ed   : > { %3834 = vrot.lane.b32.xlu1 %v3778_v40, %s6424_s12 }
 0x7ef   : > { %3836 = vrot.lane.b32.xlu0 %v3779_v12, %s6424_s12  ;;  %v8960_v12 = vld [vmem:[#allocation22_spill] sm:$0xff] }
 0x7f1   : > { %3828 = vrot.lane.b32.xlu1 %v3775_v20, %s6424_s12 }
 0x7f3   : > { %3810 = vrot.lane.b32.xlu0 %v3766_v63, %s6424_s12 }
 0x7f5   : > { %3838 = vrot.lane.b32.xlu1 %v3780_v9, %s6424_s12 }
 0x7f7   : > { %3840 = vrot.lane.b32.xlu0 %v3781_v3, %s6424_s12 }
 0x7f9   : > { %3818 = vrot.lane.b32.xlu1 %v3770_v4, %s6424_s12 }
 0x7fb   : > { %3820 = vrot.lane.b32.xlu0 %v3771_v53, %s6424_s12  ;;  %s6287_s12 = scalar_lea.vmem %s6286_s11, 4096 }
 0x847   : > { %v3803_v31 = vpop.permute.xlu1 %3802 }
 0x848   : > { %v3879_v22 = vsel %vm6967_vm9, %v3803_v31, 0.0 }
 0x849   : > { %v3805_v21 = vpop.permute.xlu0 %3804  ;;  %v7979_v57 = vadd.f32 %v3879_v22, %v7287_v11 }
 0x84a   : > { %v3843_v15 = vsel %vm3842_vm15, %v3803_v31, %v3805_v21 }
 0x84b   : > { %v3880_v51 = vsel %vm6991_vm2, %v3843_v15, 0.0  ;;  %v3807_v26 = vpop.permute.xlu1 %3806  ;;  %v3939_v58 = vmul.f32 0.1, %v7979_v57  ;;  %vm3919_vm0 = vcmp.ge.f32.partialorder %v7979_v57, 0.0 }
 0x84c   : > { %v3844_v37 = vsel %vm3842_vm15, %v3805_v21, %v3807_v26  ;;  %v7985_v34 = vadd.f32 %v3880_v51, %v7293_v0  ;;  %v8964_v21 = vld [vmem:[#allocation16_spill] sm:$0xff] }
 0x84d   : > { %v3813_v50 = vpop.permute.xlu0 %3812  ;;  %v3881_v33 = vsel %vm6981_vm1, %v3844_v37, 0.0  ;;  %v3959_v38 = vsel %vm3919_vm0, %v7979_v57, %v3939_v58  ;;  %v8966_v51 = vld [vmem:[#allocation20_spill] sm:$0xff] }
 0x84e   : > { %v3884_v42 = vsel %vm6967_vm9, %v3813_v50, 0.0  ;;  %v3940_v39 = vmul.f32 0.1, %v7985_v34  ;;  %v8006_v61 = vadd.f32 %v3881_v33, %v8957_v2  ;;  %vm3920_vm4 = vcmp.ge.f32.partialorder %v7985_v34, 0.0 }
 0x84f   : > { %v7991_v14 = vadd.f32 %v3884_v42, %v8953_v55  ;;  %v3815_v11 = vpop.permute.xlu1 %3814 }
 0x850   : > { %v3847_v27 = vsel %vm3842_vm15, %v3813_v50, %v3815_v11  ;;  %v3960_v54 = vsel %vm3920_vm4, %v7985_v34, %v3940_v39  ;;  %v3941_v18 = vmul.f32 0.1, %v8006_v61  ;;  %vm3921_vm10 = vcmp.ge.f32.partialorder %v8006_v61, 0.0  ;;  %v8970_v39 = vld [vmem:[#allocation17_spill] sm:$0xff] }
 0x851   : > { %8954 = vst [vmem:[#allocation28_spill] sm:$0xff] %v7991_v14  ;;  %v3944_v5 = vmul.f32 0.1, %v7991_v14  ;;  %v3885_v0 = vsel %vm6991_vm2, %v3847_v27, 0.0  ;;  %v3825_v1 = vpop.permute.xlu0 %3824  ;;  %vm3924_vm14 = vcmp.ge.f32.partialorder %v7991_v14, 0.0 }
 0x852   : > { %v8002_v43 = vadd.f32 %v3885_v0, %v8955_v10  ;;  %v3961_v44 = vsel %vm3921_vm10, %v8006_v61, %v3941_v18 }
 0x853   : > { %v3823_v35 = vpop.permute.xlu1 %3822  ;;  %v3964_v29 = vsel %vm3924_vm14, %v7991_v14, %v3944_v5  ;;  %v8968_v5 = vld [vmem:[#allocation32_spill] sm:$0xff] }
 0x854   : > { %8956 = vst [vmem:[#allocation30_spill] sm:$0xff] %v8002_v43  ;;  %v3889_v30 = vsel %vm6967_vm9, %v3823_v35, 0.0  ;;  %v8013_v19 = vpack.c.bf16 %v3964_v29, %v3959_v38  ;;  %vm3925_vm8 = vcmp.ge.f32.partialorder %v8002_v43, 0.0  ;;  %v3945_v59 = vmul.f32 0.1, %v8002_v43 }
 0x855   : > { %v8016_v47 = vpop.permute.xlu0 %3816  ;;  %v8025_v24 = vadd.f32 %v3889_v30, %v8958_v52  ;;  %v3851_v7 = vsel %vm3842_vm15, %v3823_v35, %v3825_v1  ;;  %v8972_v30 = vld [vmem:[#allocation27_spill] sm:$0xff] }
 0x856   : > { %v3848_v6 = vsel %vm3842_vm15, %v3815_v11, %v8016_v47  ;;  %4019 = vrot.lane.b32.xlu0 %v8013_v19, %s6425_s27  ;;  %v3965_v49 = vsel %vm3925_vm8, %v8002_v43, %v3945_v59  ;;  %v3890_v36 = vsel %vm6991_vm2, %v3851_v7, 0.0  ;;  %v8974_v7 = vld [vmem:[#allocation21_spill] sm:$0xff] }
 0x857   : > { %8959 = vst [vmem:[#allocation33_spill] sm:$0xff] %v8025_v24  ;;  %v3886_v48 = vsel %vm6981_vm1, %v3848_v6, 0.0  ;;  %v3809_v40 = vpop.permute.xlu1 %3808  ;;  %v8035_v45 = vpack.c.bf16 %v3965_v49, %v3960_v54  ;;  %v3949_v63 = vmul.f32 0.1, %v8025_v24  ;;  %vm3929_vm11 = vcmp.ge.f32.partialorder %v8025_v24, 0.0 }
 0x858   : > { %v8033_v8 = vadd.f32 %v3886_v48, %v8960_v12  ;;  %v3845_v9 = vsel %vm3842_vm15, %v3807_v26, %v3809_v40  ;;  %v8062_v15 = vadd.f32 %v3890_v36, %v8964_v21 }
 0x859   : > { %v3833_v56 = vpop.permute.xlu0 %3832  ;;  %v3969_v50 = vsel %vm3929_vm11, %v8025_v24, %v3949_v63  ;;  %v3882_v58 = vsel %vm7031_vm7, %v3845_v9, 0.0 }
 0x85a   : > { %8961 = vst [vmem:[#allocation34_spill] sm:$0xff] %v8033_v8  ;;  %v3894_v20 = vsel %vm6967_vm9, %v3833_v56, 0.0  ;;  %4021 = vrot.lane.b32.xlu0 %v8035_v45, %s6425_s27  ;;  %vm3926_vm12 = vcmp.ge.f32.partialorder %v8033_v8, 0.0  ;;  %v3946_v60 = vmul.f32 0.1, %v8033_v8  ;;  %8965 = vst [vmem:[#allocation18_spill] sm:$0xff] %v8062_v15  ;;  %v8084_v2 = vadd.f32 %v3882_v58, %v8970_v39 }
 0x85b   : > { %v8048_v46 = vadd.f32 %v3894_v20, %v8962_v41  ;;  %v3827_v23 = vpop.permute.xlu1 %3826  ;;  %v3950_v10 = vmul.f32 0.1, %v8062_v15  ;;  %vm3930_vm0 = vcmp.ge.f32.partialorder %v8062_v15, 0.0 }
 0x85c   : > { %v3852_v3 = vsel %vm3842_vm15, %v3825_v1, %v3827_v23  ;;  %v3966_v13 = vsel %vm3926_vm12, %v8033_v8, %v3946_v60  ;;  %8971 = vst [vmem:[#allocation16_spill] sm:$0xff] %v8084_v2  ;;  %v8976_v60 = vld [vmem:[#allocation31_spill] sm:$0xff]  ;;  %vm3922_vm11 = vcmp.ge.f32.partialorder %v8084_v2, 0.0 }
 0x85d   : > { %8963 = vst [vmem:[#allocation35_spill] sm:$0xff] %v8048_v46  ;;  %v3954_v4 = vmul.f32 0.1, %v8048_v46  ;;  %v3891_v53 = vsel %vm6981_vm1, %v3852_v3, 0.0  ;;  %v3831_v31 = vpop.permute.xlu0 %3830  ;;  %v8058_v22 = vpack.c.bf16 %v3966_v13, %v3961_v44  ;;  %vm3934_vm13 = vcmp.ge.f32.partialorder %v8048_v46, 0.0  ;;  %v8978_v13 = vld [vmem:[#allocation23_spill] sm:$0xff] }
 0x85e   : > { %v8065_v26 = vadd.f32 %v3891_v53, %v8966_v51  ;;  %v3970_v20 = vsel %vm3930_vm0, %v8062_v15, %v3950_v10 }
 0x85f   : > { %4023 = vrot.lane.b32.xlu1 %v8058_v22, %s6425_s27  ;;  %v3835_v37 = vpop.permute.xlu1 %3834  ;;  %v3974_v42 = vsel %vm3934_vm13, %v8048_v46, %v3954_v4 }
 0x860   : > { %8967 = vst [vmem:[#allocation22_spill] sm:$0xff] %v8065_v26  ;;  %v3855_v55 = vsel %vm3842_vm15, %v3833_v56, %v3835_v37  ;;  %v8074_v11 = vpack.c.bf16 %v3974_v42, %v3969_v50  ;;  %v3951_v29 = vmul.f32 0.1, %v8065_v26  ;;  %vm3931_vm4 = vcmp.ge.f32.partialorder %v8065_v26, 0.0 }
 0x861   : > { %v3895_v33 = vsel %vm6991_vm2, %v3855_v55, 0.0  ;;  %v3837_v27 = vpop.permute.xlu0 %3836 }
 0x862   : > { %v8079_v0 = vadd.f32 %v3895_v33, %v8968_v5  ;;  %v3856_v1 = vsel %vm3842_vm15, %v3835_v37, %v3837_v27  ;;  %v8980_v37 = vld [vmem:[#allocation25_spill] sm:$0xff] }
 0x863   : > { %v3896_v35 = vsel %vm6981_vm1, %v3856_v1, 0.0  ;;  %4029 = vrot.lane.b32.xlu1 %v8074_v11, %s6425_s27  ;;  %v3829_v38 = vpop.permute.xlu1 %3828  ;;  %v8982_v5 = vld [vmem:[#allocation29_spill] sm:$0xff] }
 0x864   : > { %8969 = vst [vmem:[#allocation19_spill] sm:$0xff] %v8079_v0  ;;  %v8093_v59 = vadd.f32 %v3896_v35, %v8972_v30  ;;  %v3853_v6 = vsel %vm3842_vm15, %v3827_v23, %v3829_v38  ;;  %v3854_v54 = vsel %vm3842_vm15, %v3829_v38, %v3831_v31  ;;  %vm3935_vm14 = vcmp.ge.f32.partialorder %v8079_v0, 0.0 }
 0x865   : > { %v3892_v52 = vsel %vm7031_vm7, %v3853_v6, 0.0  ;;  %v3893_v48 = vsel %vm7024_vm3, %v3854_v54, 0.0  ;;  %v3811_v49 = vpop.permute.xlu0 %3810  ;;  %v3955_v18 = vmul.f32 0.1, %v8079_v0  ;;  %v3942_v6 = vmul.f32 0.1, %v8084_v2 }
 0x866   : > { %8973 = vst [vmem:[#allocation20_spill] sm:$0xff] %v8093_v59  ;;  %v8105_v12 = vadd.f32 %v3892_v52, %v8974_v7  ;;  %v3846_v56 = vsel %vm3842_vm15, %v3809_v40, %v3811_v49  ;;  %vm3936_vm8 = vcmp.ge.f32.partialorder %v8093_v59, 0.0  ;;  %v8111_v36 = vadd.f32 %v3893_v48, %v8976_v60  ;;  %v8984_v52 = vld [vmem:[#allocation24_spill] sm:$0xff] }
 0x867   : > { %v3883_v63 = vsel %vm7024_vm3, %v3846_v56, 0.0  ;;  %v3839_v41 = vpop.permute.xlu1 %3838  ;;  %v3975_v23 = vsel %vm3935_vm14, %v8079_v0, %v3955_v18  ;;  %v3956_v44 = vmul.f32 0.1, %v8093_v59  ;;  %v3971_v40 = vsel %vm3931_vm4, %v8065_v26, %v3951_v29 }
 0x868   : > { %8975 = vst [vmem:[#allocation32_spill] sm:$0xff] %v8105_v12  ;;  %8977 = vst [vmem:[#allocation17_spill] sm:$0xff] %v8111_v36  ;;  %v3857_v9 = vsel %vm3842_vm15, %v3837_v27, %v3839_v41  ;;  %v8118_v3 = vpack.c.bf16 %v3975_v23, %v3970_v20  ;;  %v8122_v4 = vadd.f32 %v3883_v63, %v8978_v13  ;;  %v3952_v51 = vmul.f32 0.1, %v8105_v12  ;;  %v8986_v20 = vld [vmem:[#allocation26_spill] sm:$0xff] }
 0x869   : > { %v3897_v53 = vsel %vm7031_vm7, %v3857_v9, 0.0  ;;  %v3841_v31 = vpop.permute.xlu0 %3840  ;;  %v3976_v21 = vsel %vm3936_vm8, %v8093_v59, %v3956_v44  ;;  %vm3932_vm10 = vcmp.ge.f32.partialorder %v8105_v12, 0.0  ;;  %vm3933_vm12 = vcmp.ge.f32.partialorder %v8111_v36, 0.0 }
 0x86a   : > { %8979 = vst [vmem:[#allocation27_spill] sm:$0xff] %v8122_v4  ;;  %v8129_v50 = vadd.f32 %v3897_v53, %v8980_v37  ;;  %v3858_v42 = vsel %vm3842_vm15, %v3839_v41, %v3841_v31  ;;  %4031 = vrot.lane.b32.xlu1 %v8118_v3, %s6425_s27  ;;  %v3986_v58 = vpack.c.bf16 %v3976_v21, %v3971_v40  ;;  %v3953_v27 = vmul.f32 0.1, %v8111_v36 }
 0x86b   : > { %v3898_v55 = vsel %vm7024_vm3, %v3858_v42, 0.0  ;;  %v3819_v33 = vpop.permute.xlu1 %3818  ;;  %v3943_v35 = vmul.f32 0.1, %v8122_v4  ;;  %v3972_v30 = vsel %vm3932_vm10, %v8105_v12, %v3952_v51  ;;  %v3962_v9 = vsel %vm3922_vm11, %v8084_v2, %v3942_v6  ;;  %v5839_v51 = vld [vmem:[%s8798_s2 + $0x90] sm:$0xff] }
 0x86c   : > { %8981 = vst [vmem:[#allocation21_spill] sm:$0xff] %v8129_v50  ;;  %v8141_v1 = vadd.f32 %v3898_v55, %v8982_v5  ;;  %4033 = vrot.lane.b32.xlu0 %v3986_v58, %s6425_s27  ;;  %v3849_v10 = vsel %vm3842_vm15, %v8016_v47, %v3819_v33  ;;  %vm3937_vm13 = vcmp.ge.f32.partialorder %v8129_v50, 0.0  ;;  %v3957_v39 = vmul.f32 0.1, %v8129_v50 }
 0x86d   : > { %v3887_v38 = vsel %vm7031_vm7, %v3849_v10, 0.0  ;;  %v3821_v29 = vpop.permute.xlu0 %3820  ;;  %v3973_v56 = vsel %vm3933_vm12, %v8111_v36, %v3953_v27  ;;  %vm4039_vm8 = vcmask 957440   ;;  %vm4463_vm10 = vcmask 916480  }
 0x86e   : > { %8983 = vst [vmem:[#allocation31_spill] sm:$0xff] %v8141_v1  ;;  %v3958_v54 = vmul.f32 0.1, %v8141_v1  ;;  %v8155_v48 = vadd.f32 %v3887_v38, %v8984_v52  ;;  %v3850_v47 = vsel %vm3842_vm15, %v3819_v33, %v3821_v29  ;;  %v3977_v49 = vsel %vm3937_vm13, %v8129_v50, %v3957_v39 }
 0x86f   : > { %v3888_v18 = vsel %vm7024_vm3, %v3850_v47, 0.0  ;;  %v3987_v7 = vpack.c.bf16 %v3977_v49, %v3972_v30  ;;  %vm3938_vm0 = vcmp.ge.f32.partialorder %v8141_v1, 0.0  ;;  %vm3923_vm15 = vcmp.ge.f32.partialorder %v8122_v4, 0.0 }
 0x870   : > { %8985 = vst [vmem:[#allocation23_spill] sm:$0xff] %v8155_v48  ;;  %v8166_v60 = vadd.f32 %v3888_v18, %v8986_v20  ;;  %v3978_v63 = vsel %vm3938_vm0, %v8141_v1, %v3958_v54  ;;  %vm3927_vm14 = vcmp.ge.f32.partialorder %v8155_v48, 0.0  ;;  %v3947_v41 = vmul.f32 0.1, %v8155_v48  ;;  %v6216_v18 = vld [vmem:[#allocation5 + $0xd8] sm:$0xff]  }
 0x871   : > { %4035 = vrot.lane.b32.xlu1 %v3987_v7, %s6425_s27  ;;  %v3988_v23 = vpack.c.bf16 %v3978_v63, %v3973_v56  ;;  %v3963_v53 = vsel %vm3923_vm15, %v8122_v4, %v3943_v35  ;;  %v6215_v35 = vld [vmem:[#allocation5 + $0xd0] sm:$0xff]  }
 0x872   : > { %8987 = vst [vmem:[#allocation25_spill] sm:$0xff] %v8166_v60  ;;  %v3948_v44 = vmul.f32 0.1, %v8166_v60  ;;  %v3967_v40 = vsel %vm3927_vm14, %v8155_v48, %v3947_v41  ;;  %vm3928_vm4 = vcmp.ge.f32.partialorder %v8166_v60, 0.0 }
 0x873   : > { %4037 = vrot.lane.b32.xlu0 %v3988_v23, %s6425_s27  ;;  %v3982_v13 = vpack.c.bf16 %v3967_v40, %v3962_v9 }
 0x874   : > { %v3968_v31 = vsel %vm3928_vm4, %v8166_v60, %v3948_v44 }
 0x875   : > { %4025 = vrot.lane.b32.xlu1 %v3982_v13, %s6425_s27  ;;  %v3983_v21 = vpack.c.bf16 %v3968_v31, %v3963_v53 }
 0x877   : > { %4027 = vrot.lane.b32.xlu0 %v3983_v21, %s6425_s27 }
 0x879   : > { %4241 = vrot.lane.b32.xlu1 %v8118_v3, %s6422_s29 }
 0x87b   : > { %4243 = vrot.lane.b32.xlu0 %v3986_v58, %s6422_s29 }
 0x87d   : > { %4239 = vrot.lane.b32.xlu1 %v8074_v11, %s6422_s29 }
 0x87f   : > { %4245 = vrot.lane.b32.xlu0 %v3987_v7, %s6422_s29 }
 0x881   : > { %4247 = vrot.lane.b32.xlu1 %v3988_v23, %s6422_s29 }
 0x883   : > { %4231 = vrot.lane.b32.xlu0 %v8035_v45, %s6422_s29 }
 0x885   : > { %4233 = vrot.lane.b32.xlu1 %v8058_v22, %s6422_s29 }
 0x887   : > { %4229 = vrot.lane.b32.xlu0 %v8013_v19, %s6422_s29 }
 0x889   : > { %4235 = vrot.lane.b32.xlu1 %v3982_v13, %s6422_s29 }
 0x88b   : > { %4237 = vrot.lane.b32.xlu0 %v3983_v21, %s6422_s29  ;;  %s5865_s29 = sshll.u32 %s6393_s19, 5  ;;  %s5594_s19 = sshll.u32 %s8661_s8, 4  ;;  %s8721_s19 = int_to_ptr.vmem [resolvable:$true] %s5594_s19 }
 0x88c   : > { %s5591_s18 = sadd.s32 %s5865_s29, %s5864_s3  ;;  %s6281_s26 = scalar_lea.vmem %s8721_s19, 2048 }
 0x88d   : > { %4455 = vrot.lane.b32.xlu1 %v8118_v3, %s6426_s4  ;;  %v5840_v3 = vld [vmem:[%s8798_s2 + $0x98] sm:$0xff]  ;;  %s5866_s30 = sshll.u32 %s5591_s18, 7  ;;  %p6282_p1 = scmp.ne.s32.totalorder %s8721_s19, %s6281_s26 }
 0x88e   : > { %p6288_p13 = scmp.lt.s32.totalorder %s8721_s19, %s6286_s11  ;;  %p6289_p5 = scmp.lt.s32.totalorder %s6287_s12, %s6281_s26 }
 0x88f   : > { %4457 = vrot.lane.b32.xlu0 %v3986_v58, %s6426_s4  ;;  %p6283_p11 = pnand %p6282_p1, %p9007_p3 }
 0x890   : > { %p6290_p6 = por %p6289_p5, %p6288_p13 }
 0x891   : > { %4453 = vrot.lane.b32.xlu1 %v8074_v11, %s6426_s4  ;;  %p6284_p0 = pneg %p6283_p11 }
 0x893   : > { %4445 = vrot.lane.b32.xlu0 %v8035_v45, %s6426_s4  ;;  %v5837_v45 = vld [vmem:[%s8798_s2 + $0x80] sm:$0xff]  ;;  %p6291_p8 = pnand %p6290_p6, %p6284_p0 }
 0x895   : > { %4447 = vrot.lane.b32.xlu1 %v8058_v22, %s6426_s4 }
 0x897   : > { %4443 = vrot.lane.b32.xlu0 %v8013_v19, %s6426_s4  ;;  %v5838_v19 = vld [vmem:[%s8798_s2 + $0x88] sm:$0xff] }
 0x899   : > { %4459 = vrot.lane.b32.xlu1 %v3987_v7, %s6426_s4 }
 0x89b   : > { %4461 = vrot.lane.b32.xlu0 %v3988_v23, %s6426_s4 }
 0x89d   : > { %4449 = vrot.lane.b32.xlu1 %v3982_v13, %s6426_s4 }
 0x89f   : > { %4451 = vrot.lane.b32.xlu0 %v3983_v21, %s6426_s4 }
 0x8a1   : > { %4680 = vperm.xlu1 %6190, %v5839_v51  }
 0x8a3   : > { %4685 = vperm.xlu0 %6189, %v5840_v3   ;;  %v6217_v3 = vld [vmem:[#allocation5 + $0xc0] sm:$0xff]  }
 0x8a5   : > { %4670 = vperm.xlu1 %6190, %v5837_v45  }
 0x8a7   : > { %4675 = vperm.xlu0 %6189, %v5838_v19  }
 0x8c8   : > { %v4020_v11 = vpop.permute.xlu0 %4019 }
 0x8cc   : > { %v4022_v42 = vpop.permute.xlu0 %4021 }
 0x8cd   : > { %v4040_v39 = vsel %vm4039_vm8, %v4020_v11, %v4022_v42 }
 0x8d1   : > { %v4024_v22 = vpop.permute.xlu1 %4023 }
 0x8d2   : > { %v4041_v5 = vsel %vm4039_vm8, %v4022_v42, %v4024_v22 }
 0x8d5   : > { %v4030_v37 = vpop.permute.xlu1 %4029 }
 0x8dc   : > { %v4032_v58 = vpop.permute.xlu1 %4031 }
 0x8dd   : > { %v4044_v27 = vsel %vm4039_vm8, %v4030_v37, %v4032_v58 }
 0x8de   : > { %v4034_v55 = vpop.permute.xlu0 %4033 }
 0x8df   : > { %v4045_v33 = vsel %vm4039_vm8, %v4032_v58, %v4034_v55 }
 0x8e0   : > { %4076 = vmatprep.subr.bf16.mxu0 %v4045_v33 }
 0x8e1   : > { %4077 = vmatpush1.bf16.msra.mxu0 %v4044_v27 }
 0x8e2   : > { %4078 = vmatprep.subr.bf16.mxu0 %v4041_v5 }
 0x8e3   : > { %v4036_v10 = vpop.permute.xlu1 %4035 }
 0x8e4   : > { %v4046_v6 = vsel %vm4039_vm8, %v4034_v55, %v4036_v10  ;;  %v6218_v55 = vld [vmem:[#allocation5 + $0xc8] sm:$0xff]  }
 0x8e5   : > { %4079 = vmatpush1.bf16.msra.mxu0 %v4040_v39  ;;  %v4038_v38 = vpop.permute.xlu0 %4037 }
 0x8e6   : > { %6025 = vmatprep.subr.bf16.mxu0 %v4038_v38  ;;  %v4047_v29 = vsel %vm4039_vm8, %v4036_v10, %v4038_v38 }
 0x8e7   : > { %4129 = vmatprep.subr.bf16.mxu1 %v4047_v29  ;;  %v4026_v30 = vpop.permute.xlu1 %4025 }
 0x8e8   : > { %5815 = vmatmul.mubr.msk.bf16.vlgmr.msra.gmra.mxu0 %vm423_vm5, %v6215_v35  ;;  %4130 = vmatpush1.bf16.msra.mxu1 %v4046_v6  ;;  %v4042_v49 = vsel %vm4039_vm8, %v4024_v22, %v4026_v30 }
 0x8e9   : > { %6026 = vmatpush3.bf16.msra.mxu0 %v4038_v38  ;;  %v4028_v54 = vpop.permute.xlu0 %4027  ;;  %4106 = vmatprep.mubr.bf16.mxu0 %v8952_v62 }
 0x8ea   : > { %6027 = vmatprep.subr.bf16.mxu0 %v4028_v54  ;;  %v4043_v52 = vsel %vm4039_vm8, %v4026_v30, %v4028_v54 }
 0x8eb   : > { %4131 = vmatprep.subr.bf16.mxu1 %v4043_v52  ;;  %v4242_v47 = vpop.permute.xlu1 %4241 }
 0x8ec   : > { %4132 = vmatpush1.bf16.msra.mxu1 %v4042_v49 }
 0x8ed   : > { %6028 = vmatpush3.bf16.msra.mxu0 %v4028_v54  ;;  %v4244_v7 = vpop.permute.xlu0 %4243  ;;  %v6219_v54 = vld [vmem:[#allocation5 + $0xe0] sm:$0xff]  }
 0x8ee   : > { %v4254_v56 = vsel %vm3113_vm6, %v4242_v47, %v4244_v7 }
 0x8ef   : > { %5817 = vmatmul.mubr.msk.bf16.vlgmr.msra.gmra.mxu1 %vm423_vm5, %v6215_v35  ;;  %4285 = vmatprep.subr.bf16.mxu1 %v4254_v56  ;;  %v4240_v20 = vpop.permute.xlu1 %4239 }
 0x8f0   : > { %5816 = vmatmul.mubr.msk.bf16.gmra.mxu0 %vm423_vm5, %v6216_v18  ;;  %v4253_v63 = vsel %vm3113_vm6, %v4240_v20, %v4242_v47  ;;  %4159 = vmatprep.mubr.bf16.mxu1 %v8952_v62 }
 0x8f1   : > { %v4246_v41 = vpop.permute.xlu0 %4245  ;;  %4286 = vmatpush1.bf16.msra.mxu1 %v4253_v63  ;;  %6029 = vmatprep.mubr.msk.bf16.mxu0 %vm423_vm5, %v6215_v35 }
 0x8f2   : > { %v4255_v13 = vsel %vm3113_vm6, %v4244_v7, %v4246_v41  ;;  %v6220_v7 = vld [vmem:[#allocation5 + $0xe8] sm:$0xff]  }
 0x8f3   : > { %v4248_v23 = vpop.permute.xlu1 %4247 }
 0x8f4   : > { %v4256_v44 = vsel %vm3113_vm6, %v4246_v41, %v4248_v23 }
 0x8f5   : > { %v4232_v9 = vpop.permute.xlu0 %4231  ;;  %4338 = vmatprep.subr.bf16.mxu0 %v4256_v44 }
 0x8f7   : > { %5818 = vmatmul.mubr.msk.bf16.gmra.mxu1 %vm423_vm5, %v6216_v18  ;;  %v4234_v40 = vpop.permute.xlu1 %4233 }
 0x8f8   : > { %6030 = vmatmul.mubr.msk.bf16.vlgmr.msra.gmra.mxu0 %vm423_vm5, %v6216_v18  ;;  %v4250_v53 = vsel %vm3113_vm6, %v4232_v9, %v4234_v40  ;;  %4305 = vmatprep.mubr.bf16.mxu1 %v8952_v62 }
 0x8f9   : > { %4339 = vmatpush1.bf16.msra.mxu0 %v4255_v13  ;;  %v4230_v31 = vpop.permute.xlu0 %4229  ;;  %4287 = vmatprep.subr.bf16.mxu1 %v4250_v53 }
 0x8fa   : > { %v4249_v21 = vsel %vm3113_vm6, %v4230_v31, %v4232_v9  ;;  %4358 = vmatprep.mubr.bf16.mxu0 %v8952_v62 }
 0x8fb   : > { %4288 = vmatpush1.bf16.msra.mxu1 %v4249_v21  ;;  %v4236_v51 = vpop.permute.xlu1 %4235 }
 0x8fc   : > { %6033 = vmatprep.subr.bf16.mxu1 %v4248_v23  ;;  %v4251_v22 = vsel %vm3113_vm6, %v4234_v40, %v4236_v51 }
 0x8fd   : > { %v4238_v45 = vpop.permute.xlu0 %4237 }
 0x8fe   : > { %v4252_v19 = vsel %vm3113_vm6, %v4236_v51, %v4238_v45  ;;  %vm4768_vm6 = vcmask 89088  }
 0x8ff   : > { %5823 = vmatmul.mubr.msk.bf16.vlgmr.msra.gmra.mxu1 %vm423_vm5, %v6217_v3  ;;  %4340 = vmatprep.subr.bf16.mxu0 %v4252_v19  ;;  %v4456_v11 = vpop.permute.xlu1 %4455 }
 0x900   : > { %6034 = vmatpush3.bf16.msra.mxu1 %v4248_v23  ;;  %4341 = vmatpush1.bf16.msra.mxu0 %v4251_v22 }
 0x901   : > { %6035 = vmatprep.subr.bf16.mxu1 %v4238_v45  ;;  %v4458_v37 = vpop.permute.xlu0 %4457  ;;  %4315 = vmatprep.mubr.bf16.mxu1 %v8952_v62 }
 0x902   : > { %v4469_v42 = vsel %vm4463_vm10, %v4456_v11, %v4458_v37 }
 0x903   : > { %5825 = vmatmul.mubr.msk.bf16.vlgmr.msra.gmra.mxu0 %vm423_vm5, %v6217_v3  ;;  %4500 = vmatprep.subr.bf16.mxu0 %v4469_v42  ;;  %v4454_v58 = vpop.permute.xlu1 %4453 }
 0x904   : > { %6036 = vmatpush3.bf16.msra.mxu1 %v4238_v45  ;;  %v4468_v33 = vsel %vm4463_vm10, %v4454_v58, %v4456_v11  ;;  %4368 = vmatprep.mubr.bf16.mxu0 %v8952_v62 }
 0x905   : > { %v4446_v27 = vpop.permute.xlu0 %4445  ;;  %4501 = vmatpush1.bf16.msra.mxu0 %v4468_v33 }
 0x907   : > { %5824 = vmatmul.mubr.msk.bf16.gmra.mxu1 %vm423_vm5, %v6218_v55  ;;  %v4448_v5 = vpop.permute.xlu1 %4447 }
 0x908   : > { %v4465_v10 = vsel %vm4463_vm10, %v4446_v27, %v4448_v5  ;;  %6037 = vmatprep.mubr.msk.bf16.mxu1 %vm423_vm5, %v6217_v3 }
 0x909   : > { %v4444_v39 = vpop.permute.xlu0 %4443  ;;  %4502 = vmatprep.subr.bf16.mxu0 %v4465_v10 }
 0x90a   : > { %v4464_v35 = vsel %vm4463_vm10, %v4444_v39, %v4446_v27 }
 0x90b   : > { %5826 = vmatmul.mubr.msk.bf16.gmra.mxu0 %vm423_vm5, %v6218_v55  ;;  %v4460_v38 = vpop.permute.xlu1 %4459 }
 0x90c   : > { %4503 = vmatpush1.bf16.msra.mxu0 %v4464_v35  ;;  %4520 = vmatprep.mubr.bf16.mxu0 %v8952_v62  ;;  %v4470_v6 = vsel %vm4463_vm10, %v4458_v37, %v4460_v38 }
 0x90d   : > { %v4462_v29 = vpop.permute.xlu0 %4461 }
 0x90e   : > { %6041 = vmatprep.subr.bf16.mxu0 %v4462_v29  ;;  %v4471_v30 = vsel %vm4463_vm10, %v4460_v38, %v4462_v29 }
 0x90f   : > { %6038 = vmatmul.mubr.msk.bf16.vlgmr.msra.gmra.mxu1 %vm423_vm5, %v6218_v55  ;;  %4553 = vmatprep.subr.bf16.mxu1 %v4471_v30  ;;  %v4450_v52 = vpop.permute.xlu1 %4449 }
 0x910   : > { %4554 = vmatpush1.bf16.msra.mxu1 %v4470_v6  ;;  %4573 = vmatprep.mubr.bf16.mxu1 %v8952_v62  ;;  %v4466_v18 = vsel %vm4463_vm10, %v4448_v5, %v4450_v52 }
 0x911   : > { %v4452_v47 = vpop.permute.xlu0 %4451 }
 0x912   : > { %v4467_v49 = vsel %vm4463_vm10, %v4450_v52, %v4452_v47 }
 0x913   : > { %5831 = vmatmul.mubr.msk.bf16.vlgmr.msra.gmra.mxu0 %vm423_vm5, %v6219_v54  ;;  %4555 = vmatprep.subr.bf16.mxu1 %v4467_v49 }
 0x914   : > { %6042 = vmatpush3.bf16.msra.mxu0 %v4462_v29  ;;  %4556 = vmatpush1.bf16.msra.mxu1 %v4466_v18 }
 0x915   : > { %6043 = vmatprep.subr.bf16.mxu0 %v4452_v47  ;;  %4530 = vmatprep.mubr.bf16.mxu0 %v8952_v62 }
 0x917   : > { %5833 = vmatmul.mubr.msk.bf16.vlgmr.msra.gmra.mxu1 %vm423_vm5, %v6219_v54 }
 0x918   : > { %6044 = vmatpush3.bf16.msra.mxu0 %v4452_v47  ;;  %4583 = vmatprep.mubr.bf16.mxu1 %v8952_v62 }
 0x91b   : > { %5832 = vmatmul.mubr.msk.bf16.gmra.mxu0 %vm423_vm5, %v6220_v7 }
 0x91c   : > { %6045 = vmatprep.mubr.msk.bf16.mxu0 %vm423_vm5, %v6219_v54  ;;  %v8302_v47 = vpop.permute.xlu1 %4680 }
 0x91e   : > { %v8318_v26 = vpop.permute.xlu0 %4685 }
 0x91f   : > { %5834 = vmatmul.mubr.msk.bf16.gmra.mxu1 %vm423_vm5, %v6220_v7 }
 0x920   : > { %5000 = vmatprep.mubr.bf16.mxu1 %v8952_v62  ;;  %v8314_v46 = vpop.permute.xlu1 %4670 }
 0x923   : > { %6046 = vmatmul.mubr.msk.bf16.vlgmr.msra.gmra.mxu0 %vm423_vm5, %v6220_v7 }
 0x924   : > { %5053 = vmatprep.mubr.bf16.mxu0 %v8952_v62 }
 0x9a8   : > { %v4098_v56 = vpop.f32.mrf.mxu0 }
 0x9aa   : > { %v4100_v20 = vpop.f32.mrf.mxu0 }
 0x9ac   : > { %v4102_v63 = vpop.f32.mrf.mxu0 }
 0x9ae   : > { %v4104_v41 = vpop.f32.mrf.mxu0 }
 0x9af   : > { %v4151_v23 = vpop.f32.mrf.mxu1 }
 0x9b0   : > { %v8270_v44 = vpop.f32.mrf.mxu0 }
 0x9b1   : > { %v4153_v9 = vpop.f32.mrf.mxu1 }
 0x9b2   : > { %v8272_v40 = vpop.f32.mrf.mxu0 }
 0x9b3   : > { %v8274_v13 = vpop.f32.mrf.mxu1 }
 0x9b4   : > { %v8276_v53 = vpop.f32.mrf.mxu0 }
 0x9b5   : > { %v8278_v31 = vpop.f32.mrf.mxu1 }
 0x9b6   : > { %v8280_v21 = vpop.f32.mrf.mxu0 }
 0x9b7   : > { %v8282_v51 = vpop.f32.mrf.mxu1 }
 0x9b8   : > { %v8284_v3 = vpop.f32.mrf.mxu0 }
 0x9b9   : > { %v8286_v45 = vpop.f32.mrf.mxu1 }
 0x9ba   : > { %v8288_v19 = vpop.f32.mrf.mxu0 }
 0x9bb   : > { %v8290_v22 = vpop.f32.mrf.mxu1 }
 0x9bc   : > { %v8294_v37 = vpop.f32.mrf.mxu0 }
 0x9bd   : > { %v8292_v11 = vpop.f32.mrf.mxu1 }
 0x9be   : > { %v8296_v58 = vpop.f32.mrf.mxu0 }
 0x9bf   : > { %v4307_v42 = vpop.f32.mrf.mxu1 }
 0x9c0   : > { %v4308_v1 = vadd.f32 %v4307_v42, %v4098_v56 }
 0x9c1   : > { %v4309_v55 = vpop.f32.mrf.mxu1 }
 0x9c2   : > { %v4310_v0 = vadd.f32 %v4309_v55, %v4100_v20 }
 0x9c3   : > { %v4311_v33 = vpop.f32.mrf.mxu1  ;;  %v4360_v27 = vpop.f32.mrf.mxu0 }
 0x9c4   : > { %v4361_v60 = vadd.f32 %v4360_v27, %v4151_v23  ;;  %v4312_v20 = vadd.f32 %v4311_v33, %v4102_v63 }
 0x9c5   : > { %v4313_v5 = vpop.f32.mrf.mxu1  ;;  %v4362_v10 = vpop.f32.mrf.mxu0 }
 0x9c6   : > { %v4314_v43 = vadd.f32 %v4313_v5, %v4104_v41  ;;  %v4363_v56 = vadd.f32 %v4362_v10, %v4153_v9 }
 0x9c7   : > { %v4317_v39 = vpop.f32.mrf.mxu1  ;;  %v4364_v35 = vpop.f32.mrf.mxu0 }
 0x9c8   : > { %v4318_v41 = vadd.f32 %v4317_v39, %v8270_v44  ;;  %v4365_v63 = vadd.f32 %v4364_v35, %v8274_v13 }
 0x9c9   : > { %v4319_v38 = vpop.f32.mrf.mxu1  ;;  %v8298_v29 = vpop.f32.mrf.mxu0 }
 0x9ca   : > { %v4320_v5 = vadd.f32 %v4319_v38, %v8272_v40 }
 0x9cb   : > { %v8300_v30 = vpop.f32.mrf.mxu1  ;;  %v4370_v6 = vpop.f32.mrf.mxu0 }
 0x9cc   : > { %v4371_v27 = vadd.f32 %v4370_v6, %v8282_v51 }
 0x9cd   : > { %v4323_v54 = vpop.f32.mrf.mxu1  ;;  %v4372_v52 = vpop.f32.mrf.mxu0 }
 0x9ce   : > { %v4324_v35 = vadd.f32 %v4323_v54, %v8280_v21  ;;  %v4373_v51 = vadd.f32 %v4372_v52, %v8286_v45  ;;  %v4322_v54 = vadd.f32 %v8300_v30, %v8276_v53 }
 0x9cf   : > { %v8304_v49 = vpop.f32.mrf.mxu0  ;;  %v8306_v18 = vpop.f32.mrf.mxu1 }
 0x9d1   : > { %v8308_v7 = vpop.f32.mrf.mxu0  ;;  %v8310_v62 = vpop.f32.mrf.mxu1 }
 0x9d3   : > { %v8312_v59 = vpop.f32.mrf.mxu1  ;;  %v4522_v50 = vpop.f32.mrf.mxu0 }
 0x9d4   : > { %v4643_v12 = vadd.f32 %v4522_v50, %v4308_v1 }
 0x9d5   : > { %v8316_v36 = vpop.f32.mrf.mxu1  ;;  %v4524_v15 = vpop.f32.mrf.mxu0 }
 0x9d6   : > { %v4688_v24 = vadd.f32 %v8314_v46, %v4643_v12  ;;  %v4644_v8 = vadd.f32 %v4524_v15, %v4310_v0  ;;  %v8325_v12 = vpop.permute.xlu0 %4675 }
 0x9d7   : > { %v4526_v48 = vpop.f32.mrf.mxu0  ;;  %v4575_v14 = vpop.f32.mrf.mxu1 }
 0x9d8   : > { %v4689_v42 = vadd.f32 %v8314_v46, %v4644_v8  ;;  %v4645_v2 = vadd.f32 %v4575_v14, %v4361_v60  ;;  %4728 = vrot.lane.b32.xlu1 %v4688_v24, %s6427_s25  ;;  %v4648_v8 = vadd.f32 %v4526_v48, %v4312_v20 }
 0x9d9   : > { %v4528_v50 = vpop.f32.mrf.mxu0  ;;  %v4577_v1 = vpop.f32.mrf.mxu1 }
 0x9da   : > { %v4690_v55 = vadd.f32 %v8314_v46, %v4645_v2  ;;  %v4649_v4 = vadd.f32 %v4528_v50, %v4314_v43  ;;  %v4646_v23 = vadd.f32 %v4577_v1, %v4363_v56  ;;  %4730 = vrot.lane.b32.xlu0 %v4689_v42, %s6427_s25  ;;  %v4693_v44 = vadd.f32 %v8325_v12, %v4648_v8 }
 0x9db   : > { %v4532_v15 = vpop.f32.mrf.mxu0  ;;  %v4579_v0 = vpop.f32.mrf.mxu1  ;;  %v4422_v1 = vadd.f32 %v8306_v18, %v8284_v3 }
 0x9dc   : > { %v4691_v14 = vadd.f32 %v8314_v46, %v4646_v23  ;;  %4732 = vrot.lane.b32.xlu1 %v4690_v55, %s6427_s25  ;;  %v4694_v43 = vadd.f32 %v8325_v12, %v4649_v4  ;;  %v4653_v2 = vadd.f32 %v4532_v15, %v4318_v41  ;;  %v4650_v48 = vadd.f32 %v4579_v0, %v4365_v63 }
 0x9dd   : > { %v4534_v24 = vpop.f32.mrf.mxu0  ;;  %v4581_v60 = vpop.f32.mrf.mxu1  ;;  %v4377_v23 = vadd.f32 %v8308_v7, %v8292_v11  ;;  %v4375_v0 = vadd.f32 %v8304_v49, %v8290_v22  ;;  %v4414_v41 = vadd.f32 %v8310_v62, %v8288_v19  ;;  %v4417_v63 = vadd.f32 %v8316_v36, %v8296_v58 }
 0x9de   : > { %4734 = vrot.lane.b32.xlu0 %v4691_v14, %s6427_s25  ;;  %v4698_v10 = vadd.f32 %v8302_v47, %v4653_v2  ;;  %v4695_v56 = vadd.f32 %v8325_v12, %v4650_v48  ;;  %v4654_v42 = vadd.f32 %v4534_v24, %v4320_v5  ;;  %v4425_v14 = vadd.f32 %v8312_v59, %v8294_v37 }
 0x9df   : > { %v4536_v9 = vpop.f32.mrf.mxu0  ;;  %v4585_v33 = vpop.f32.mrf.mxu1 }
 0x9e0   : > { %4740 = vrot.lane.b32.xlu1 %v4694_v43, %s6427_s25  ;;  %v4655_v39 = vadd.f32 %v4585_v33, %v4371_v27  ;;  %v4699_v20 = vadd.f32 %v8302_v47, %v4654_v42  ;;  %v4658_v15 = vadd.f32 %v4536_v9, %v4322_v54 }
 0x9e1   : > { %v4538_v4 = vpop.f32.mrf.mxu0  ;;  %v4587_v13 = vpop.f32.mrf.mxu1 }
 0x9e2   : > { %4738 = vrot.lane.b32.xlu0 %v4693_v44, %s6427_s25  ;;  %v4700_v6 = vadd.f32 %v8302_v47, %v4655_v39  ;;  %v4659_v50 = vadd.f32 %v4538_v4, %v4324_v35  ;;  %v4656_v21 = vadd.f32 %v4587_v13, %v4373_v51  ;;  %v4703_v8 = vadd.f32 %v8318_v26, %v4658_v15 }
 0x9e3   : > { %v4589_v40 = vpop.f32.mrf.mxu1  ;;  %v6047_v38 = vpop.f32.mrf.mxu0 }
 0x9e4   : > { %4748 = vrot.lane.b32.xlu1 %v4698_v10, %s6427_s25  ;;  %v4704_v45 = vadd.f32 %v8318_v26, %v4659_v50  ;;  %v4657_v52 = vadd.f32 %v6047_v38, %v4422_v1  ;;  %v4701_v3 = vadd.f32 %v8302_v47, %v4656_v21  ;;  %v4660_v11 = vadd.f32 %v4589_v40, %v4375_v0 }
 0x9e5   : > { %v4591_v55 = vpop.f32.mrf.mxu1  ;;  %v4628_v18 = vpop.f32.mrf.mxu0 }
 0x9e6   : > { %4742 = vrot.lane.b32.xlu0 %v4695_v56, %s6427_s25  ;;  %v4702_v53 = vadd.f32 %v8302_v47, %v4657_v52  ;;  %v4661_v30 = vadd.f32 %v4591_v55, %v4377_v23  ;;  %v4647_v22 = vadd.f32 %v4628_v18, %v4414_v41  ;;  %v4367_v47 = vadd.f32 %v8298_v29, %v8278_v31 }
 0x9e7   : > { %v6048_v7 = vpop.f32.mrf.mxu0  ;;  %v4705_v49 = vadd.f32 %v8318_v26, %v4660_v11 }
 0x9e8   : > { %4752 = vrot.lane.b32.xlu1 %v4700_v6, %s6427_s25  ;;  %v4706_v24 = vadd.f32 %v8318_v26, %v4661_v30  ;;  %v4662_v62 = vadd.f32 %v6048_v7, %v4425_v14  ;;  %v4651_v43 = vadd.f32 %v4581_v60, %v4367_v47  ;;  %v4692_v59 = vadd.f32 %v8314_v46, %v4647_v22 }
 0x9e9   : > { %v4631_v19 = vpop.f32.mrf.mxu0 }
 0x9ea   : > { %4750 = vrot.lane.b32.xlu0 %v4699_v20, %s6427_s25  ;;  %v4707_v37 = vadd.f32 %v8318_v26, %v4662_v62  ;;  %v4652_v2 = vadd.f32 %v4631_v19, %v4417_v63  ;;  %v4696_v31 = vadd.f32 %v8325_v12, %v4651_v43 }
 0x9ec   : > { %4760 = vrot.lane.b32.xlu1 %v4704_v45, %s6427_s25  ;;  %v4697_v29 = vadd.f32 %v8325_v12, %v4652_v2 }
 0x9ee   : > { %4754 = vrot.lane.b32.xlu0 %v4701_v3, %s6427_s25 }
 0x9f0   : > { %4756 = vrot.lane.b32.xlu1 %v4702_v53, %s6427_s25 }
 0x9f2   : > { %4758 = vrot.lane.b32.xlu0 %v4703_v8, %s6427_s25 }
 0x9f4   : > { %4764 = vrot.lane.b32.xlu1 %v4706_v24, %s6427_s25 }
 0x9f6   : > { %4762 = vrot.lane.b32.xlu0 %v4705_v49, %s6427_s25 }
 0x9f8   : > { %4736 = vrot.lane.b32.xlu1 %v4692_v59, %s6427_s25 }
 0x9fa   : > { %4766 = vrot.lane.b32.xlu0 %v4707_v37, %s6427_s25 }
 0x9fc   : > { %4744 = vrot.lane.b32.xlu1 %v4696_v31, %s6427_s25 }
 0x9fe   : > { %4746 = vrot.lane.b32.xlu0 %v4697_v29, %s6427_s25 }
 0xa4a   : > { %v4729_v36 = vpop.permute.xlu1 %4728 }
 0xa4b   : > { %v4805_v26 = vsel %vm6967_vm9, %v4729_v36, 0.0 }
 0xa4c   : > { %v4731_v58 = vpop.permute.xlu0 %4730  ;;  %v4845_v44 = vmul.f32 0.1, %v4805_v26  ;;  %vm4825_vm12 = vcmp.ge.f32.partialorder %v4805_v26, 0.0 }
 0xa4d   : > { %v4769_v9 = vsel %vm4768_vm6, %v4729_v36, %v4731_v58 }
 0xa4e   : > { %v4733_v46 = vpop.permute.xlu1 %4732  ;;  %v4806_v48 = vsel %vm6991_vm2, %v4769_v9, 0.0  ;;  %v4865_v42 = vsel %vm4825_vm12, %v4805_v26, %v4845_v44 }
 0xa4f   : > { %v4770_v27 = vsel %vm4768_vm6, %v4731_v58, %v4733_v46  ;;  %v4846_v51 = vmul.f32 0.1, %v4806_v48  ;;  %vm4826_vm0 = vcmp.ge.f32.partialorder %v4806_v48, 0.0 }
 0xa50   : > { %v8384_v60 = vpop.permute.xlu0 %4734  ;;  %v4807_v39 = vsel %vm6981_vm1, %v4770_v27, 0.0 }
 0xa51   : > { %v4847_v40 = vmul.f32 0.1, %v4807_v39  ;;  %vm4827_vm14 = vcmp.ge.f32.partialorder %v4807_v39, 0.0  ;;  %v4866_v52 = vsel %vm4826_vm0, %v4806_v48, %v4846_v51  ;;  %v4771_v19 = vsel %vm4768_vm6, %v4733_v46, %v8384_v60 }
 0xa52   : > { %v4741_v33 = vpop.permute.xlu1 %4740  ;;  %v4808_v36 = vsel %vm7031_vm7, %v4771_v19, 0.0  ;;  %v5859_v19 = vld [vmem:[%s8798_s2 + $0xa0] sm:$0xff] }
 0xa53   : > { %v4867_v23 = vsel %vm4827_vm14, %v4807_v39, %v4847_v40 }
 0xa54   : > { %v4739_v12 = vpop.permute.xlu0 %4738 }
 0xa55   : > { %v4773_v5 = vsel %vm4768_vm6, %v4739_v12, %v4741_v33  ;;  %v4810_v10 = vsel %vm6967_vm9, %v4739_v12, 0.0  ;;  %v4848_v12 = vmul.f32 0.1, %v4808_v36 }
 0xa56   : > { %v4811_v4 = vsel %vm6991_vm2, %v4773_v5, 0.0  ;;  %vm4830_vm11 = vcmp.ge.f32.partialorder %v4810_v10, 0.0  ;;  %v4850_v13 = vmul.f32 0.1, %v4810_v10  ;;  %v4749_v35 = vpop.permute.xlu1 %4748 }
 0xa57   : > { %vm4831_vm13 = vcmp.ge.f32.partialorder %v4811_v4, 0.0  ;;  %v4851_v56 = vmul.f32 0.1, %v4811_v4  ;;  %v4815_v30 = vsel %vm6967_vm9, %v4749_v35, 0.0 }
 0xa58   : > { %v4870_v6 = vsel %vm4830_vm11, %v4810_v10, %v4850_v13  ;;  %v8399_v50 = vpop.permute.xlu0 %4742  ;;  %v4855_v7 = vmul.f32 0.1, %v4815_v30  ;;  %vm4835_vm4 = vcmp.ge.f32.partialorder %v4815_v30, 0.0 }
 0xa59   : > { %v8401_v38 = vpack.c.bf16 %v4870_v6, %v4865_v42  ;;  %v4774_v1 = vsel %vm4768_vm6, %v4741_v33, %v8399_v50  ;;  %v4871_v20 = vsel %vm4831_vm13, %v4811_v4, %v4851_v56 }
 0xa5a   : > { %v4812_v21 = vsel %vm6981_vm1, %v4774_v1, 0.0  ;;  %v4753_v54 = vpop.permute.xlu1 %4752  ;;  %v8409_v15 = vpack.c.bf16 %v4871_v20, %v4866_v52  ;;  %v4875_v59 = vsel %vm4835_vm4, %v4815_v30, %v4855_v7 }
 0xa5b   : > { %vm4832_vm15 = vcmp.ge.f32.partialorder %v4812_v21, 0.0  ;;  %v4852_v45 = vmul.f32 0.1, %v4812_v21  ;;  %4925 = vrot.lane.b32.xlu0 %v8401_v38, %s6428_s9 }
 0xa5c   : > { %v4751_v55 = vpop.permute.xlu0 %4750 }
 0xa5d   : > { %v4872_v3 = vsel %vm4832_vm15, %v4812_v21, %v4852_v45  ;;  %v4777_v8 = vsel %vm4768_vm6, %v4749_v35, %v4751_v55  ;;  %v4778_v26 = vsel %vm4768_vm6, %v4751_v55, %v4753_v54 }
 0xa5e   : > { %v8411_v18 = vpack.c.bf16 %v4872_v3, %v4867_v23  ;;  %v4761_v0 = vpop.permute.xlu1 %4760  ;;  %v4816_v24 = vsel %vm6991_vm2, %v4777_v8, 0.0  ;;  %v4817_v39 = vsel %vm6981_vm1, %v4778_v26, 0.0  ;;  %v9003_v26 = vld [vmem:[#allocation20_spill] sm:$0xff] }
 0xa5f   : > { %4927 = vrot.lane.b32.xlu0 %v8409_v15, %s6428_s9  ;;  %v4856_v37 = vmul.f32 0.1, %v4816_v24  ;;  %vm4836_vm11 = vcmp.ge.f32.partialorder %v4816_v24, 0.0  ;;  %v4857_v21 = vmul.f32 0.1, %v4817_v39 }
 0xa60   : > { %v4755_v53 = vpop.permute.xlu0 %4754  ;;  %4929 = vrot.lane.b32.xlu1 %v8411_v18, %s6428_s9 }
 0xa61   : > { %v4779_v16 = vsel %vm4768_vm6, %v4753_v54, %v4755_v53  ;;  %v4876_v27 = vsel %vm4836_vm11, %v4816_v24, %v4856_v37  ;;  %v8991_v37 = vld [vmem:[#allocation28_spill] sm:$0xff] }
 0xa62   : > { %v4757_v41 = vpop.permute.xlu1 %4756  ;;  %v4818_v44 = vsel %vm7031_vm7, %v4779_v16, 0.0  ;;  %v8997_v16 = vld [vmem:[#allocation18_spill] sm:$0xff] }
 0xa63   : > { %v4858_v56 = vmul.f32 0.1, %v4818_v44  ;;  %v4780_v42 = vsel %vm4768_vm6, %v4755_v53, %v4757_v41 }
 0xa64   : > { %v4759_v11 = vpop.permute.xlu0 %4758  ;;  %v4819_v52 = vsel %vm7024_vm3, %v4780_v42, 0.0 }
 0xa65   : > { %v4781_v14 = vsel %vm4768_vm6, %v4759_v11, %v4761_v0  ;;  %v4820_v22 = vsel %vm6967_vm9, %v4759_v11, 0.0  ;;  %vm4828_vm9 = vcmp.ge.f32.partialorder %v4808_v36, 0.0  ;;  %v4859_v8 = vmul.f32 0.1, %v4819_v52 }
 0xa66   : > { %v4821_v47 = vsel %vm6991_vm2, %v4781_v14, 0.0  ;;  %v4765_v49 = vpop.permute.xlu1 %4764  ;;  %vm4840_vm10 = vcmp.ge.f32.partialorder %v4820_v22, 0.0  ;;  %v4860_v62 = vmul.f32 0.1, %v4820_v22  ;;  %v4868_v20 = vsel %vm4828_vm9, %v4808_v36, %v4848_v12  ;;  %v9000_v36 = vld [vmem:[#allocation19_spill] sm:$0xff] }
 0xa67   : > { %vm4841_vm12 = vcmp.ge.f32.partialorder %v4821_v47, 0.0  ;;  %v4861_v63 = vmul.f32 0.1, %v4821_v47 }
 0xa68   : > { %v4763_v43 = vpop.permute.xlu0 %4762  ;;  %v4880_v2 = vsel %vm4840_vm10, %v4820_v22, %v4860_v62  ;;  %vm5267_vm10 = vcmask 941056  }
 0xa69   : > { %v4783_v31 = vsel %vm4768_vm6, %v4763_v43, %v4765_v49  ;;  %v8431_v29 = vpack.c.bf16 %v4880_v2, %v4875_v59  ;;  %v4881_v58 = vsel %vm4841_vm12, %v4821_v47, %v4861_v63  ;;  %v4782_v46 = vsel %vm4768_vm6, %v4761_v0, %v4763_v43  ;;  %v5861_v63 = vld [vmem:[%s8798_s2 + $0xb0] sm:$0xff]  ;;  %v5860_v43 = vld [vmem:[%s8798_s2 + $0xa8] sm:$0xff] }
 0xa6a   : > { %v4737_v25 = vpop.permute.xlu1 %4736  ;;  %v4823_v9 = vsel %vm7031_vm7, %v4783_v31, 0.0  ;;  %v4891_v48 = vpack.c.bf16 %v4881_v58, %v4876_v27  ;;  %v4822_v5 = vsel %vm6981_vm1, %v4782_v46, 0.0  ;;  %vm4838_vm1 = vcmp.ge.f32.partialorder %v4818_v44, 0.0  ;;  %v8990_v59 = vld [vmem:[#allocation30_spill] sm:$0xff]  ;;  %v8995_v2 = vld [vmem:[#allocation25_spill] sm:$0xff]  ;;  %v9001_v58 = vld [vmem:[#allocation35_spill] sm:$0xff] }
 0xa6b   : > { %4935 = vrot.lane.b32.xlu1 %v8431_v29, %s6428_s9  ;;  %v4863_v4 = vmul.f32 0.1, %v4823_v9  ;;  %vm4843_vm2 = vcmp.ge.f32.partialorder %v4823_v9, 0.0  ;;  %v4862_v40 = vmul.f32 0.1, %v4822_v5  ;;  %vm4842_vm0 = vcmp.ge.f32.partialorder %v4822_v5, 0.0 }
 0xa6c   : > { %v4767_v33 = vpop.permute.xlu0 %4766  ;;  %v4772_v17 = vsel %vm4768_vm6, %v8384_v60, %v4737_v25  ;;  %v4878_v3 = vsel %vm4838_vm1, %v4818_v44, %v4858_v56  ;;  %v8996_v31 = vld [vmem:[#allocation22_spill] sm:$0xff]  ;;  %v8999_v25 = vld [vmem:[#allocation32_spill] sm:$0xff]  ;;  %v9002_v46 = vld [vmem:[#allocation21_spill] sm:$0xff] }
 0xa6d   : > { %v4784_v13 = vsel %vm4768_vm6, %v4765_v49, %v4767_v33  ;;  %v4883_v54 = vsel %vm4843_vm2, %v4823_v9, %v4863_v4  ;;  %v4882_v0 = vsel %vm4842_vm0, %v4822_v5, %v4862_v40  ;;  %v4809_v41 = vsel %vm7024_vm3, %v4772_v17, 0.0  ;;  %v9004_v9 = vld [vmem:[#allocation31_spill] sm:$0xff] }
 0xa6e   : > { %v4745_v10 = vpop.permute.xlu1 %4744  ;;  %v4893_v30 = vpack.c.bf16 %v4883_v54, %v4878_v3  ;;  %v4849_v14 = vmul.f32 0.1, %v4809_v41  ;;  %vm4829_vm4 = vcmp.ge.f32.partialorder %v4809_v41, 0.0 }
 0xa6f   : > { %v4775_v35 = vsel %vm4768_vm6, %v8399_v50, %v4745_v10  ;;  %4937 = vrot.lane.b32.xlu1 %v4891_v48, %s6428_s9  ;;  %v4824_v50 = vsel %vm7024_vm3, %v4784_v13, 0.0 }
 0xa70   : > { %v4813_v51 = vsel %vm7031_vm7, %v4775_v35, 0.0  ;;  %v4747_v6 = vpop.permute.xlu0 %4746  ;;  %vm4837_vm7 = vcmp.ge.f32.partialorder %v4817_v39, 0.0  ;;  %v4864_v53 = vmul.f32 0.1, %v4824_v50  ;;  %vm4844_vm14 = vcmp.ge.f32.partialorder %v4824_v50, 0.0 }
 0xa71   : > { %vm4833_vm13 = vcmp.ge.f32.partialorder %v4813_v51, 0.0  ;;  %v4853_v32 = vmul.f32 0.1, %v4813_v51  ;;  %v4776_v1 = vsel %vm4768_vm6, %v4745_v10, %v4747_v6  ;;  %v4877_v60 = vsel %vm4837_vm7, %v4817_v39, %v4857_v21 }
 0xa72   : > { %v4814_v23 = vsel %vm7024_vm3, %v4776_v1, 0.0  ;;  %vm4839_vm6 = vcmp.ge.f32.partialorder %v4819_v52, 0.0  ;;  %v4892_v7 = vpack.c.bf16 %v4882_v0, %v4877_v60  ;;  %v4884_v24 = vsel %vm4844_vm14, %v4824_v50, %v4864_v53 }
 0xa73   : > { %v4873_v45 = vsel %vm4833_vm13, %v4813_v51, %v4853_v32  ;;  %5096 = vrot.lane.b32.xlu1 %v4891_v48, %s6425_s27  ;;  %v4854_v11 = vmul.f32 0.1, %v4814_v23  ;;  %vm4834_vm15 = vcmp.ge.f32.partialorder %v4814_v23, 0.0  ;;  %v4879_v22 = vsel %vm4839_vm6, %v4819_v52, %v4859_v8 }
 0xa74   : > { %v4888_v55 = vpack.c.bf16 %v4873_v45, %v4868_v20  ;;  %v4894_v28 = vpack.c.bf16 %v4884_v24, %v4879_v22  ;;  %v4869_v49 = vsel %vm4829_vm4, %v4809_v41, %v4849_v14  ;;  %vm4945_vm3 = vcmask 949248   ;;  %v6221_v20 = vld [vmem:[#allocation5 + $0x100] sm:$0xff]  }
 0xa75   : > { %v4874_v47 = vsel %vm4834_vm15, %v4814_v23, %v4854_v11 }
 0xa76   : > { %4931 = vrot.lane.b32.xlu0 %v4888_v55, %s6428_s9  ;;  %v4889_v62 = vpack.c.bf16 %v4874_v47, %v4869_v49 }
 0xa77   : > { %4941 = vrot.lane.b32.xlu1 %v4893_v30, %s6428_s9 }
 0xa7a   : > { %4939 = vrot.lane.b32.xlu0 %v4892_v7, %s6428_s9 }
 0xa7b   : > { %5100 = vrot.lane.b32.xlu1 %v4893_v30, %s6425_s27 }
 0xa7e   : > { %4943 = vrot.lane.b32.xlu0 %v4894_v28, %s6428_s9 }
 0xa7f   : > { %4933 = vrot.lane.b32.xlu1 %v4889_v62, %s6428_s9 }
 0xa82   : > { %5098 = vrot.lane.b32.xlu0 %v4892_v7, %s6425_s27 }
 0xa83   : > { %5094 = vrot.lane.b32.xlu1 %v8431_v29, %s6425_s27 }
 0xa86   : > { %5102 = vrot.lane.b32.xlu0 %v4894_v28, %s6425_s27 }
 0xa87   : > { %5088 = vrot.lane.b32.xlu1 %v8411_v18, %s6425_s27 }
 0xa8a   : > { %5086 = vrot.lane.b32.xlu0 %v8409_v15, %s6425_s27 }
 0xa8b   : > { %5259 = vrot.lane.b32.xlu1 %v4891_v48, %s6429_s24 }
 0xa8e   : > { %5090 = vrot.lane.b32.xlu0 %v4888_v55, %s6425_s27 }
 0xa8f   : > { %5092 = vrot.lane.b32.xlu1 %v4889_v62, %s6425_s27 }
 0xa92   : > { %5084 = vrot.lane.b32.xlu0 %v8401_v38, %s6425_s27 }
 0xa93   : > { %5263 = vrot.lane.b32.xlu1 %v4893_v30, %s6429_s24  ;;  %v6222_v30 = vld [vmem:[#allocation5 + $0x108] sm:$0xff]  }
 0xa96   : > { %5261 = vrot.lane.b32.xlu0 %v4892_v7, %s6429_s24 }
 0xa97   : > { %5257 = vrot.lane.b32.xlu1 %v8431_v29, %s6429_s24  ;;  %v8998_v29 = vld [vmem:[#allocation17_spill] sm:$0xff] }
 0xa9a   : > { %5265 = vrot.lane.b32.xlu0 %v4894_v28, %s6429_s24  ;;  %v6223_v28 = vld [vmem:[#allocation5 + $0xf0] sm:$0xff]  }
 0xa9b   : > { %5251 = vrot.lane.b32.xlu1 %v8411_v18, %s6429_s24  ;;  %v8989_v18 = vld [vmem:[#allocation16_spill] sm:$0xff] }
 0xa9e   : > { %5249 = vrot.lane.b32.xlu0 %v8409_v15, %s6429_s24  ;;  %v5862_v15 = vld [vmem:[%s8798_s2 + $0xb8] sm:$0xff] }
 0xa9f   : > { %5255 = vrot.lane.b32.xlu1 %v4889_v62, %s6429_s24 }
 0xaa2   : > { %5253 = vrot.lane.b32.xlu0 %v4888_v55, %s6429_s24  ;;  %v9005_v55 = vmov 0  }
 0xaa3   : > { %5419 = vperm.xlu1 %6190, %v5859_v19  }
 0xaa6   : > { %5247 = vrot.lane.b32.xlu0 %v8401_v38, %s6429_s24  ;;  %v8988_v38 = vld [vmem:[#allocation27_spill] sm:$0xff] }
 0xaa7   : > { %5429 = vperm.xlu1 %6190, %v5861_v63  }
 0xaaa   : > { %5424 = vperm.xlu0 %6189, %v5860_v43  }
 0xaab   : > { %5473 = vrot.lane.b32.xlu1 %v7979_v57, %s6428_s9  ;;  %v8992_v57 = vld [vmem:[#allocation23_spill] sm:$0xff] }
 0xaae   : > { %5434 = vperm.xlu0 %6189, %v5862_v15  }
 0xaaf   : > { %5477 = vrot.lane.b32.xlu1 %v8006_v61, %s6428_s9  ;;  %v8993_v61 = vld [vmem:[#allocation34_spill] sm:$0xff] }
 0xab2   : > { %5475 = vrot.lane.b32.xlu0 %v7985_v34, %s6428_s9  ;;  %v8994_v34 = vld [vmem:[#allocation33_spill] sm:$0xff] }
 0xab3   : > { %5481 = vrot.lane.b32.xlu1 %v8988_v38, %s6428_s9 }
 0xab6   : > { %5479 = vrot.lane.b32.xlu0 %v8989_v18, %s6428_s9  ;;  %v6224_v18 = vld [vmem:[#allocation5 + $0xf8] sm:$0xff]  }
 0xab7   : > { %5485 = vrot.lane.b32.xlu1 %v8990_v59, %s6428_s9 }
 0xaba   : > { %5483 = vrot.lane.b32.xlu0 %v8991_v37, %s6428_s9 }
 0xabb   : > { %5489 = vrot.lane.b32.xlu1 %v8992_v57, %s6428_s9 }
 0xabe   : > { %5487 = vrot.lane.b32.xlu0 %v8993_v61, %s6428_s9 }
 0xabf   : > { %5493 = vrot.lane.b32.xlu1 %v8994_v34, %s6428_s9 }
 0xac2   : > { %5491 = vrot.lane.b32.xlu0 %v8995_v2, %s6428_s9 }
 0xac3   : > { %5497 = vrot.lane.b32.xlu1 %v8996_v31, %s6428_s9 }
 0xac6   : > { %5495 = vrot.lane.b32.xlu0 %v8997_v16, %s6428_s9 }
 0xac7   : > { %5501 = vrot.lane.b32.xlu1 %v8998_v29, %s6428_s9  ;;  %v6225_v29 = vld [vmem:[#allocation5 + $0x110] sm:$0xff]  }
 0xaca   : > { %5499 = vrot.lane.b32.xlu0 %v8999_v25, %s6428_s9 }
 0xacb   : > { %5505 = vrot.lane.b32.xlu1 %v9000_v36, %s6428_s9 }
 0xacd   : > { %v4926_v27 = vpop.permute.xlu0 %4925 }
 0xace   : > { %5503 = vrot.lane.b32.xlu0 %v9001_v58, %s6428_s9  ;;  %v6226_v58 = vld [vmem:[#allocation5 + $0x118] sm:$0xff]  }
 0xacf   : > { %5509 = vrot.lane.b32.xlu1 %v9002_v46, %s6428_s9 }
 0xad1   : > { %v4928_v48 = vpop.permute.xlu0 %4927 }
 0xad2   : > { %5507 = vrot.lane.b32.xlu0 %v9003_v26, %s6428_s9  ;;  %v4930_v33 = vpop.permute.xlu1 %4929  ;;  %v4946_v40 = vsel %vm4945_vm3, %v4926_v27, %v4928_v48 }
 0xad3   : > { %v4947_v42 = vsel %vm4945_vm3, %v4928_v48, %v4930_v33 }
 0xad6   : > { %5511 = vrot.lane.b32.xlu0 %v9004_v9, %s6428_s9  ;;  %s9006_s9 = sld [smem:[#allocation37_spill]] }
 0xadc   : > { %s8730_s24 = scalar_lea.hbm %s9006_s9, %s5866_s30 }
 0xadd   : > { %v4936_v44 = vpop.permute.xlu1 %4935 }
 0xae1   : > { %v4938_v12 = vpop.permute.xlu1 %4937 }
 0xae2   : > { %v4950_v35 = vsel %vm4945_vm3, %v4936_v44, %v4938_v12 }
 0xae5   : > { %v5097_v5 = vpop.permute.xlu1 %5096 }
 0xae8   : > { %v4932_v10 = vpop.permute.xlu0 %4931 }
 0xae9   : > { %v4942_v39 = vpop.permute.xlu1 %4941  ;;  %v4948_v17 = vsel %vm4945_vm3, %v4930_v33, %v4932_v10 }
 0xaec   : > { %v4940_v4 = vpop.permute.xlu0 %4939 }
 0xaed   : > { %v4951_v13 = vsel %vm4945_vm3, %v4938_v12, %v4940_v4  ;;  %v5101_v56 = vpop.permute.xlu1 %5100  ;;  %v4952_v32 = vsel %vm4945_vm3, %v4940_v4, %v4942_v39 }
 0xaee   : > { %4980 = vmatprep.subr.bf16.mxu1 %v4951_v13 }
 0xaef   : > { %4981 = vmatpush1.bf16.msra.mxu1 %v4950_v35 }
 0xaf0   : > { %v4944_v51 = vpop.permute.xlu0 %4943  ;;  %4982 = vmatprep.subr.bf16.mxu1 %v4947_v42 }
 0xaf1   : > { %v4953_v6 = vsel %vm4945_vm3, %v4942_v39, %v4944_v51  ;;  %v4934_v1 = vpop.permute.xlu1 %4933 }
 0xaf2   : > { %5033 = vmatprep.subr.bf16.mxu0 %v4953_v6  ;;  %v4949_v50 = vsel %vm4945_vm3, %v4932_v10, %v4934_v1 }
 0xaf3   : > { %4983 = vmatpush1.bf16.msra.mxu1 %v4946_v40  ;;  %5034 = vmatpush1.bf16.msra.mxu0 %v4952_v32 }
 0xaf4   : > { %v5099_v21 = vpop.permute.xlu0 %5098  ;;  %5035 = vmatprep.subr.bf16.mxu0 %v4949_v50 }
 0xaf5   : > { %v5109_v54 = vsel %vm4039_vm8, %v5097_v5, %v5099_v21  ;;  %v5095_v45 = vpop.permute.xlu1 %5094  ;;  %v5110_v0 = vsel %vm4039_vm8, %v5099_v21, %v5101_v56 }
 0xaf6   : > { %5138 = vmatprep.subr.bf16.mxu1 %v5109_v54  ;;  %5843 = vmatmul.mubr.msk.bf16.vlgmr.msra.gmra.mxu1 %vm423_vm5, %v6221_v20  ;;  %v5108_v52 = vsel %vm4039_vm8, %v5095_v45, %v5097_v5 }
 0xaf7   : > { %5036 = vmatpush1.bf16.msra.mxu0 %v4948_v17  ;;  %5010 = vmatprep.mubr.bf16.mxu1 %v9005_v55 }
 0xaf8   : > { %5139 = vmatpush1.bf16.msra.mxu1 %v5108_v52  ;;  %v5103_v23 = vpop.permute.xlu0 %5102 }
 0xaf9   : > { %v5111_v3 = vsel %vm4039_vm8, %v5101_v56, %v5103_v23  ;;  %v5089_v53 = vpop.permute.xlu1 %5088 }
 0xafa   : > { %5845 = vmatmul.mubr.msk.bf16.vlgmr.msra.gmra.mxu0 %vm423_vm5, %v6221_v20  ;;  %5191 = vmatprep.subr.bf16.mxu0 %v5111_v3 }
 0xafb   : > { %5192 = vmatpush1.bf16.msra.mxu0 %v5110_v0  ;;  %5063 = vmatprep.mubr.bf16.mxu0 %v9005_v55 }
 0xafc   : > { %v5087_v41 = vpop.permute.xlu0 %5086 }
 0xafd   : > { %v5105_v60 = vsel %vm4039_vm8, %v5087_v41, %v5089_v53  ;;  %v5260_v8 = vpop.permute.xlu1 %5259 }
 0xafe   : > { %5140 = vmatprep.subr.bf16.mxu1 %v5105_v60  ;;  %5844 = vmatmul.mubr.msk.bf16.gmra.mxu1 %vm423_vm5, %v6222_v30 }
 0xaff   : > { %5158 = vmatprep.mubr.bf16.mxu1 %v9005_v55 }
 0xb00   : > { %v5091_v11 = vpop.permute.xlu0 %5090 }
 0xb01   : > { %v5093_v7 = vpop.permute.xlu1 %5092  ;;  %v5106_v24 = vsel %vm4039_vm8, %v5089_v53, %v5091_v11 }
 0xb02   : > { %5846 = vmatmul.mubr.msk.bf16.gmra.mxu0 %vm423_vm5, %v6222_v30  ;;  %v5107_v14 = vsel %vm4039_vm8, %v5091_v11, %v5093_v7 }
 0xb03   : > { %5211 = vmatprep.mubr.bf16.mxu0 %v9005_v55  ;;  %5193 = vmatprep.subr.bf16.mxu0 %v5107_v14 }
 0xb04   : > { %v5085_v22 = vpop.permute.xlu0 %5084  ;;  %5194 = vmatpush1.bf16.msra.mxu0 %v5106_v24 }
 0xb05   : > { %v5104_v47 = vsel %vm4039_vm8, %v5085_v22, %v5087_v41  ;;  %v5264_v49 = vpop.permute.xlu1 %5263 }
 0xb06   : > { %5141 = vmatpush1.bf16.msra.mxu1 %v5104_v47 }
 0xb08   : > { %v5262_v62 = vpop.permute.xlu0 %5261 }
 0xb09   : > { %5849 = vmatmul.mubr.msk.bf16.vlgmr.msra.gmra.mxu1 %vm423_vm5, %v6223_v28  ;;  %v5273_v19 = vsel %vm5267_vm10, %v5260_v8, %v5262_v62  ;;  %v5258_v63 = vpop.permute.xlu1 %5257  ;;  %v5274_v59 = vsel %vm5267_vm10, %v5262_v62, %v5264_v49 }
 0xb0a   : > { %5851 = vmatmul.mubr.msk.bf16.vlgmr.msra.gmra.mxu0 %vm423_vm5, %v6223_v28  ;;  %5302 = vmatprep.subr.bf16.mxu1 %v5273_v19  ;;  %v5272_v43 = vsel %vm5267_vm10, %v5258_v63, %v5260_v8 }
 0xb0b   : > { %5168 = vmatprep.mubr.bf16.mxu1 %v9005_v55  ;;  %5221 = vmatprep.mubr.bf16.mxu0 %v9005_v55 }
 0xb0c   : > { %5303 = vmatpush1.bf16.msra.mxu1 %v5272_v43  ;;  %v5266_v15 = vpop.permute.xlu0 %5265 }
 0xb0d   : > { %v5275_v38 = vsel %vm5267_vm10, %v5264_v49, %v5266_v15  ;;  %v5252_v37 = vpop.permute.xlu1 %5251 }
 0xb0e   : > { %5355 = vmatprep.subr.bf16.mxu0 %v5275_v38 }
 0xb0f   : > { %5356 = vmatpush1.bf16.msra.mxu0 %v5274_v59 }
 0xb10   : > { %v5250_v57 = vpop.permute.xlu0 %5249 }
 0xb11   : > { %5850 = vmatmul.mubr.msk.bf16.gmra.mxu1 %vm423_vm5, %v6224_v18  ;;  %v5269_v61 = vsel %vm5267_vm10, %v5250_v57, %v5252_v37  ;;  %v5256_v34 = vpop.permute.xlu1 %5255 }
 0xb12   : > { %5852 = vmatmul.mubr.msk.bf16.gmra.mxu0 %vm423_vm5, %v6224_v18  ;;  %5304 = vmatprep.subr.bf16.mxu1 %v5269_v61 }
 0xb13   : > { %5375 = vmatprep.mubr.bf16.mxu0 %v9005_v55  ;;  %5322 = vmatprep.mubr.bf16.mxu1 %v9005_v55 }
 0xb14   : > { %v5254_v2 = vpop.permute.xlu0 %5253 }
 0xb15   : > { %v5270_v31 = vsel %vm5267_vm10, %v5252_v37, %v5254_v2  ;;  %v5271_v16 = vsel %vm5267_vm10, %v5254_v2, %v5256_v34 }
 0xb16   : > { %5357 = vmatprep.subr.bf16.mxu0 %v5271_v16 }
 0xb17   : > { %5358 = vmatpush1.bf16.msra.mxu0 %v5270_v31 }
 0xb18   : > { %v5248_v25 = vpop.permute.xlu0 %5247 }
 0xb19   : > { %v5268_v36 = vsel %vm5267_vm10, %v5248_v25, %v5250_v57 }
 0xb1a   : > { %5305 = vmatpush1.bf16.msra.mxu1 %v5268_v36  ;;  %5857 = vmatmul.mubr.msk.bf16.vlgmr.msra.gmra.mxu0 %vm423_vm5, %v6225_v29 }
 0xb1b   : > { %5385 = vmatprep.mubr.bf16.mxu0 %v9005_v55 }
 0xb1d   : > { %5855 = vmatmul.mubr.msk.bf16.vlgmr.msra.gmra.mxu1 %vm423_vm5, %v6225_v29 }
 0xb1e   : > { %5332 = vmatprep.mubr.bf16.mxu1 %v9005_v55  ;;  %v8587_v46 = vpop.permute.xlu1 %5419 }
 0xb22   : > { %5858 = vmatmul.mubr.msk.bf16.gmra.mxu0 %vm423_vm5, %v6226_v58  ;;  %v8591_v9 = vpop.permute.xlu1 %5429 }
 0xb25   : > { %5856 = vmatmul.mubr.msk.bf16.gmra.mxu1 %vm423_vm5, %v6226_v58  ;;  %v8589_v26 = vpop.permute.xlu0 %5424 }
 0xb26   : > { %v5474_v27 = vpop.permute.xlu1 %5473 }
 0xb29   : > { %v8593_v33 = vpop.permute.xlu0 %5434 }
 0xb2a   : > { %v5478_v48 = vpop.permute.xlu1 %5477 }
 0xb2d   : > { %v5476_v44 = vpop.permute.xlu0 %5475 }
 0xb2e   : > { %v5482_v56 = vpop.permute.xlu1 %5481  ;;  %v5514_v38 = vsel %vm4945_vm3, %v5474_v27, %v5476_v44  ;;  %v5515_v18 = vsel %vm4945_vm3, %v5476_v44, %v5478_v48 }
 0xb31   : > { %v5480_v10 = vpop.permute.xlu0 %5479 }
 0xb32   : > { %v5486_v50 = vpop.permute.xlu1 %5485  ;;  %v5516_v37 = vsel %vm4945_vm3, %v5478_v48, %v5480_v10  ;;  %v5517_v57 = vsel %vm4945_vm3, %v5480_v10, %v5482_v56 }
 0xb35   : > { %v5484_v6 = vpop.permute.xlu0 %5483 }
 0xb36   : > { %v5490_v23 = vpop.permute.xlu1 %5489  ;;  %v5518_v31 = vsel %vm4945_vm3, %v5484_v6, %v5486_v50 }
 0xb39   : > { %v5488_v54 = vpop.permute.xlu0 %5487 }
 0xb3a   : > { %v5494_v11 = vpop.permute.xlu1 %5493  ;;  %v8642_v16 = vsel %vm4945_vm3, %v5486_v50, %v5488_v54  ;;  %v5520_v29 = vsel %vm4945_vm3, %v5488_v54, %v5490_v23 }
 0xb3d   : > { %v5492_v0 = vpop.permute.xlu0 %5491 }
 0xb3e   : > { %v8623_v49 = vpop.permute.xlu1 %5497  ;;  %v5521_v27 = vsel %vm4945_vm3, %v5490_v23, %v5492_v0 }
 0xb41   : > { %v8617_v14 = vpop.permute.xlu0 %5495 }
 0xb42   : > { %v5502_v25 = vpop.permute.xlu1 %5501  ;;  %v8651_v56 = vsel %vm4945_vm3, %v5494_v11, %v8617_v14 }
 0xb45   : > { %v5500_v19 = vpop.permute.xlu0 %5499 }
 0xb46   : > { %v5524_v6 = vsel %vm4945_vm3, %v8623_v49, %v5500_v19 }
 0xb49   : > { %v8646_v44 = vpop.permute.xlu0 %5503 }
 0xbb6   : > { %v5002_v12 = vpop.f32.mrf.mxu1 }
 0xbb8   : > { %v8595_v5 = vpop.f32.mrf.mxu1 }
 0xbba   : > { %v5055_v39 = vpop.f32.mrf.mxu0  ;;  %v8597_v4 = vpop.f32.mrf.mxu1 }
 0xbbc   : > { %v5057_v13 = vpop.f32.mrf.mxu0  ;;  %v8599_v35 = vpop.f32.mrf.mxu1 }
 0xbbe   : > { %v5059_v42 = vpop.f32.mrf.mxu0  ;;  %v8601_v51 = vpop.f32.mrf.mxu1 }
 0xbc0   : > { %v5061_v40 = vpop.f32.mrf.mxu0  ;;  %v8603_v32 = vpop.f32.mrf.mxu1 }
 0xbc2   : > { %v8605_v1 = vpop.f32.mrf.mxu0  ;;  %v8607_v20 = vpop.f32.mrf.mxu1 }
 0xbc4   : > { %v8609_v21 = vpop.f32.mrf.mxu0  ;;  %v8613_v45 = vpop.f32.mrf.mxu1 }
 0xbc6   : > { %v8611_v17 = vpop.f32.mrf.mxu0 }
 0xbc8   : > { %v8615_v52 = vpop.f32.mrf.mxu0 }
 0xbc9   : > { %v5160_v55 = vpop.f32.mrf.mxu1 }
 0xbca   : > { %v5213_v3 = vpop.f32.mrf.mxu0  ;;  %v5161_v36 = vadd.f32 %v5160_v55, %v5002_v12 }
 0xbcb   : > { %v5162_v53 = vpop.f32.mrf.mxu1  ;;  %v5214_v15 = vadd.f32 %v5213_v3, %v5055_v39 }
 0xbcc   : > { %v5215_v30 = vpop.f32.mrf.mxu0  ;;  %v5163_v50 = vadd.f32 %v5162_v53, %v8595_v5 }
 0xbcd   : > { %v5164_v41 = vpop.f32.mrf.mxu1  ;;  %v5216_v61 = vadd.f32 %v5215_v30, %v5057_v13  ;;  %v5525_v30 = vsel %vm4945_vm3, %v5500_v19, %v5502_v25  ;;  %v8665_v19 = vpop.permute.xlu1 %5505 }
 0xbce   : > { %v5217_v60 = vpop.f32.mrf.mxu0 }
 0xbcf   : > { %v5166_v8 = vpop.f32.mrf.mxu1  ;;  %v5218_v48 = vadd.f32 %v5217_v60, %v5059_v42  ;;  %v5165_v60 = vadd.f32 %v5164_v41, %v8597_v4 }
 0xbd0   : > { %v5219_v7 = vpop.f32.mrf.mxu0  ;;  %v5167_v4 = vadd.f32 %v5166_v8, %v8599_v35 }
 0xbd1   : > { %v8619_v24 = vpop.f32.mrf.mxu1  ;;  %v5220_v55 = vadd.f32 %v5219_v7, %v5061_v40 }
 0xbd2   : > { %v5223_v22 = vpop.f32.mrf.mxu0  ;;  %v5171_v35 = vadd.f32 %v8619_v24, %v8601_v51 }
 0xbd3   : > { %v8621_v47 = vpop.f32.mrf.mxu1 }
 0xbd4   : > { %v5225_v28 = vpop.f32.mrf.mxu0  ;;  %v5173_v51 = vadd.f32 %v8621_v47, %v8603_v32  ;;  %v5510_v32 = vpop.permute.xlu1 %5509 }
 0xbd5   : > { %v8627_v63 = vpop.f32.mrf.mxu1  ;;  %v5226_v25 = vadd.f32 %v5225_v28, %v8609_v21 }
 0xbd6   : > { %v8625_v62 = vpop.f32.mrf.mxu0  ;;  %v5175_v47 = vadd.f32 %v8627_v63, %v8607_v20 }
 0xbd7   : > { %v8636_v34 = vpop.f32.mrf.mxu1  ;;  %v5228_v21 = vadd.f32 %v8625_v62, %v8611_v17 }
 0xbd8   : > { %v8629_v43 = vpop.f32.mrf.mxu0  ;;  %v5177_v63 = vadd.f32 %v8636_v34, %v8613_v45 }
 0xbd9   : > { %v5230_v17 = vadd.f32 %v8629_v43, %v8615_v52 }
 0xbda   : > { %v5377_v59 = vpop.f32.mrf.mxu0 }
 0xbdb   : > { %v5398_v2 = vadd.f32 %v5377_v59, %v5214_v15 }
 0xbdc   : > { %v5379_v58 = vpop.f32.mrf.mxu0 }
 0xbdd   : > { %v5439_v10 = vadd.f32 %v8587_v46, %v5398_v2  ;;  %v5399_v39 = vadd.f32 %v5379_v58, %v5216_v61  ;;  %v5324_v13 = vpop.f32.mrf.mxu1  ;;  %v5224_v61 = vadd.f32 %v5223_v22, %v8605_v1  ;;  %v8669_v22 = vpop.permute.xlu0 %5507 }
 0xbde   : > { %v5396_v12 = vadd.f32 %v5324_v13, %v5161_v36  ;;  %v5381_v54 = vpop.f32.mrf.mxu0  ;;  %v5528_v52 = vsel %vm4945_vm3, %v8669_v22, %v5510_v32 }
 0xbdf   : > { %v5548_v23 = vadd.f32 %v5516_v37, %v5439_v10  ;;  %v5440_v3 = vadd.f32 %v8587_v46, %v5399_v39  ;;  %v5402_v42 = vadd.f32 %v5381_v54, %v5218_v48  ;;  %v5326_v0 = vpop.f32.mrf.mxu1 }
 0xbe0   : > { %v5437_v11 = vadd.f32 %v8587_v46, %v5396_v12  ;;  %v5397_v15 = vadd.f32 %v5326_v0, %v5163_v50  ;;  %v5383_v59 = vpop.f32.mrf.mxu0 }
 0xbe1   : > { %5564 = vst [vmem:[%s8661_s8 + $0x10] sm:$0xff] %v5548_v23  ;;  %v5549_v5 = vadd.f32 %v5517_v57, %v5440_v3  ;;  %v5443_v40 = vadd.f32 %v8589_v26, %v5402_v42  ;;  %v5403_v53 = vadd.f32 %v5383_v59, %v5220_v55  ;;  %v5328_v7 = vpop.f32.mrf.mxu1  ;;  %v5512_v43 = vpop.permute.xlu0 %5511 }
 0xbe2   : > { %v5546_v41 = vadd.f32 %v5514_v38, %v5437_v11  ;;  %v5438_v37 = vadd.f32 %v8587_v46, %v5397_v15  ;;  %v5400_v2 = vadd.f32 %v5328_v7, %v5165_v60  ;;  %v5387_v1 = vpop.f32.mrf.mxu0  ;;  %v5529_v45 = vsel %vm4945_vm3, %v5510_v32, %v5512_v43 }
 0xbe3   : > { %5565 = vst [vmem:[%s8661_s8 + $0x18] sm:$0xff] %v5549_v5  ;;  %v5552_v57 = vadd.f32 %v5520_v29, %v5443_v40  ;;  %v5444_v36 = vadd.f32 %v8589_v26, %v5403_v53  ;;  %v5406_v58 = vadd.f32 %v5387_v1, %v5224_v61  ;;  %v5330_v48 = vpop.f32.mrf.mxu1  ;;  %v5527_v53 = vsel %vm4945_vm3, %v8665_v19, %v8669_v22 }
 0xbe4   : > { %5562 = vst [vmem:[%s8661_s8] sm:$0xff] %v5546_v41  ;;  %v5547_v8 = vadd.f32 %v5515_v18, %v5438_v37  ;;  %v5441_v46 = vadd.f32 %v8589_v26, %v5400_v2  ;;  %v5401_v38 = vadd.f32 %v5330_v48, %v5167_v4  ;;  %v5389_v10 = vpop.f32.mrf.mxu0 }
 0xbe5   : > { %5568 = vst [vmem:[%s8661_s8 + $0x30] sm:$0xff] %v5552_v57  ;;  %v5553_v28 = vadd.f32 %v5521_v27, %v5444_v36  ;;  %v5447_v29 = vadd.f32 %v8591_v9, %v5406_v58  ;;  %v5407_v39 = vadd.f32 %v5389_v10, %v5226_v25  ;;  %v5334_v13 = vpop.f32.mrf.mxu1 }
 0xbe6   : > { %5563 = vst [vmem:[%s8661_s8 + $0x8] sm:$0xff] %v5547_v8  ;;  %v5550_v24 = vadd.f32 %v5518_v31, %v5441_v46  ;;  %v5442_v18 = vadd.f32 %v8589_v26, %v5401_v38  ;;  %v5404_v50 = vadd.f32 %v5334_v13, %v5171_v35  ;;  %v5391_v12 = vpop.f32.mrf.mxu0 }
 0xbe7   : > { %5569 = vst [vmem:[%s8661_s8 + $0x38] sm:$0xff] %v5553_v28  ;;  %v5556_v62 = vadd.f32 %v5524_v6, %v5447_v29  ;;  %v5448_v27 = vadd.f32 %v8591_v9, %v5407_v39  ;;  %v5410_v54 = vadd.f32 %v5391_v12, %v5228_v21  ;;  %v5336_v55 = vpop.f32.mrf.mxu1 }
 0xbe8   : > { %5566 = vst [vmem:[%s8661_s8 + $0x20] sm:$0xff] %v5550_v24  ;;  %v5551_v26 = vadd.f32 %v8642_v16, %v5442_v18  ;;  %v5445_v31 = vadd.f32 %v8591_v9, %v5404_v50  ;;  %v5405_v23 = vadd.f32 %v5336_v55, %v5173_v51  ;;  %v5393_v3 = vpop.f32.mrf.mxu0 }
 0xbe9   : > { %5572 = vst [vmem:[%s8661_s8 + $0x50] sm:$0xff] %v5556_v62  ;;  %v5557_v6 = vadd.f32 %v5525_v30, %v5448_v27  ;;  %v5451_v42 = vadd.f32 %v8593_v33, %v5410_v54  ;;  %v5411_v0 = vadd.f32 %v5393_v3, %v5230_v17  ;;  %v5338_v20 = vpop.f32.mrf.mxu1  ;;  %v5523_v30 = vsel %vm4945_vm3, %v8617_v14, %v8623_v49 }
 0xbea   : > { %5567 = vst [vmem:[%s8661_s8 + $0x28] sm:$0xff] %v5551_v26  ;;  %v5554_v16 = vadd.f32 %v8651_v56, %v5445_v31  ;;  %v5446_v60 = vadd.f32 %v8591_v9, %v5405_v23  ;;  %v5408_v11 = vadd.f32 %v5338_v20, %v5175_v47  ;;  %v5526_v14 = vsel %vm4945_vm3, %v8646_v44, %v8665_v19 }
 0xbeb   : > { %5573 = vst [vmem:[%s8661_s8 + $0x58] sm:$0xff] %v5557_v6  ;;  %v5560_v15 = vadd.f32 %v5528_v52, %v5451_v42  ;;  %v5452_v59 = vadd.f32 %v8593_v33, %v5411_v0  ;;  %v5340_v61 = vpop.f32.mrf.mxu1 }
 0xbec   : > { %5570 = vst [vmem:[%s8661_s8 + $0x40] sm:$0xff] %v5554_v16  ;;  %v5555_v34 = vadd.f32 %v5523_v30, %v5446_v60  ;;  %v5449_v9 = vadd.f32 %v8593_v33, %v5408_v11  ;;  %v5409_v56 = vadd.f32 %v5340_v61, %v5177_v63 }
 0xbed   : > { %5576 = vst [vmem:[%s8661_s8 + $0x70] sm:$0xff] %v5560_v15  ;;  %v5561_v49 = vadd.f32 %v5529_v45, %v5452_v59 }
 0xbee   : > { %5571 = vst [vmem:[%s8661_s8 + $0x48] sm:$0xff] %v5555_v34  ;;  %v5558_v5 = vadd.f32 %v5526_v14, %v5449_v9  ;;  %v5450_v40 = vadd.f32 %v8593_v33, %v5409_v56 }
 0xbef   : > { %5577 = vst [vmem:[%s8661_s8 + $0x78] sm:$0xff] %v5561_v49 }
 0xbf0   : > { %5574 = vst [vmem:[%s8661_s8 + $0x60] sm:$0xff] %v5558_v5  ;;  %v5559_v44 = vadd.f32 %v5527_v53, %v5450_v40 }
 0xbf2   : > { %5575 = vst [vmem:[%s8661_s8 + $0x68] sm:$0xff] %v5559_v44 }
 0xbf3   : > { %6294 = shalt.err (!%p6291_p8)
}
 0xbf4   : > { %s6295_s27 = scalar_lea.hbm %s8730_s24, 2048  ;;  %s6299_s6 = scalar_lea.hbm %s9006_s9, 8192 }
 0xbf5   : > { %p6296_p7 = scmp.ne.s32.totalorder %s8730_s24, %s6295_s27  ;;  %p6300_p12 = scmp.lt.s32.totalorder %s8730_s24, %s9006_s9 }
 0xbf6   : > { %p6301_p2 = scmp.lt.s32.totalorder %s6299_s6, %s6295_s27 }
 0xbf7   : > { %p6297_p9 = pnand %p6296_p7, %p9007_p3 }
 0xbf8   : > { %p6302_p4 = por %p6301_p2, %p6300_p12 }
 0xbf9   : > { %p6298_p10 = pneg %p6297_p9 }
 0xbfb   : > { %p6303_p1 = pnand %p6302_p4, %p6298_p10 }
 0xbfd   : > { %6306 = shalt.err (!%p6303_p1)
}
 0xbfe   : > { %s6431_s3 = smov 512   ;;  %s6432_s29 = smov 1024  }
 0xbff   : > { %s6433_s18 = smov 32  }
 0xc00   : > { %6058 = dma.vmem_to_hbm [thread:$0]  (%p9007_p3), %s8721_s19, 2048, %s8730_s24, %s8736_s23, %s6431_s3, %s6432_s29, %s6433_s18  }
 0xc01 PF: > { %s9008_s30 = sld [smem:[#allocation11_spill]]  ;;  %p6075_p11 = scmp.ge.s32.totalorder %s6405_s22, 2 }
 0xc02   : > { %s9009_s15 = sld [smem:[#allocation13_spill]] }
 0xc07   : > { %s5609_s25 = sand.u32 1, %s9008_s30  }
 0xc08   : > { %p9010_p0 = scmp.ne.s32.totalorder %s9009_s15, 0  ;;  %s5610_s26 = scalar_lea.sflag [#allocation4], %s5609_s25 }
 0xc0a   : > { %p6069_p13 = pnand %p6075_p11, %p9010_p0 }
 0xc0c   : > { %p6070_p5 = pneg %p6069_p13 }
 0xc0e   : > { %6360 = dma.done.wait (%p6070_p5), %s5610_s26, 2048  }
 0xc0f   : > { %6362 = vsyncadd (%p6070_p5), %s5610_s26, 4294965248  ;;  %s20_s22 = sadd.s32 1, %s6405_s22   ;;  %s9011_s18 = sld [smem:[#allocation12_spill]] }
 0xc10   : > { %p17_p6 = scmp.ge.s32.totalorder %s20_s22, 6   ;;  %s9012_s20 = sld [smem:[#allocation14_spill]] }
 0xc11   : > { %s9013_s28 = sld [smem:[#allocation15_spill]]  ;;  %s9014_s12 = smov %s6369_s13 }
 0xc12   : > { %s9015_s13 = smov %s6373_s14  ;;  %s9016_s14 = smov %s6574_s1 }
 0xc13   : > { %s9017_s15 = smov %s6381_s16  ;;  %s9018_s16 = smov %s6385_s17 }
 0xc14   : > { %s9019_s17 = smov %s6569_s10  ;;  %s9020_s19 = smov %s6401_s21 }
 0xc15   :  { %19 = sbr.rel (!%p17_p6) target bundleno = 13 (0xd), region = 104 }
 0xc17   : > { %s9021_s21 = smov %s9013_s28 }
 0xc1a   :  { %5615 = vsyncpa [#allocation3], 1 }
 0xc1b   :  { %5617 = vsyncpa [#allocation3 + $0x1], 1 }
 0xc1c   :  { %5618 = vsyncpa [#allocation6], 1 }
 0xc1d   :  { %5619 = vsyncpa [#allocation4], 1 }
 0xc1e   :  { %5621 = vsyncpa [#allocation4 + $0x1], 1 }

</bundles_post_ra>
